<compile_context>
chip_gen: v7x
topology: tpu7x:2x2x1
jax: 0.10.0
libtpu: 0.0.40
codegen_flags: <defaults>
</compile_context>

<pallas_src>
import functools

import numpy as np

import jax
import jax.numpy as jnp
from jax import lax
from jax.experimental import pallas as pl
from jax.experimental.pallas import tpu as pltpu

GN_GROUPS = 8
GN_EPS = 1e-5


def _pick_nb(n, rows_per_sample, target_rows=256):
    """Samples per grid step: fill MXU M dim, keep >=2 grid steps if possible."""
    divs = [d for d in range(1, n + 1) if n % d == 0]
    cands = [d for d in divs if n // d >= 2] or [n]
    best = 1
    for d in cands:
        if d * rows_per_sample <= target_rows:
            best = max(best, d)
    return best


# ---------------------------------------------------------------------------
# Fused kernel: NB samples per grid step.
#   x_ref     : (NB, D, H*W*Cin)        bf16  lane-dense input slab
#   w0_ref    : (H*W*Cin, H*W*Cin)      bf16  block-diagonal 1x1x1 conv weight
#   b0/gamma/beta : (1, H*W*Cin)        f32   per-channel params tiled over H*W
#   fold_ref  : (H*W*Cin, G)            f32   channel->group fold
#   unfold_ref: (G, H*W*Cin)            f32   group->channel unfold
#   wb_ref    : (3, H*W*Cin, Ho*Wo*Cout) bf16 banded 3x3x3 weights per kd
#   bias_ref  : (1, Ho*Wo*Cout)         f32
#   o_ref     : (NB, Do, Ho*Wo*Cout)    f32   lane-dense output slab
#   zp_ref    : (NB, D+2, H*W*Cin)      bf16  VMEM scratch, D halo only
# ---------------------------------------------------------------------------
def _fused_spatial3d_kernel(x_ref, w0_ref, b0_ref, gamma_ref, beta_ref,
                            fold_ref, unfold_ref, wb_ref, bias_ref,
                            o_ref, zp_ref, *, dims):
    NB, D, H, W, Cin, Do, Ho, Wo, Cout, stride, groups = dims
    HWC = H * W * Cin
    NoC = Ho * Wo * Cout
    cg = Cin // groups

    # --- conv0 (1x1x1) as one lane-dense matmul (block-diagonal weight) -----
    x = x_ref[...].reshape(NB * D, HWC)                               # bf16
    y = jnp.dot(x, w0_ref[...], preferred_element_type=jnp.float32)
    y = y + b0_ref[...]                                               # (NB*D, HWC) f32

    # --- GroupNorm(groups): one-pass per-sample stats via stacked folds -----
    y3 = y.reshape(NB, D, HWC)
    s1 = jnp.sum(y3, axis=1)                                          # (NB, HWC)
    s2 = jnp.sum(y3 * y3, axis=1)                                     # (NB, HWC)
    cnt = float(D * H * W * cg)
    g = jnp.dot(jnp.concatenate([s1, s2], axis=0), fold_ref[...],
                preferred_element_type=jnp.float32) / cnt             # (2*NB, G)
    mean_g = g[:NB]
    var_g = g[NB:] - mean_g * mean_g
    rstd_g = lax.rsqrt(var_g + GN_EPS)
    loc = jnp.dot(jnp.concatenate([mean_g, rstd_g], axis=0), unfold_ref[...],
                  preferred_element_type=jnp.float32)                 # (2*NB, HWC)
    mean_l, rstd_l = loc[:NB], loc[NB:]
    scale = rstd_l * gamma_ref[...]                                   # (NB, HWC)
    shift = beta_ref[...] - mean_l * scale
    zn = y3 * scale[:, None, :] + shift[:, None, :]                   # (NB, D, HWC)
    z = zn * jax.nn.sigmoid(zn)                                       # SiLU, f32

    # --- stage into the bf16 scratch; only the D halo lives here (kh/kw taps
    #     and H/W zero padding are folded into the banded weights) -----------
    zp_ref[:, 0:1, :] = jnp.zeros((NB, 1, HWC), zp_ref.dtype)
    zp_ref[:, D + 1:D + 2, :] = jnp.zeros((NB, 1, HWC), zp_ref.dtype)
    zp_ref[:, 1:1 + D, :] = z.astype(zp_ref.dtype)
    zp = zp_ref[...]                                                  # (NB, D+2, HWC)

    # --- 3x3x3 conv: 3 banded matmuls over kd, K = H*W*Cin -------------------
    span = (Do - 1) * stride + 1

    def tap(kd):
        slab = zp[:, kd:kd + span:stride, :]                          # (NB, Do, HWC)
        return jnp.dot(slab.reshape(NB * Do, HWC), wb_ref[kd],
                       preferred_element_type=jnp.float32)            # (NB*Do, NoC)

    acc = tap(0) + tap(1) + tap(2)
    o_ref[...] = (acc + bias_ref[...]).reshape(NB, Do, NoC).astype(o_ref.dtype)


# ---------------------------------------------------------------------------
# Wrapper: layout plumbing + one-time weight re-layout (kron / banding).
# ---------------------------------------------------------------------------
def spatial3d_block_forward(x, params, *, stride, nb=None):
    """x: (N, C, D, H, W) float32, params in PyTorch conventions."""
    N, Cin, D, H, W = x.shape
    Cout = params["conv_w"].shape[0]
    # Module spec: conv0 preserves the channel count and GroupNorm(8, Cin).
    assert params["conv0_w"].shape[0] == Cin and params["conv0_w"].shape[1] == Cin
    assert Cin % GN_GROUPS == 0
    G = GN_GROUPS
    cg = Cin // G

    Do = (D + 2 - 3) // stride + 1
    Ho = (H + 2 - 3) // stride + 1
    Wo = (W + 2 - 3) // stride + 1
    HWC = H * W * Cin
    NoC = Ho * Wo * Cout

    if nb is None:
        nb = _pick_nb(N, D)
    assert N % nb == 0

    # NCDHW -> lane-dense bf16 (N, D, H*W*Cin); cast fused with the transpose.
    x_l = jnp.transpose(x, (0, 2, 3, 4, 1)).reshape(N, D, HWC).astype(jnp.bfloat16)

    # conv0 1x1x1 as a block-diagonal (H*W*Cin, H*W*Cin) matrix.
    w0m = params["conv0_w"][:, :, 0, 0, 0].T                          # (Cin_in, Cin_out)
    w0_big = jnp.kron(jnp.eye(H * W, dtype=w0m.dtype), w0m).astype(jnp.bfloat16)
    b0_l = jnp.tile(params["conv0_b"], H * W).reshape(1, HWC)
    gamma_l = jnp.tile(params["gn_gamma"], H * W).reshape(1, HWC)
    beta_l = jnp.tile(params["gn_beta"], H * W).reshape(1, HWC)

    # GroupNorm channel->group fold / unfold matrices (precomputed constants).
    onehot = np.zeros((Cin, G), np.float32)
    onehot[np.arange(Cin), np.arange(Cin) // cg] = 1.0
    fold = jnp.asarray(np.tile(onehot, (H * W, 1)))                   # (HWC, G)
    unfold = jnp.asarray(np.tile(onehot, (H * W, 1)).T)               # (G, HWC)

    # 3x3x3 conv -> 3 banded (H*W*Cin, Ho*Wo*Cout) matrices: for each kd, the
    # (kh, kw) taps and the H/W zero padding are placed via an (H*W, Ho*Wo) band.
    w_t = jnp.transpose(params["conv_w"], (2, 3, 4, 1, 0))            # (3,3,3,Cin,Cout)
    band = np.zeros((3, 3, H * W, Ho * Wo), np.float32)
    for kh in range(3):
        for kw in range(3):
            for oh in range(Ho):
                ih = oh * stride + kh - 1
                if not (0 <= ih < H):
                    continue
                for ow in range(Wo):
                    iw = ow * stride + kw - 1
                    if 0 <= iw < W:
                        band[kh, kw, ih * W + iw, oh * Wo + ow] = 1.0
    wb = jnp.stack([
        sum(jnp.kron(jnp.asarray(band[kh, kw]), w_t[kd, kh, kw])
            for kh in range(3) for kw in range(3))
        for kd in range(3)
    ]).astype(jnp.bfloat16)                                           # (3, HWC, NoC)
    bias_l = jnp.tile(params["conv_b"], Ho * Wo).reshape(1, NoC)

    kern = functools.partial(
        _fused_spatial3d_kernel,
        dims=(nb, D, H, W, Cin, Do, Ho, Wo, Cout, stride, G))

    const = dict(pipeline_mode=pl.Buffered(1))   # grid-invariant: single-buffer

    out = pl.pallas_call(
        kern,
        out_shape=jax.ShapeDtypeStruct((N, Do, NoC), jnp.float32),
        grid=(N // nb,),
        in_specs=[
            pl.BlockSpec((nb, D, HWC), lambda n: (n, 0, 0)),                 # x
            pl.BlockSpec((HWC, HWC), lambda n: (0, 0), **const),             # w0
            pl.BlockSpec((1, HWC), lambda n: (0, 0), **const),               # b0
            pl.BlockSpec((1, HWC), lambda n: (0, 0), **const),               # gamma
            pl.BlockSpec((1, HWC), lambda n: (0, 0), **const),               # beta
            pl.BlockSpec((HWC, G), lambda n: (0, 0), **const),               # fold
            pl.BlockSpec((G, HWC), lambda n: (0, 0), **const),               # unfold
            pl.BlockSpec((3, HWC, NoC), lambda n: (0, 0, 0), **const),       # taps
            pl.BlockSpec((1, NoC), lambda n: (0, 0), **const),               # bias
        ],
        out_specs=pl.BlockSpec((nb, Do, NoC), lambda n: (n, 0, 0)),
        scratch_shapes=[pltpu.VMEM((nb, D + 2, HWC), jnp.bfloat16)],
        compiler_params=pltpu.CompilerParams(
            dimension_semantics=("parallel",),
            vmem_limit_bytes=48 * 1024 * 1024),
    )(x_l, w0_big, b0_l, gamma_l, beta_l, fold, unfold, wb, bias_l)

    out = out.reshape(N, Do, Ho, Wo, Cout)
    return jnp.transpose(out, (0, 4, 1, 2, 3))                        # back to NCDHW


# ---------------------------------------------------------------------------
# Pure-JAX reference (matches the PyTorch forward semantics).
# ---------------------------------------------------------------------------
def reference_forward(x, params, *, stride):
    y = lax.conv_general_dilated(
        x, params["conv0_w"], window_strides=(1, 1, 1), padding="VALID",
        dimension_numbers=("NCDHW", "OIDHW", "NCDHW"))
    y = y + params["conv0_b"].reshape(1, -1, 1, 1, 1)

    N, C, D, H, W = y.shape
    yg = y.reshape(N, GN_GROUPS, C // GN_GROUPS, D, H, W)
    mean = yg.mean(axis=(2, 3, 4, 5), keepdims=True)
    var = ((yg - mean) ** 2).mean(axis=(2, 3, 4, 5), keepdims=True)
    yn = ((yg - mean) / jnp.sqrt(var + GN_EPS)).reshape(N, C, D, H, W)
    yn = yn * params["gn_gamma"].reshape(1, -1, 1, 1, 1) \
         + params["gn_beta"].reshape(1, -1, 1, 1, 1)
    z = yn * jax.nn.sigmoid(yn)

    out = lax.conv_general_dilated(
        z, params["conv_w"], window_strides=(stride,) * 3,
        padding=[(1, 1)] * 3, dimension_numbers=("NCDHW", "OIDHW", "NCDHW"))
    return out + params["conv_b"].reshape(1, -1, 1, 1, 1)


if __name__ == "__main__":
    N, C_in, D, H, W = 2, 8, 8, 8, 8      # GroupNorm(8, c) needs C_in % 8 == 0
    C_out = 16
    stride = 1

    key = jax.random.PRNGKey(0)
    ks = jax.random.split(key, 8)
    x = jax.random.normal(ks[0], (N, C_in, D, H, W), jnp.float32)
    params = {
        "conv0_w": 0.3 * jax.random.normal(ks[1], (C_in, C_in, 1, 1, 1), jnp.float32),
        "conv0_b": 0.1 * jax.random.normal(ks[2], (C_in,), jnp.float32),
        "gn_gamma": 1.0 + 0.1 * jax.random.normal(ks[3], (C_in,), jnp.float32),
        "gn_beta": 0.1 * jax.random.normal(ks[4], (C_in,), jnp.float32),
        "conv_w": 0.1 * jax.random.normal(ks[5], (C_out, C_in, 3, 3, 3), jnp.float32),
        "conv_b": 0.1 * jax.random.normal(ks[6], (C_out,), jnp.float32),
    }

    fwd = jax.jit(functools.partial(spatial3d_block_forward, stride=stride))
    out = jax.block_until_ready(fwd(x, params))

    ref = reference_forward(x, params, stride=stride)
    assert out.shape == ref.shape, (out.shape, ref.shape)
    max_err = float(jnp.max(jnp.abs(out - ref)))
    # bf16 MXU operands with f32 accumulation -> slightly looser tolerance than pure f32.
    assert max_err < 2e-2, max_err

    print("KERNEL_OK")
</pallas_src>

<mosaic_0001>
module attributes {stable_mosaic.version = 11 : i64} {
  func.func @_fused_spatial3d_kernel(%arg0: i32, %arg1: memref<1x8x512xbf16, #tpu.memory_space<vmem>>, %arg2: memref<512x512xbf16, #tpu.memory_space<vmem>>, %arg3: memref<1x512xf32, #tpu.memory_space<vmem>>, %arg4: memref<1x512xf32, #tpu.memory_space<vmem>>, %arg5: memref<1x512xf32, #tpu.memory_space<vmem>>, %arg6: memref<512x8xf32, #tpu.memory_space<vmem>>, %arg7: memref<8x512xf32, #tpu.memory_space<vmem>>, %arg8: memref<3x512x1024xbf16, #tpu.memory_space<vmem>>, %arg9: memref<1x1024xf32, #tpu.memory_space<vmem>>, %arg10: memref<1x8x1024xf32, #tpu.memory_space<vmem>>, %arg11: memref<1x10x512xbf16, #tpu.memory_space<vmem>>) attributes {dimension_semantics = [#tpu.dimension_semantics<parallel>], iteration_bounds = array<i64: 2>, scalar_prefetch = 0 : i64, scratch_operands = 1 : i64, tpu.core_type = #tpu.core_type<tc>, window_params = [{transform_indices = @transform_0, window_bounds = array<i64: 1, 8, 512>}, {pipeline_mode = #tpu.pipeline_mode<synchronous>, transform_indices = @transform_1, window_bounds = array<i64: 512, 512>}, {pipeline_mode = #tpu.pipeline_mode<synchronous>, transform_indices = @transform_2, window_bounds = array<i64: 1, 512>}, {pipeline_mode = #tpu.pipeline_mode<synchronous>, transform_indices = @transform_3, window_bounds = array<i64: 1, 512>}, {pipeline_mode = #tpu.pipeline_mode<synchronous>, transform_indices = @transform_4, window_bounds = array<i64: 1, 512>}, {pipeline_mode = #tpu.pipeline_mode<synchronous>, transform_indices = @transform_5, window_bounds = array<i64: 512, 8>}, {pipeline_mode = #tpu.pipeline_mode<synchronous>, transform_indices = @transform_6, window_bounds = array<i64: 8, 512>}, {pipeline_mode = #tpu.pipeline_mode<synchronous>, transform_indices = @transform_7, window_bounds = array<i64: 3, 512, 1024>}, {pipeline_mode = #tpu.pipeline_mode<synchronous>, transform_indices = @transform_8, window_bounds = array<i64: 1, 1024>}, {transform_indices = @transform_9, window_bounds = array<i64: 1, 8, 1024>}]} {
    %c0 = arith.constant 0 : index
    %c0_0 = arith.constant 0 : index
    %c0_1 = arith.constant 0 : index
    %0 = vector.load %arg1[%c0, %c0_0, %c0_1] : memref<1x8x512xbf16, #tpu.memory_space<vmem>>, vector<1x8x512xbf16>
    %1 = vector.shape_cast %0 : vector<1x8x512xbf16> to vector<8x512xbf16>
    %c0_2 = arith.constant 0 : index
    %c0_3 = arith.constant 0 : index
    %2 = vector.load %arg2[%c0_2, %c0_3] : memref<512x512xbf16, #tpu.memory_space<vmem>>, vector<512x512xbf16>
    %cst = arith.constant dense<0.000000e+00> : vector<8x512xf32>
    %3 = tpu.matmul %1, %2, %cst {dimension_numbers = #tpu.dot_dimension_numbers<[1], [0], [0], [1], [0, 0, 1, 1], [], []>} : vector<8x512xbf16>, vector<512x512xbf16>, vector<8x512xf32> -> vector<8x512xf32>
    %c0_4 = arith.constant 0 : index
    %c0_5 = arith.constant 0 : index
    %4 = vector.load %arg3[%c0_4, %c0_5] : memref<1x512xf32, #tpu.memory_space<vmem>>, vector<1x512xf32>
    %5 = vector.broadcast %4 : vector<1x512xf32> to vector<8x512xf32>
    %6 = arith.addf %3, %5 : vector<8x512xf32>
    %7 = vector.shape_cast %6 : vector<8x512xf32> to vector<1x8x512xf32>
    %cst_6 = arith.constant dense<0.000000e+00> : vector<1x512xf32>
    %8 = vector.multi_reduction <add>, %7, %cst_6 [1] : vector<1x8x512xf32> to vector<1x512xf32>
    %9 = arith.mulf %7, %7 : vector<1x8x512xf32>
    %cst_7 = arith.constant dense<0.000000e+00> : vector<1x512xf32>
    %10 = vector.multi_reduction <add>, %9, %cst_7 [1] : vector<1x8x512xf32> to vector<1x512xf32>
    %11 = tpu.concatenate %8, %10 in 0 : vector<1x512xf32>, vector<1x512xf32> -> vector<2x512xf32>
    %c0_8 = arith.constant 0 : index
    %c0_9 = arith.constant 0 : index
    %12 = vector.load %arg6[%c0_8, %c0_9] : memref<512x8xf32, #tpu.memory_space<vmem>>, vector<512x8xf32>
    %cst_10 = arith.constant dense<0.000000e+00> : vector<2x8xf32>
    %13 = tpu.matmul %11, %12, %cst_10 {dimension_numbers = #tpu.dot_dimension_numbers<[1], [0], [0], [1], [0, 0, 1, 1], [], []>} : vector<2x512xf32>, vector<512x8xf32>, vector<2x8xf32> -> vector<2x8xf32>
    %cst_11 = arith.constant 5.120000e+02 : f32
    %14 = vector.broadcast %cst_11 : f32 to vector<2x8xf32>
    %15 = arith.divf %13, %14 : vector<2x8xf32>
    %16 = vector.extract_strided_slice %15 {offsets = [0, 0], sizes = [1, 8], strides = [1, 1]} : vector<2x8xf32> to vector<1x8xf32>
    %17 = vector.extract_strided_slice %15 {offsets = [1, 0], sizes = [1, 8], strides = [1, 1]} : vector<2x8xf32> to vector<1x8xf32>
    %18 = arith.mulf %16, %16 : vector<1x8xf32>
    %19 = arith.subf %17, %18 : vector<1x8xf32>
    %cst_12 = arith.constant 9.99999974E-6 : f32
    %20 = vector.broadcast %cst_12 : f32 to vector<1x8xf32>
    %21 = arith.addf %19, %20 : vector<1x8xf32>
    %22 = math.rsqrt %21 : vector<1x8xf32>
    %23 = tpu.concatenate %16, %22 in 0 : vector<1x8xf32>, vector<1x8xf32> -> vector<2x8xf32>
    %c0_13 = arith.constant 0 : index
    %c0_14 = arith.constant 0 : index
    %24 = vector.load %arg7[%c0_13, %c0_14] : memref<8x512xf32, #tpu.memory_space<vmem>>, vector<8x512xf32>
    %cst_15 = arith.constant dense<0.000000e+00> : vector<2x512xf32>
    %25 = tpu.matmul %23, %24, %cst_15 {dimension_numbers = #tpu.dot_dimension_numbers<[1], [0], [0], [1], [0, 0, 1, 1], [], []>} : vector<2x8xf32>, vector<8x512xf32>, vector<2x512xf32> -> vector<2x512xf32>
    %26 = vector.extract_strided_slice %25 {offsets = [0, 0], sizes = [1, 512], strides = [1, 1]} : vector<2x512xf32> to vector<1x512xf32>
    %27 = vector.extract_strided_slice %25 {offsets = [1, 0], sizes = [1, 512], strides = [1, 1]} : vector<2x512xf32> to vector<1x512xf32>
    %c0_16 = arith.constant 0 : index
    %c0_17 = arith.constant 0 : index
    %28 = vector.load %arg4[%c0_16, %c0_17] : memref<1x512xf32, #tpu.memory_space<vmem>>, vector<1x512xf32>
    %29 = arith.mulf %27, %28 : vector<1x512xf32>
    %c0_18 = arith.constant 0 : index
    %c0_19 = arith.constant 0 : index
    %30 = vector.load %arg5[%c0_18, %c0_19] : memref<1x512xf32, #tpu.memory_space<vmem>>, vector<1x512xf32>
    %31 = arith.mulf %26, %29 : vector<1x512xf32>
    %32 = arith.subf %30, %31 : vector<1x512xf32>
    %33 = vector.shape_cast %29 : vector<1x512xf32> to vector<1x1x512xf32>
    %34 = vector.broadcast %33 : vector<1x1x512xf32> to vector<1x8x512xf32>
    %35 = arith.mulf %7, %34 : vector<1x8x512xf32>
    %36 = vector.shape_cast %32 : vector<1x512xf32> to vector<1x1x512xf32>
    %37 = vector.broadcast %36 : vector<1x1x512xf32> to vector<1x8x512xf32>
    %38 = arith.addf %35, %37 : vector<1x8x512xf32>
    %39 = arith.negf %38 : vector<1x8x512xf32>
    %40 = math.exp %39 : vector<1x8x512xf32>
    %cst_20 = arith.constant 1.000000e+00 : f32
    %41 = vector.broadcast %cst_20 : f32 to vector<1x8x512xf32>
    %42 = arith.addf %41, %40 : vector<1x8x512xf32>
    %43 = arith.divf %41, %42 : vector<1x8x512xf32>
    %44 = arith.mulf %38, %43 : vector<1x8x512xf32>
    %cst_21 = arith.constant 0.000000e+00 : bf16
    %45 = vector.broadcast %cst_21 : bf16 to vector<1x1x512xbf16>
    %c0_22 = arith.constant 0 : index
    %c0_23 = arith.constant 0 : index
    %c0_24 = arith.constant 0 : index
    %46 = vector.load %arg11[%c0_22, %c0_23, %c0_24] : memref<1x10x512xbf16, #tpu.memory_space<vmem>>, vector<1x1x512xbf16>
    tpu.vector_store %arg11[%c0_22, %c0_23, %c0_24], %45 {strides = array<i32>} : memref<1x10x512xbf16, #tpu.memory_space<vmem>>, vector<1x1x512xbf16>,
    %cst_25 = arith.constant 0.000000e+00 : bf16
    %47 = vector.broadcast %cst_25 : bf16 to vector<1x1x512xbf16>
    %c0_26 = arith.constant 0 : index
    %c9 = arith.constant 9 : index
    %c0_27 = arith.constant 0 : index
    %48 = vector.load %arg11[%c0_26, %c9, %c0_27] : memref<1x10x512xbf16, #tpu.memory_space<vmem>>, vector<1x1x512xbf16>
    tpu.vector_store %arg11[%c0_26, %c9, %c0_27], %47 {strides = array<i32>} : memref<1x10x512xbf16, #tpu.memory_space<vmem>>, vector<1x1x512xbf16>,
    %49 = arith.truncf %44 : vector<1x8x512xf32> to vector<1x8x512xbf16>
    %c0_28 = arith.constant 0 : index
    %c1 = arith.constant 1 : index
    %c0_29 = arith.constant 0 : index
    %50 = vector.load %arg11[%c0_28, %c1, %c0_29] : memref<1x10x512xbf16, #tpu.memory_space<vmem>>, vector<1x8x512xbf16>
    tpu.vector_store %arg11[%c0_28, %c1, %c0_29], %49 {strides = array<i32>} : memref<1x10x512xbf16, #tpu.memory_space<vmem>>, vector<1x8x512xbf16>,
    %c0_30 = arith.constant 0 : index
    %c0_31 = arith.constant 0 : index
    %c0_32 = arith.constant 0 : index
    %51 = vector.load %arg11[%c0_30, %c0_31, %c0_32] : memref<1x10x512xbf16, #tpu.memory_space<vmem>>, vector<1x10x512xbf16>
    %52 = vector.extract_strided_slice %51 {offsets = [0, 0, 0], sizes = [1, 8, 512], strides = [1, 1, 1]} : vector<1x10x512xbf16> to vector<1x8x512xbf16>
    %53 = vector.shape_cast %52 : vector<1x8x512xbf16> to vector<8x512xbf16>
    %c0_33 = arith.constant 0 : index
    %c0_34 = arith.constant 0 : index
    %c0_35 = arith.constant 0 : index
    %54 = vector.load %arg8[%c0_33, %c0_34, %c0_35] : memref<3x512x1024xbf16, #tpu.memory_space<vmem>>, vector<1x512x1024xbf16>
    %55 = vector.shape_cast %54 : vector<1x512x1024xbf16> to vector<512x1024xbf16>
    %cst_36 = arith.constant dense<0.000000e+00> : vector<8x1024xf32>
    %56 = tpu.matmul %53, %55, %cst_36 {dimension_numbers = #tpu.dot_dimension_numbers<[1], [0], [0], [1], [0, 0, 1, 1], [], []>} : vector<8x512xbf16>, vector<512x1024xbf16>, vector<8x1024xf32> -> vector<8x1024xf32>
    %57 = vector.extract_strided_slice %51 {offsets = [0, 1, 0], sizes = [1, 8, 512], strides = [1, 1, 1]} : vector<1x10x512xbf16> to vector<1x8x512xbf16>
    %58 = vector.shape_cast %57 : vector<1x8x512xbf16> to vector<8x512xbf16>
    %c1_37 = arith.constant 1 : index
    %c0_38 = arith.constant 0 : index
    %c0_39 = arith.constant 0 : index
    %59 = vector.load %arg8[%c1_37, %c0_38, %c0_39] : memref<3x512x1024xbf16, #tpu.memory_space<vmem>>, vector<1x512x1024xbf16>
    %60 = vector.shape_cast %59 : vector<1x512x1024xbf16> to vector<512x1024xbf16>
    %cst_40 = arith.constant dense<0.000000e+00> : vector<8x1024xf32>
    %61 = tpu.matmul %58, %60, %cst_40 {dimension_numbers = #tpu.dot_dimension_numbers<[1], [0], [0], [1], [0, 0, 1, 1], [], []>} : vector<8x512xbf16>, vector<512x1024xbf16>, vector<8x1024xf32> -> vector<8x1024xf32>
    %62 = arith.addf %56, %61 : vector<8x1024xf32>
    %63 = vector.extract_strided_slice %51 {offsets = [0, 2, 0], sizes = [1, 8, 512], strides = [1, 1, 1]} : vector<1x10x512xbf16> to vector<1x8x512xbf16>
    %64 = vector.shape_cast %63 : vector<1x8x512xbf16> to vector<8x512xbf16>
    %c2 = arith.constant 2 : index
    %c0_41 = arith.constant 0 : index
    %c0_42 = arith.constant 0 : index
    %65 = vector.load %arg8[%c2, %c0_41, %c0_42] : memref<3x512x1024xbf16, #tpu.memory_space<vmem>>, vector<1x512x1024xbf16>
    %66 = vector.shape_cast %65 : vector<1x512x1024xbf16> to vector<512x1024xbf16>
    %cst_43 = arith.constant dense<0.000000e+00> : vector<8x1024xf32>
    %67 = tpu.matmul %64, %66, %cst_43 {dimension_numbers = #tpu.dot_dimension_numbers<[1], [0], [0], [1], [0, 0, 1, 1], [], []>} : vector<8x512xbf16>, vector<512x1024xbf16>, vector<8x1024xf32> -> vector<8x1024xf32>
    %68 = arith.addf %62, %67 : vector<8x1024xf32>
    %c0_44 = arith.constant 0 : index
    %c0_45 = arith.constant 0 : index
    %69 = vector.load %arg9[%c0_44, %c0_45] : memref<1x1024xf32, #tpu.memory_space<vmem>>, vector<1x1024xf32>
    %70 = vector.broadcast %69 : vector<1x1024xf32> to vector<8x1024xf32>
    %71 = arith.addf %68, %70 : vector<8x1024xf32>
    %72 = vector.shape_cast %71 : vector<8x1024xf32> to vector<1x8x1024xf32>
    %c0_46 = arith.constant 0 : index
    %c0_47 = arith.constant 0 : index
    %c0_48 = arith.constant 0 : index
    %73 = vector.load %arg10[%c0_46, %c0_47, %c0_48] : memref<1x8x1024xf32, #tpu.memory_space<vmem>>, vector<1x8x1024xf32>
    tpu.vector_store %arg10[%c0_46, %c0_47, %c0_48], %72 {strides = array<i32>} : memref<1x8x1024xf32, #tpu.memory_space<vmem>>, vector<1x8x1024xf32>,
    return
  }
  func.func @transform_0(%arg0: i32) -> (i32, i32, i32) {
    %c0_i32 = arith.constant 0 : i32
    %c0_i32_0 = arith.constant 0 : i32
    %c0_i32_1 = arith.constant 0 : i32
    return %arg0, %c0_i32, %c0_i32_0 : i32, i32, i32
  }
  func.func @transform_1(%arg0: i32) -> (i32, i32) {
    %c0_i32 = arith.constant 0 : i32
    %c0_i32_0 = arith.constant 0 : i32
    %c0_i32_1 = arith.constant 0 : i32
    return %c0_i32, %c0_i32_0 : i32, i32
  }
  func.func @transform_2(%arg0: i32) -> (i32, i32) {
    %c0_i32 = arith.constant 0 : i32
    %c0_i32_0 = arith.constant 0 : i32
    %c0_i32_1 = arith.constant 0 : i32
    return %c0_i32, %c0_i32_0 : i32, i32
  }
  func.func @transform_3(%arg0: i32) -> (i32, i32) {
    %c0_i32 = arith.constant 0 : i32
    %c0_i32_0 = arith.constant 0 : i32
    %c0_i32_1 = arith.constant 0 : i32
    return %c0_i32, %c0_i32_0 : i32, i32
  }
  func.func @transform_4(%arg0: i32) -> (i32, i32) {
    %c0_i32 = arith.constant 0 : i32
    %c0_i32_0 = arith.constant 0 : i32
    %c0_i32_1 = arith.constant 0 : i32
    return %c0_i32, %c0_i32_0 : i32, i32
  }
  func.func @transform_5(%arg0: i32) -> (i32, i32) {
    %c0_i32 = arith.constant 0 : i32
    %c0_i32_0 = arith.constant 0 : i32
    %c0_i32_1 = arith.constant 0 : i32
    return %c0_i32, %c0_i32_0 : i32, i32
  }
  func.func @transform_6(%arg0: i32) -> (i32, i32) {
    %c0_i32 = arith.constant 0 : i32
    %c0_i32_0 = arith.constant 0 : i32
    %c0_i32_1 = arith.constant 0 : i32
    return %c0_i32, %c0_i32_0 : i32, i32
  }
  func.func @transform_7(%arg0: i32) -> (i32, i32, i32) {
    %c0_i32 = arith.constant 0 : i32
    %c0_i32_0 = arith.constant 0 : i32
    %c0_i32_1 = arith.constant 0 : i32
    %c0_i32_2 = arith.constant 0 : i32
    return %c0_i32, %c0_i32_0, %c0_i32_1 : i32, i32, i32
  }
  func.func @transform_8(%arg0: i32) -> (i32, i32) {
    %c0_i32 = arith.constant 0 : i32
    %c0_i32_0 = arith.constant 0 : i32
    %c0_i32_1 = arith.constant 0 : i32
    return %c0_i32, %c0_i32_0 : i32, i32
  }
  func.func @transform_9(%arg0: i32) -> (i32, i32, i32) {
    %c0_i32 = arith.constant 0 : i32
    %c0_i32_0 = arith.constant 0 : i32
    %c0_i32_1 = arith.constant 0 : i32
    return %arg0, %c0_i32, %c0_i32_0 : i32, i32, i32
  }
}

</mosaic_0001>

<bundles_post_ra>
// kernel: tile.38
= control target key start
LH: loop header
LB: loop body
LE: loop exit
PB: predicated region body
PF: predicated region fallthrough
CT: control target
= control target key end

     0   :  { %s64_s0 = inlined_call_operand.vmem [shape: f32[16], index: 0, kind: input, shape index: {}]   ;;  %s65_s1 = inlined_call_operand.vmem [shape: f32[64,16], index: 1, kind: output, shape index: {}]  }
   0x1   :  { %v4_v0 = vld [vmem:[%s64_s0] ss:$0 sm:$0xff] }
   0x2   :  { %5 = vst [vmem:[%s65_s1] sm:$0xff] %v4_v0  ;;  %20 = vst [vmem:[%s65_s1 + $0x8] sm:$0xff] %v4_v0 }
   0x3   :  { %21 = vst [vmem:[%s65_s1 + $0x10] sm:$0xff] %v4_v0  ;;  %22 = vst [vmem:[%s65_s1 + $0x18] sm:$0xff] %v4_v0 }
   0x4   :  { %23 = vst [vmem:[%s65_s1 + $0x20] sm:$0xff] %v4_v0  ;;  %24 = vst [vmem:[%s65_s1 + $0x28] sm:$0xff] %v4_v0 }
   0x5   :  { %25 = vst [vmem:[%s65_s1 + $0x30] sm:$0xff] %v4_v0  ;;  %26 = vst [vmem:[%s65_s1 + $0x38] sm:$0xff] %v4_v0 }

// kernel: tile.39
= control target key start
LH: loop header
LB: loop body
LE: loop exit
PB: predicated region body
PF: predicated region fallthrough
CT: control target
= control target key end

     0   :  { %vm4_vm0 = vcmask 1047556   ;;  %s167_s16 = smov 112   ;;  %s168_s19 = smov 80   ;;  %vm6_vm1 = vcmask 130048   ;;  %vm17_vm2 = vcmask 1048448   ;;  %vm28_vm3 = vcmask 917248   ;;  %s264_s0 = inlined_call_operand.vmem [shape: f32[64,16], index: 0, kind: input, shape index: {}]   ;;  %s265_s1 = inlined_call_operand.vmem [shape: f32[1,1024], index: 1, kind: output, shape index: {}]  }
   0x1   :  { %v139_v0 = vld [vmem:[%s264_s0 + $0x7] ss:$8 sm:$0xf]   ;;  %v143_v2 = vld [vmem:[%s264_s0 + $0x5] ss:$8 sm:$0xf]  }
   0x2   :  { %v140_v1 = vld [vmem:[%s264_s0 + $0x7] ss:$8 sm:$0xf0]   ;;  %v144_v4 = vld [vmem:[%s264_s0 + $0x5] ss:$8 sm:$0xf0]  }
   0x3   :  { %v14_v3 = vsel %vm4_vm0, %v140_v1, %v139_v0  ;;  %v141_v5 = vld [vmem:[%s264_s0 + $0x6] ss:$8 sm:$0xf]   ;;  %v36_v6 = vsel %vm4_vm0, %v144_v4, %v143_v2  ;;  %v145_v9 = vld [vmem:[%s264_s0 + $0x4] ss:$8 sm:$0xf]  }
   0x4   :  { %15 = vrot.lane.b32.xlu0 %v14_v3, %s167_s16  ;;  %v142_v7 = vld [vmem:[%s264_s0 + $0x6] ss:$8 sm:$0xf0]   ;;  %37 = vrot.lane.b32.xlu1 %v36_v6, %s168_s19  ;;  %v146_v10 = vld [vmem:[%s264_s0 + $0x4] ss:$8 sm:$0xf0]  }
   0x5   :  { %v25_v8 = vsel %vm4_vm0, %v142_v7, %v141_v5  ;;  %v47_v11 = vsel %vm4_vm0, %v146_v10, %v145_v9  ;;  %v147_v12 = vld [vmem:[%s264_s0 + $0x3] ss:$8 sm:$0xf]   ;;  %v149_v14 = vld [vmem:[%s264_s0 + $0x2] ss:$8 sm:$0xf]  }
   0x6   :  { %v148_v13 = vld [vmem:[%s264_s0 + $0x3] ss:$8 sm:$0xf0]   ;;  %s169_s30 = smov 96   ;;  %s170_s4 = smov 64   ;;  %vm39_vm4 = vcmask 786048  }
   0x7   :  { %v150_v15 = vld [vmem:[%s264_s0 + $0x2] ss:$8 sm:$0xf0]   ;;  %v58_v16 = vsel %vm4_vm0, %v148_v13, %v147_v12  ;;  %v151_v17 = vld [vmem:[%s264_s0 + $0x1] ss:$8 sm:$0xf]  }
   0x8   :  { %26 = vrot.lane.b32.xlu0 %v25_v8, %s169_s30  ;;  %48 = vrot.lane.b32.xlu1 %v47_v11, %s170_s4  ;;  %v152_v18 = vld [vmem:[%s264_s0 + $0x1] ss:$8 sm:$0xf0]   ;;  %v69_v19 = vsel %vm4_vm0, %v150_v15, %v149_v14  ;;  %v2_v20 = vld [vmem:[%s264_s0] ss:$8 sm:$0xf]  }
   0x9   :  { %v3_v21 = vld [vmem:[%s264_s0] ss:$8 sm:$0xf0]   ;;  %s171_s0 = smov 48   ;;  %s172_s13 = smov 32   ;;  %v80_v23 = vsel %vm4_vm0, %v152_v18, %v151_v17  ;;  %vm50_vm5 = vcmask 654848  }
   0xa   :  { %v5_v22 = vsel %vm4_vm0, %v3_v21, %v2_v20  ;;  %s173_s14 = smov 16   ;;  %vm61_vm6 = vcmask 523648   ;;  %vm72_vm7 = vcmask 392448   ;;  %vm83_vm8 = vcmask 261248  }
   0xb   :  { %7 = vst.msk [vmem:[#allocation0] ss:$8 sm:$0xf] %vm6_vm1, %v5_v22   ;;  %8 = vst.msk [vmem:[#allocation0] ss:$8 sm:$0xf0] %vm6_vm1, %v5_v22  }
   0xc   :  { %59 = vrot.lane.b32.xlu0 %v58_v16, %s171_s0  ;;  %70 = vrot.lane.b32.xlu1 %v69_v19, %s172_s13 }
  0x10   :  { %81 = vrot.lane.b32.xlu0 %v80_v23, %s173_s14 }
  0x76   :  { %v16_v24 = vpop.permute.xlu0 %15   ;;  %v38_v25 = vpop.permute.xlu1 %37  }
  0x77   :  { %18 = vst.msk [vmem:[#allocation0] ss:$8 sm:$0xf] %vm17_vm2, %v16_v24   ;;  %19 = vst.msk [vmem:[#allocation0] ss:$8 sm:$0xf0] %vm17_vm2, %v16_v24  }
  0x7a   :  { %v27_v26 = vpop.permute.xlu0 %26   ;;  %v49_v27 = vpop.permute.xlu1 %48  }
  0x7b   :  { %29 = vst.msk [vmem:[#allocation0] ss:$8 sm:$0xf] %vm28_vm3, %v27_v26   ;;  %30 = vst.msk [vmem:[#allocation0] ss:$8 sm:$0xf0] %vm28_vm3, %v27_v26  }
  0x7c   :  { %40 = vst.msk [vmem:[#allocation0] ss:$8 sm:$0xf] %vm39_vm4, %v38_v25   ;;  %41 = vst.msk [vmem:[#allocation0] ss:$8 sm:$0xf0] %vm39_vm4, %v38_v25  }
  0x7d   :  { %51 = vst.msk [vmem:[#allocation0] ss:$8 sm:$0xf] %vm50_vm5, %v49_v27   ;;  %52 = vst.msk [vmem:[#allocation0] ss:$8 sm:$0xf0] %vm50_vm5, %v49_v27  }
  0x7e   :  { %v60_v28 = vpop.permute.xlu0 %59   ;;  %v71_v29 = vpop.permute.xlu1 %70  }
  0x7f   :  { %62 = vst.msk [vmem:[#allocation0] ss:$8 sm:$0xf] %vm61_vm6, %v60_v28   ;;  %63 = vst.msk [vmem:[#allocation0] ss:$8 sm:$0xf0] %vm61_vm6, %v60_v28  }
  0x80   :  { %73 = vst.msk [vmem:[#allocation0] ss:$8 sm:$0xf] %vm72_vm7, %v71_v29   ;;  %74 = vst.msk [vmem:[#allocation0] ss:$8 sm:$0xf0] %vm72_vm7, %v71_v29  }
  0x82   :  { %v82_v30 = vpop.permute.xlu0 %81  }
  0x83   :  { %84 = vst.msk [vmem:[#allocation0] ss:$8 sm:$0xf] %vm83_vm8, %v82_v30   ;;  %85 = vst.msk [vmem:[#allocation0] ss:$8 sm:$0xf0] %vm83_vm8, %v82_v30  }
  0x8a   :  { %v89_v31 = vld [vmem:[#allocation0] sm:$0x1]  ;;  %v93_v32 = vld [vmem:[#allocation0 + $0x8] sm:$0x1]  ;;  %v98_v33 = vld [vmem:[#allocation0 + $0x10] sm:$0x1] }
  0x8b   :  { %91 = vst [vmem:[%s265_s1] sm:$0x1] %v89_v31  ;;  %153 = vst [vmem:[%s265_s1 + $0x1] sm:$0x1] %v93_v32  ;;  %v104_v34 = vld [vmem:[#allocation0 + $0x18] sm:$0x1] }
  0x8c   :  { %154 = vst [vmem:[%s265_s1 + $0x2] sm:$0x1] %v98_v33  ;;  %v110_v35 = vld [vmem:[#allocation0 + $0x20] sm:$0x1]  ;;  %v116_v36 = vld [vmem:[#allocation0 + $0x28] sm:$0x1] }
  0x8d   :  { %155 = vst [vmem:[%s265_s1 + $0x3] sm:$0x1] %v104_v34  ;;  %156 = vst [vmem:[%s265_s1 + $0x4] sm:$0x1] %v110_v35  ;;  %v122_v37 = vld [vmem:[#allocation0 + $0x30] sm:$0x1] }
  0x8e   :  { %157 = vst [vmem:[%s265_s1 + $0x5] sm:$0x1] %v116_v36  ;;  %v128_v38 = vld [vmem:[#allocation0 + $0x38] sm:$0x1]  ;;  %158 = vst [vmem:[%s265_s1 + $0x6] sm:$0x1] %v122_v37 }
  0x8f   :  { %159 = vst [vmem:[%s265_s1 + $0x7] sm:$0x1] %v128_v38 }

// kernel: tile.23
= control target key start
LH: loop header
LB: loop body
LE: loop exit
PB: predicated region body
PF: predicated region fallthrough
CT: control target
= control target key end

     0   :  { %s64_s0 = inlined_call_operand.vmem [shape: f32[8], index: 0, kind: input, shape index: {}]   ;;  %s65_s1 = inlined_call_operand.vmem [shape: f32[64,8], index: 1, kind: output, shape index: {}]  }
   0x1   :  { %v4_v0 = vld [vmem:[%s64_s0] ss:$0 sm:$0xff] }
   0x2   :  { %5 = vst [vmem:[%s65_s1] sm:$0xff] %v4_v0  ;;  %20 = vst [vmem:[%s65_s1 + $0x8] sm:$0xff] %v4_v0 }
   0x3   :  { %21 = vst [vmem:[%s65_s1 + $0x10] sm:$0xff] %v4_v0  ;;  %22 = vst [vmem:[%s65_s1 + $0x18] sm:$0xff] %v4_v0 }
   0x4   :  { %23 = vst [vmem:[%s65_s1 + $0x20] sm:$0xff] %v4_v0  ;;  %24 = vst [vmem:[%s65_s1 + $0x28] sm:$0xff] %v4_v0 }
   0x5   :  { %25 = vst [vmem:[%s65_s1 + $0x30] sm:$0xff] %v4_v0  ;;  %26 = vst [vmem:[%s65_s1 + $0x38] sm:$0xff] %v4_v0 }

// kernel: tile.24
= control target key start
LH: loop header
LB: loop body
LE: loop exit
PB: predicated region body
PF: predicated region fallthrough
CT: control target
= control target key end

     0   :  { %vm6_vm0 = vcmask 1043458   ;;  %s11_s6 = smov 3  ;;  %s14_s7 = smov 12  ;;  %vm8_vm1 = vcmask 64512   ;;  %vm20_vm2 = vcmask 1048512   ;;  %vm32_vm3 = vcmask 982912   ;;  %s412_s0 = inlined_call_operand.vmem [shape: f32[64,8], index: 0, kind: input, shape index: {}]   ;;  %s413_s1 = inlined_call_operand.vmem [shape: f32[1,512], index: 1, kind: output, shape index: {}]  }
   0x1   :  { %v215_v0 = vld [vmem:[%s412_s0 + $0xf] ss:$16 sm:%s11_s6]   ;;  %s35_s12 = smov 3  ;;  %s38_s15 = smov 12  ;;  %vm44_vm4 = vcmask 917312   ;;  %vm56_vm5 = vcmask 851712  }
   0x2   :  { %v216_v1 = vld [vmem:[%s412_s0 + $0xf] ss:$16 sm:%s14_s7]   ;;  %v219_v3 = vld [vmem:[%s412_s0 + $0xd] ss:$16 sm:%s35_s12]   ;;  %s263_s16 = smov 120   ;;  %s23_s19 = smov 3 }
   0x3   :  { %v17_v2 = vsel %vm6_vm0, %v216_v1, %v215_v0  ;;  %v220_v4 = vld [vmem:[%s412_s0 + $0xd] ss:$16 sm:%s38_s15]   ;;  %s26_s20 = smov 12  ;;  %v217_v6 = vld [vmem:[%s412_s0 + $0xe] ss:$16 sm:%s23_s19]   ;;  %s47_s25 = smov 3 }
   0x4   :  { %18 = vrot.lane.b32.xlu0 %v17_v2, %s263_s16  ;;  %v41_v5 = vsel %vm6_vm0, %v220_v4, %v219_v3  ;;  %v218_v7 = vld [vmem:[%s412_s0 + $0xe] ss:$16 sm:%s26_s20]   ;;  %s264_s26 = smov 104   ;;  %s50_s29 = smov 12  ;;  %vm68_vm6 = vcmask 786112   ;;  %vm80_vm7 = vcmask 720512  }
   0x5   :  { %42 = vrot.lane.b32.xlu1 %v41_v5, %s264_s26  ;;  %v29_v8 = vsel %vm6_vm0, %v218_v7, %v217_v6  ;;  %v221_v9 = vld [vmem:[%s412_s0 + $0xc] ss:$16 sm:%s47_s25]   ;;  %s59_s3 = smov 3  ;;  %s62_s4 = smov 12  ;;  %vm92_vm8 = vcmask 654912   ;;  %vm104_vm9 = vcmask 589312  }
   0x6   :  { %v222_v10 = vld [vmem:[%s412_s0 + $0xc] ss:$16 sm:%s50_s29]   ;;  %s265_s5 = smov 112   ;;  %v223_v12 = vld [vmem:[%s412_s0 + $0xb] ss:$16 sm:%s59_s3]   ;;  %s71_s8 = smov 3 }
   0x7   :  { %v53_v11 = vsel %vm6_vm0, %v222_v10, %v221_v9  ;;  %v224_v13 = vld [vmem:[%s412_s0 + $0xb] ss:$16 sm:%s62_s4]   ;;  %v225_v14 = vld [vmem:[%s412_s0 + $0xa] ss:$16 sm:%s71_s8]   ;;  %s74_s13 = smov 12  ;;  %s266_s14 = smov 96  }
   0x8   :  { %30 = vrot.lane.b32.xlu0 %v29_v8, %s265_s5  ;;  %v65_v15 = vsel %vm6_vm0, %v224_v13, %v223_v12  ;;  %v226_v16 = vld [vmem:[%s412_s0 + $0xa] ss:$16 sm:%s74_s13]   ;;  %s83_s17 = smov 3  ;;  %s86_s18 = smov 12  ;;  %vm116_vm10 = vcmask 523712   ;;  %vm128_vm11 = vcmask 458112  }
   0x9   :  { %54 = vrot.lane.b32.xlu1 %v53_v11, %s266_s14  ;;  %v77_v17 = vsel %vm6_vm0, %v226_v16, %v225_v14  ;;  %v227_v18 = vld [vmem:[%s412_s0 + $0x9] ss:$16 sm:%s83_s17]   ;;  %s95_s23 = smov 3  ;;  %s267_s24 = smov 88   ;;  %vm140_vm12 = vcmask 392512   ;;  %vm152_vm13 = vcmask 326912  }
   0xa   :  { %v228_v19 = vld [vmem:[%s412_s0 + $0x9] ss:$16 sm:%s86_s18]   ;;  %v229_v20 = vld [vmem:[%s412_s0 + $0x8] ss:$16 sm:%s95_s23]   ;;  %s98_s27 = smov 12  ;;  %s107_s30 = smov 3 }
   0xb   :  { %v89_v21 = vsel %vm6_vm0, %v228_v19, %v227_v18  ;;  %v230_v22 = vld [vmem:[%s412_s0 + $0x8] ss:$16 sm:%s98_s27]   ;;  %s110_s2 = smov 12  ;;  %s268_s3 = smov 80   ;;  %v231_v23 = vld [vmem:[%s412_s0 + $0x7] ss:$16 sm:%s107_s30]  }
   0xc   :  { %66 = vrot.lane.b32.xlu0 %v65_v15, %s267_s24  ;;  %s119_s6 = smov 3  ;;  %v101_v24 = vsel %vm6_vm0, %v230_v22, %v229_v20  ;;  %v232_v25 = vld [vmem:[%s412_s0 + $0x7] ss:$16 sm:%s110_s2]   ;;  %s122_s11 = smov 12  ;;  %vm164_vm14 = vcmask 261312   ;;  %vm176_vm15 = vcmask 195712  }
   0xd   :  { %78 = vrot.lane.b32.xlu1 %v77_v17, %s268_s3  ;;  %v233_v26 = vld [vmem:[%s412_s0 + $0x6] ss:$16 sm:%s119_s6]   ;;  %s269_s12 = smov 72   ;;  %s131_s15 = smov 3  ;;  %v113_v28 = vsel %vm6_vm0, %v232_v25, %v231_v23 }
   0xe   :  { %v234_v27 = vld [vmem:[%s412_s0 + $0x6] ss:$16 sm:%s122_s11]   ;;  %s134_s16 = smov 12  ;;  %v235_v29 = vld [vmem:[%s412_s0 + $0x5] ss:$16 sm:%s131_s15]   ;;  %s143_s19 = smov 3 }
   0xf   :  { %s270_s20 = smov 64   ;;  %v236_v30 = vld [vmem:[%s412_s0 + $0x5] ss:$16 sm:%s134_s16]   ;;  %s146_s23 = smov 12  ;;  %v125_v31 = vsel %vm6_vm0, %v234_v27, %v233_v26  ;;  %v237_v32 = vld [vmem:[%s412_s0 + $0x4] ss:$16 sm:%s143_s19]  }
  0x10   :  { %90 = vrot.lane.b32.xlu0 %v89_v21, %s269_s12  ;;  %s155_s26 = smov 3  ;;  %s158_s27 = smov 12  ;;  %v238_v33 = vld [vmem:[%s412_s0 + $0x4] ss:$16 sm:%s146_s23]   ;;  %v137_v34 = vsel %vm6_vm0, %v236_v30, %v235_v29 }
  0x11   :  { %102 = vrot.lane.b32.xlu1 %v101_v24, %s270_s20  ;;  %s271_s28 = smov 56   ;;  %s167_s2 = smov 3  ;;  %v239_v35 = vld [vmem:[%s412_s0 + $0x3] ss:$16 sm:%s155_s26]   ;;  %v149_v37 = vsel %vm6_vm0, %v238_v33, %v237_v32 }
  0x12   :  { %s170_s5 = smov 12  ;;  %s272_s6 = smov 48   ;;  %v240_v36 = vld [vmem:[%s412_s0 + $0x3] ss:$16 sm:%s158_s27]   ;;  %v241_v38 = vld [vmem:[%s412_s0 + $0x2] ss:$16 sm:%s167_s2]  }
  0x13   :  { %s179_s9 = smov 3  ;;  %v242_v39 = vld [vmem:[%s412_s0 + $0x2] ss:$16 sm:%s170_s5]   ;;  %s182_s14 = smov 12  ;;  %v161_v41 = vsel %vm6_vm0, %v240_v36, %v239_v35 }
  0x14   :  { %114 = vrot.lane.b32.xlu0 %v113_v28, %s271_s28  ;;  %s2_s15 = smov 3  ;;  %s273_s16 = smov 40   ;;  %v243_v42 = vld [vmem:[%s412_s0 + $0x1] ss:$16 sm:%s179_s9]   ;;  %v173_v46 = vsel %vm6_vm0, %v242_v39, %v241_v38 }
  0x15   :  { %126 = vrot.lane.b32.xlu1 %v125_v31, %s272_s6  ;;  %v3_v40 = vld [vmem:[%s412_s0] ss:$16 sm:%s2_s15]   ;;  %s4_s19 = smov 12  ;;  %s274_s24 = smov 32  }
  0x16   :  { %v5_v43 = vld [vmem:[%s412_s0] ss:$16 sm:%s4_s19]   ;;  %v244_v44 = vld [vmem:[%s412_s0 + $0x1] ss:$16 sm:%s182_s14]   ;;  %s275_s0 = smov 24   ;;  %s276_s27 = smov 16  }
  0x17   :  { %v7_v45 = vsel %vm6_vm0, %v5_v43, %v3_v40  ;;  %v185_v47 = vsel %vm6_vm0, %v244_v44, %v243_v42  ;;  %s277_s28 = smov 8   ;;  %vm188_vm0 = vcmask 130112  }
  0x18   :  { %138 = vrot.lane.b32.xlu0 %v137_v34, %s273_s16  ;;  %9 = vst.msk [vmem:[#allocation0] ss:$8 sm:$0xf] %vm8_vm1, %v7_v45  }
  0x19   :  { %150 = vrot.lane.b32.xlu1 %v149_v37, %s274_s24 }
  0x1c   :  { %162 = vrot.lane.b32.xlu0 %v161_v41, %s275_s0 }
  0x1d   :  { %174 = vrot.lane.b32.xlu1 %v173_v46, %s276_s27 }
  0x20   :  { %186 = vrot.lane.b32.xlu0 %v185_v47, %s277_s28 }
  0x76   :  { %v19_v48 = vpop.permute.xlu0 %18  }
  0x77   :  { %21 = vst.msk [vmem:[#allocation0] ss:$8 sm:$0xf] %vm20_vm2, %v19_v48   ;;  %v43_v49 = vpop.permute.xlu1 %42  }
  0x7a   :  { %v31_v50 = vpop.permute.xlu0 %30  }
  0x7b   :  { %33 = vst.msk [vmem:[#allocation0] ss:$8 sm:$0xf] %vm32_vm3, %v31_v50   ;;  %v55_v51 = vpop.permute.xlu1 %54  }
  0x7c   :  { %45 = vst.msk [vmem:[#allocation0] ss:$8 sm:$0xf] %vm44_vm4, %v43_v49  }
  0x7d   :  { %57 = vst.msk [vmem:[#allocation0] ss:$8 sm:$0xf] %vm56_vm5, %v55_v51  }
  0x7e   :  { %v67_v52 = vpop.permute.xlu0 %66  }
  0x7f   :  { %69 = vst.msk [vmem:[#allocation0] ss:$8 sm:$0xf] %vm68_vm6, %v67_v52   ;;  %v79_v53 = vpop.permute.xlu1 %78  }
  0x80   :  { %81 = vst.msk [vmem:[#allocation0] ss:$8 sm:$0xf] %vm80_vm7, %v79_v53  }
  0x82   :  { %v91_v54 = vpop.permute.xlu0 %90  }
  0x83   :  { %93 = vst.msk [vmem:[#allocation0] ss:$8 sm:$0xf] %vm92_vm8, %v91_v54   ;;  %v103_v55 = vpop.permute.xlu1 %102  }
  0x84   :  { %105 = vst.msk [vmem:[#allocation0] ss:$8 sm:$0xf] %vm104_vm9, %v103_v55  }
  0x86   :  { %v115_v56 = vpop.permute.xlu0 %114  }
  0x87   :  { %117 = vst.msk [vmem:[#allocation0] ss:$8 sm:$0xf] %vm116_vm10, %v115_v56   ;;  %v127_v57 = vpop.permute.xlu1 %126  }
  0x88   :  { %129 = vst.msk [vmem:[#allocation0] ss:$8 sm:$0xf] %vm128_vm11, %v127_v57  }
  0x8a   :  { %v139_v58 = vpop.permute.xlu0 %138  }
  0x8b   :  { %141 = vst.msk [vmem:[#allocation0] ss:$8 sm:$0xf] %vm140_vm12, %v139_v58   ;;  %v151_v59 = vpop.permute.xlu1 %150  }
  0x8c   :  { %153 = vst.msk [vmem:[#allocation0] ss:$8 sm:$0xf] %vm152_vm13, %v151_v59  }
  0x8e   :  { %v163_v60 = vpop.permute.xlu0 %162  }
  0x8f   :  { %165 = vst.msk [vmem:[#allocation0] ss:$8 sm:$0xf] %vm164_vm14, %v163_v60   ;;  %v175_v61 = vpop.permute.xlu1 %174  }
  0x90   :  { %177 = vst.msk [vmem:[#allocation0] ss:$8 sm:$0xf] %vm176_vm15, %v175_v61  }
  0x92   :  { %v187_v62 = vpop.permute.xlu0 %186  }
  0x93   :  { %189 = vst.msk [vmem:[#allocation0] ss:$8 sm:$0xf] %vm188_vm0, %v187_v62  }
  0x9a   :  { %v193_v63 = vld [vmem:[#allocation0] sm:$0x1]  ;;  %v197_v0 = vld [vmem:[#allocation0 + $0x8] sm:$0x1]  ;;  %v202_v1 = vld [vmem:[#allocation0 + $0x10] sm:$0x1] }
  0x9b   :  { %195 = vst [vmem:[%s413_s1] sm:$0x1] %v193_v63  ;;  %245 = vst [vmem:[%s413_s1 + $0x1] sm:$0x1] %v197_v0  ;;  %v208_v2 = vld [vmem:[#allocation0 + $0x18] sm:$0x1] }
  0x9c   :  { %246 = vst [vmem:[%s413_s1 + $0x2] sm:$0x1] %v202_v1  ;;  %247 = vst [vmem:[%s413_s1 + $0x3] sm:$0x1] %v208_v2 }

// kernel: spatial3d_block_forward.1
= control target key start
LH: loop header
LB: loop body
LE: loop exit
PB: predicated region body
PF: predicated region fallthrough
CT: control target
= control target key end

     0   :  { %s9604_s30 = smov 0   ;;  %s12857_s0 = inlined_call_operand.vmem [shape: bf16[2,8,512], index: 0, kind: input, shape index: {}]   ;;  %s12858_s1 = inlined_call_operand.vmem [shape: bf16[512,512], index: 1, kind: input, shape index: {}]   ;;  %s12859_s2 = inlined_call_operand.vmem [shape: f32[1,512], index: 2, kind: input, shape index: {}]   ;;  %s12860_s3 = inlined_call_operand.vmem [shape: f32[1,512], index: 3, kind: input, shape index: {}]   ;;  %s12861_s4 = inlined_call_operand.vmem [shape: f32[1,512], index: 4, kind: input, shape index: {}]   ;;  %s12862_s5 = inlined_call_operand.vmem [shape: f32[512,8], index: 5, kind: input, shape index: {}]   ;;  %s12863_s6 = inlined_call_operand.vmem [shape: f32[8,512], index: 6, kind: input, shape index: {}]   ;;  %s12864_s7 = inlined_call_operand.vmem [shape: bf16[3,512,1024], index: 7, kind: input, shape index: {}]   ;;  %s12865_s8 = inlined_call_operand.vmem [shape: f32[1,1024], index: 8, kind: input, shape index: {}]   ;;  %s12866_s9 = inlined_call_operand.vmem [shape: f32[2,8,1024], index: 9, kind: output, shape index: {}]  }
   0x1 LB: > { %s7729_s10 = sadd.s32 4294967295, %s9550_s30   ;;  %p7733_p0 = scmp.ge.s32.totalorder %s9550_s30, 1  ;;  %s9550_s30 = sphi %s9604_s30, %s19_s30  }
   0x2   : > { %p287_p1 = scmp.lt.s32.totalorder %s9550_s30, 3 }
   0x4   : > { %p288_p2 = pnand %p7733_p0, %p287_p1 }
   0x5   : > { %v9328_v0 = vld [vmem:[%s12858_s1 + $0x4] ss:$16 sps:$4 sm:$0xff] (!%p288_p2)   ;;  %v9330_v1 = vld [vmem:[%s12858_s1 + $0xc] ss:$16 sps:$4 sm:$0xff] (!%p288_p2)   ;;  %v9332_v2 = vld [vmem:[%s12858_s1] ss:$16 sps:$4 sm:$0xff] (!%p288_p2)  }
   0x6   : > { %291 = sbr.rel (%p288_p2) target bundleno = 1818 (0x71a), region = 56  ;;  %1140 = vmatprep.subr.bf16.mxu0 (!%p288_p2), %v9328_v0  ;;  %v9333_v3 = vld [vmem:[%s12858_s1 + $0x8] ss:$16 sps:$4 sm:$0xff] (!%p288_p2)   ;;  %1222 = vmatprep.subr.bf16.mxu1 (!%p288_p2), %v9330_v1  ;;  %v9334_v4 = vld [vmem:[%s12858_s1 + $0x24] ss:$16 sps:$4 sm:$0xff] (!%p288_p2)   ;;  %p323_p3 = scmp.lt.s32.totalorder (!%p288_p2), %s7729_s10, 1 }
   0x7   : > { %1141 = vmatpush1.bf16.msra.mxu0 (!%p288_p2), %v9332_v2  ;;  %1223 = vmatpush1.bf16.msra.mxu1 (!%p288_p2), %v9333_v3  ;;  %v9336_v5 = vld [vmem:[%s12858_s1 + $0x2c] ss:$16 sps:$4 sm:$0xff] (!%p288_p2)   ;;  %v9338_v6 = vld [vmem:[%s12858_s1 + $0x20] ss:$16 sps:$4 sm:$0xff] (!%p288_p2)   ;;  %v9339_v7 = vld [vmem:[%s12858_s1 + $0x28] ss:$16 sps:$4 sm:$0xff] (!%p288_p2)  }
   0x8   : > { %1142 = vmatprep.subr.bf16.mxu0 (!%p288_p2), %v9334_v4  ;;  %1224 = vmatprep.subr.bf16.mxu1 (!%p288_p2), %v9336_v5  ;;  %v9340_v8 = vld [vmem:[%s12858_s1 + $0x44] ss:$16 sps:$4 sm:$0xff] (!%p288_p2)   ;;  %v9342_v9 = vld [vmem:[%s12858_s1 + $0x4c] ss:$16 sps:$4 sm:$0xff] (!%p288_p2)   ;;  %v9344_v10 = vld [vmem:[%s12858_s1 + $0x40] ss:$16 sps:$4 sm:$0xff] (!%p288_p2)  }
   0x9   : > { %v9345_v11 = vld [vmem:[%s12858_s1 + $0x48] ss:$16 sps:$4 sm:$0xff] (!%p288_p2)   ;;  %v9346_v12 = vld [vmem:[%s12858_s1 + $0x64] ss:$16 sps:$4 sm:$0xff] (!%p288_p2)   ;;  %v9348_v13 = vld [vmem:[%s12858_s1 + $0x6c] ss:$16 sps:$4 sm:$0xff] (!%p288_p2)  }
   0xa   : > { %v9350_v14 = vld [vmem:[%s12858_s1 + $0x60] ss:$16 sps:$4 sm:$0xff] (!%p288_p2)   ;;  %v9351_v15 = vld [vmem:[%s12858_s1 + $0x68] ss:$16 sps:$4 sm:$0xff] (!%p288_p2)   ;;  %v9352_v16 = vld [vmem:[%s12858_s1 + $0x84] ss:$16 sps:$4 sm:$0xff] (!%p288_p2)  }
   0xb   : > { %1143 = vmatpush1.bf16.msra.mxu0 (!%p288_p2), %v9338_v6  ;;  %1225 = vmatpush1.bf16.msra.mxu1 (!%p288_p2), %v9339_v7  ;;  %v9354_v17 = vld [vmem:[%s12858_s1 + $0x8c] ss:$16 sps:$4 sm:$0xff] (!%p288_p2)   ;;  %v9356_v18 = vld [vmem:[%s12858_s1 + $0x80] ss:$16 sps:$4 sm:$0xff] (!%p288_p2)   ;;  %v9357_v19 = vld [vmem:[%s12858_s1 + $0x88] ss:$16 sps:$4 sm:$0xff] (!%p288_p2)  }
   0xc   : > { %1144 = vmatprep.subr.bf16.mxu0 (!%p288_p2), %v9340_v8  ;;  %1226 = vmatprep.subr.bf16.mxu1 (!%p288_p2), %v9342_v9  ;;  %v9358_v20 = vld [vmem:[%s12858_s1 + $0xa4] ss:$16 sps:$4 sm:$0xff] (!%p288_p2)   ;;  %v9360_v21 = vld [vmem:[%s12858_s1 + $0xac] ss:$16 sps:$4 sm:$0xff] (!%p288_p2)   ;;  %v9362_v22 = vld [vmem:[%s12858_s1 + $0xa0] ss:$16 sps:$4 sm:$0xff] (!%p288_p2)  }
   0xd   : > { %v9363_v23 = vld [vmem:[%s12858_s1 + $0xa8] ss:$16 sps:$4 sm:$0xff]   ;;  %v9364_v24 = vld [vmem:[%s12858_s1 + $0xc4] ss:$16 sps:$4 sm:$0xff]   ;;  %v9366_v25 = vld [vmem:[%s12858_s1 + $0xcc] ss:$16 sps:$4 sm:$0xff]  }
   0xe   : > { %v9368_v26 = vld [vmem:[%s12858_s1 + $0xc0] ss:$16 sps:$4 sm:$0xff]   ;;  %v9369_v27 = vld [vmem:[%s12858_s1 + $0xc8] ss:$16 sps:$4 sm:$0xff]   ;;  %v9370_v28 = vld [vmem:[%s12858_s1 + $0xe4] ss:$16 sps:$4 sm:$0xff]  }
   0xf   : > { %1145 = vmatpush1.bf16.msra.mxu0 %v9344_v10  ;;  %1227 = vmatpush1.bf16.msra.mxu1 %v9345_v11  ;;  %v9372_v29 = vld [vmem:[%s12858_s1 + $0xec] ss:$16 sps:$4 sm:$0xff]   ;;  %v9374_v30 = vld [vmem:[%s12858_s1 + $0xe0] ss:$16 sps:$4 sm:$0xff]   ;;  %v9375_v31 = vld [vmem:[%s12858_s1 + $0xe8] ss:$16 sps:$4 sm:$0xff]  }
  0x10   : > { %1146 = vmatprep.subr.bf16.mxu0 %v9346_v12  ;;  %1228 = vmatprep.subr.bf16.mxu1 %v9348_v13  ;;  %v9376_v32 = vld [vmem:[%s12858_s1 + $0x104] ss:$16 sps:$4 sm:$0xff]   ;;  %v9378_v33 = vld [vmem:[%s12858_s1 + $0x10c] ss:$16 sps:$4 sm:$0xff]   ;;  %v9380_v34 = vld [vmem:[%s12858_s1 + $0x100] ss:$16 sps:$4 sm:$0xff]  }
  0x11   : > { %v9381_v35 = vld [vmem:[%s12858_s1 + $0x108] ss:$16 sps:$4 sm:$0xff]   ;;  %v9382_v36 = vld [vmem:[%s12858_s1 + $0x124] ss:$16 sps:$4 sm:$0xff]   ;;  %s12876_s10 = smov (!%p323_p3, %s7729_s10), 1  ;;  %vm1356_vm0 = vcmask 1040384  }
  0x12   : > { %v9384_v37 = vld [vmem:[%s12858_s1 + $0x12c] ss:$16 sps:$4 sm:$0xff]   ;;  %v9386_v38 = vld [vmem:[%s12858_s1 + $0x120] ss:$16 sps:$4 sm:$0xff]   ;;  %v9387_v39 = vld [vmem:[%s12858_s1 + $0x128] ss:$16 sps:$4 sm:$0xff]  }
  0x13   : > { %1147 = vmatpush1.bf16.msra.mxu0 %v9350_v14  ;;  %1229 = vmatpush1.bf16.msra.mxu1 %v9351_v15  ;;  %v9388_v40 = vld [vmem:[%s12858_s1 + $0x144] ss:$16 sps:$4 sm:$0xff]   ;;  %s9168_s17 = sshll.u32 %s12876_s10, 4  ;;  %v9390_v41 = vld [vmem:[%s12858_s1 + $0x14c] ss:$16 sps:$4 sm:$0xff]   ;;  %vm1579_vm1 = vcmask 64512  }
  0x14   : > { %1148 = vmatprep.subr.bf16.mxu0 %v9352_v16  ;;  %1230 = vmatprep.subr.bf16.mxu1 %v9354_v17  ;;  %v9392_v42 = vld [vmem:[%s12858_s1 + $0x140] ss:$16 sps:$4 sm:$0xff]   ;;  %v9393_v43 = vld [vmem:[%s12858_s1 + $0x148] ss:$16 sps:$4 sm:$0xff]   ;;  %s9754_s26 = scalar_lea.vmem %s12857_s0, %s9168_s17  ;;  %v9394_v44 = vld [vmem:[%s12858_s1 + $0x164] ss:$16 sps:$4 sm:$0xff]  }
  0x15   : > { %v9396_v45 = vld [vmem:[%s12858_s1 + $0x16c] ss:$16 sps:$4 sm:$0xff]   ;;  %v334_v46 = vld [vmem:[%s9754_s26] sm:$0xff]  ;;  %v9399_v49 = vld [vmem:[%s12858_s1 + $0x168] ss:$16 sps:$4 sm:$0xff]   ;;  %vm1874_vm3 = vcmask 1044484  }
  0x16   : > { %v7739_v47 = vcombine.high %v334_v46, %v334_v46  ;;  %v9398_v48 = vld [vmem:[%s12858_s1 + $0x160] ss:$16 sps:$4 sm:$0xff]   ;;  %v9400_v50 = vld [vmem:[%s12858_s1 + $0x184] ss:$16 sps:$4 sm:$0xff]   ;;  %v9402_v51 = vld [vmem:[%s12858_s1 + $0x18c] ss:$16 sps:$4 sm:$0xff]   ;;  %v7738_v5 = vcombine.low %v334_v46, %v334_v46 }
  0x17   : > { %1149 = vmatpush1.bf16.msra.mxu0 %v9356_v18  ;;  %1231 = vmatpush1.bf16.msra.mxu1 %v9357_v19  ;;  %v9404_v52 = vld [vmem:[%s12858_s1 + $0x180] ss:$16 sps:$4 sm:$0xff]   ;;  %v9405_v53 = vld [vmem:[%s12858_s1 + $0x188] ss:$16 sps:$4 sm:$0xff]   ;;  %v9406_v54 = vld [vmem:[%s12858_s1 + $0x1a4] ss:$16 sps:$4 sm:$0xff]  }
  0x18   : > { %1150 = vmatprep.subr.bf16.mxu0 %v9358_v20  ;;  %1232 = vmatprep.subr.bf16.mxu1 %v9360_v21  ;;  %v9408_v55 = vld [vmem:[%s12858_s1 + $0x1ac] ss:$16 sps:$4 sm:$0xff]   ;;  %v9410_v56 = vld [vmem:[%s12858_s1 + $0x1a0] ss:$16 sps:$4 sm:$0xff]   ;;  %v9411_v57 = vld [vmem:[%s12858_s1 + $0x1a8] ss:$16 sps:$4 sm:$0xff]  }
  0x19   : > { %1172 = vmatprep.mubr.bf16.mxu0 %v7739_v47  ;;  %1254 = vmatprep.mubr.bf16.mxu1 %v7739_v47  ;;  %v9412_v58 = vld [vmem:[%s12858_s1 + $0x1c4] ss:$16 sps:$4 sm:$0xff]   ;;  %v9414_v59 = vld [vmem:[%s12858_s1 + $0x1cc] ss:$16 sps:$4 sm:$0xff]   ;;  %v9416_v60 = vld [vmem:[%s12858_s1 + $0x1c0] ss:$16 sps:$4 sm:$0xff]  }
  0x1a   : > { %v9417_v61 = vld [vmem:[%s12858_s1 + $0x1c8] ss:$16 sps:$4 sm:$0xff]   ;;  %v9418_v62 = vld [vmem:[%s12858_s1 + $0x1e4] ss:$16 sps:$4 sm:$0xff]   ;;  %v9420_v63 = vld [vmem:[%s12858_s1 + $0x1ec] ss:$16 sps:$4 sm:$0xff]  }
  0x1b   : > { %1151 = vmatpush1.bf16.msra.mxu0 %v9362_v22  ;;  %1233 = vmatpush1.bf16.msra.mxu1 %v9363_v23  ;;  %v9422_v0 = vld [vmem:[%s12858_s1 + $0x1e0] ss:$16 sps:$4 sm:$0xff]   ;;  %v9423_v1 = vld [vmem:[%s12858_s1 + $0x1e8] ss:$16 sps:$4 sm:$0xff]   ;;  %v9429_v2 = vld [vmem:[%s12858_s1 + $0x204] ss:$16 sps:$4 sm:$0xff]  }
  0x1c   : > { %1152 = vmatprep.subr.bf16.mxu0 %v9364_v24  ;;  %1234 = vmatprep.subr.bf16.mxu1 %v9366_v25  ;;  %v9432_v3 = vld [vmem:[%s12858_s1 + $0x20c] ss:$16 sps:$4 sm:$0xff]   ;;  %v9427_v6 = vld [vmem:[%s12858_s1 + $0x200] ss:$16 sps:$4 sm:$0xff]   ;;  %v9430_v7 = vld [vmem:[%s12858_s1 + $0x208] ss:$16 sps:$4 sm:$0xff]  }
  0x1d   : > { %v9824_v4 = vld [vmem:[%s9754_s26 + $0x8] sm:$0xff]  ;;  %v9435_v8 = vld [vmem:[%s12858_s1 + $0x224] ss:$16 sps:$4 sm:$0xff]   ;;  %v9433_v11 = vld [vmem:[%s12858_s1 + $0x220] ss:$16 sps:$4 sm:$0xff]   ;;  %vm1929_vm13 = vcmask 1043456  }
  0x1e   : > { %v9438_v9 = vld [vmem:[%s12858_s1 + $0x22c] ss:$16 sps:$4 sm:$0xff]   ;;  %v7741_v10 = vcombine.high %v9824_v4, %v9824_v4  ;;  %v9436_v12 = vld [vmem:[%s12858_s1 + $0x228] ss:$16 sps:$4 sm:$0xff]   ;;  %v9441_v13 = vld [vmem:[%s12858_s1 + $0x244] ss:$16 sps:$4 sm:$0xff]  }
  0x1f   : > { %1153 = vmatpush1.bf16.msra.mxu0 %v9368_v26  ;;  %1235 = vmatpush1.bf16.msra.mxu1 %v9369_v27  ;;  %v9444_v14 = vld [vmem:[%s12858_s1 + $0x24c] ss:$16 sps:$4 sm:$0xff]   ;;  %v9439_v15 = vld [vmem:[%s12858_s1 + $0x240] ss:$16 sps:$4 sm:$0xff]   ;;  %v9442_v16 = vld [vmem:[%s12858_s1 + $0x248] ss:$16 sps:$4 sm:$0xff]  }
  0x20   : > { %1154 = vmatprep.subr.bf16.mxu0 %v9370_v28  ;;  %1236 = vmatprep.subr.bf16.mxu1 %v9372_v29  ;;  %v9447_v17 = vld [vmem:[%s12858_s1 + $0x264] ss:$16 sps:$4 sm:$0xff]   ;;  %v9450_v18 = vld [vmem:[%s12858_s1 + $0x26c] ss:$16 sps:$4 sm:$0xff]   ;;  %v9445_v19 = vld [vmem:[%s12858_s1 + $0x260] ss:$16 sps:$4 sm:$0xff]  }
  0x21   : > { %v9448_v20 = vld [vmem:[%s12858_s1 + $0x268] ss:$16 sps:$4 sm:$0xff]   ;;  %v9453_v21 = vld [vmem:[%s12858_s1 + $0x284] ss:$16 sps:$4 sm:$0xff]   ;;  %v9456_v22 = vld [vmem:[%s12858_s1 + $0x28c] ss:$16 sps:$4 sm:$0xff]  }
  0x22   : > { %v9451_v23 = vld [vmem:[%s12858_s1 + $0x280] ss:$16 sps:$4 sm:$0xff]   ;;  %v9454_v24 = vld [vmem:[%s12858_s1 + $0x288] ss:$16 sps:$4 sm:$0xff]   ;;  %v9459_v25 = vld [vmem:[%s12858_s1 + $0x2a4] ss:$16 sps:$4 sm:$0xff]  }
  0x23   : > { %1155 = vmatpush1.bf16.msra.mxu0 %v9374_v30  ;;  %1237 = vmatpush1.bf16.msra.mxu1 %v9375_v31  ;;  %v9462_v26 = vld [vmem:[%s12858_s1 + $0x2ac] ss:$16 sps:$4 sm:$0xff]   ;;  %v9457_v27 = vld [vmem:[%s12858_s1 + $0x2a0] ss:$16 sps:$4 sm:$0xff]   ;;  %v9460_v28 = vld [vmem:[%s12858_s1 + $0x2a8] ss:$16 sps:$4 sm:$0xff]  }
  0x24   : > { %1156 = vmatprep.subr.bf16.mxu0 %v9376_v32  ;;  %1238 = vmatprep.subr.bf16.mxu1 %v9378_v33  ;;  %v9465_v29 = vld [vmem:[%s12858_s1 + $0x2c4] ss:$16 sps:$4 sm:$0xff]   ;;  %v9468_v30 = vld [vmem:[%s12858_s1 + $0x2cc] ss:$16 sps:$4 sm:$0xff]   ;;  %v9463_v31 = vld [vmem:[%s12858_s1 + $0x2c0] ss:$16 sps:$4 sm:$0xff]  }
  0x25   : > { %v9466_v32 = vld [vmem:[%s12858_s1 + $0x2c8] ss:$16 sps:$4 sm:$0xff]   ;;  %v9471_v33 = vld [vmem:[%s12858_s1 + $0x2e4] ss:$16 sps:$4 sm:$0xff]   ;;  %v9492_v46 = vld [vmem:[%s12858_s1 + $0x34c] ss:$16 sps:$4 sm:$0xff]  }
  0x26   : > { %v9487_v47 = vld [vmem:[%s12858_s1 + $0x340] ss:$16 sps:$4 sm:$0xff]   ;;  %vm1872_vm2 = vsmask.f32 256  ;;  %vm1875_vm4 = vsmask.f32 4352 }
  0x27   : > { %1157 = vmatpush1.bf16.msra.mxu0 %v9380_v34  ;;  %1239 = vmatpush1.bf16.msra.mxu1 %v9381_v35  ;;  %v9474_v34 = vld [vmem:[%s12858_s1 + $0x2ec] ss:$16 sps:$4 sm:$0xff]   ;;  %v9469_v35 = vld [vmem:[%s12858_s1 + $0x2e0] ss:$16 sps:$4 sm:$0xff]   ;;  %vm1873_vm5 = vmand %vm1356_vm0, %vm1872_vm2  ;;  %vm1884_vm6 = vsmask.f32 7938 }
  0x28   : > { %1158 = vmatprep.subr.bf16.mxu0 %v9382_v36  ;;  %1240 = vmatprep.subr.bf16.mxu1 %v9384_v37  ;;  %v9472_v36 = vld [vmem:[%s12858_s1 + $0x2e8] ss:$16 sps:$4 sm:$0xff]   ;;  %v9477_v37 = vld [vmem:[%s12858_s1 + $0x304] ss:$16 sps:$4 sm:$0xff]   ;;  %vm1876_vm7 = vmand %vm1874_vm3, %vm1875_vm4  ;;  %vm1886_vm8 = vsmask.f32 7954 }
  0x29   : > { %vm10392_vm9 = vmor %vm1876_vm7, %vm1873_vm5  ;;  %vm1931_vm14 = vcmask 1047556   ;;  %s9169_s15 = sshll.u32 %s12876_s10, 6 }
  0x2a   : > { %vm10402_vm10 = vmand %vm1356_vm0, %vm1884_vm6  ;;  %s12825_s18 = scalar_lea.vmem %s12866_s9, %s9169_s15 }
  0x2b   : > { %1159 = vmatpush1.bf16.msra.mxu0 %v9386_v38  ;;  %1241 = vmatpush1.bf16.msra.mxu1 %v9387_v39  ;;  %v9480_v38 = vld [vmem:[%s12858_s1 + $0x30c] ss:$16 sps:$4 sm:$0xff]   ;;  %v9475_v39 = vld [vmem:[%s12858_s1 + $0x300] ss:$16 sps:$4 sm:$0xff]   ;;  %vm1887_vm11 = vmand %vm1874_vm3, %vm1886_vm8 }
  0x2c   : > { %1160 = vmatprep.subr.bf16.mxu0 %v9388_v40  ;;  %1242 = vmatprep.subr.bf16.mxu1 %v9390_v41  ;;  %v9478_v40 = vld [vmem:[%s12858_s1 + $0x308] ss:$16 sps:$4 sm:$0xff]   ;;  %v9483_v41 = vld [vmem:[%s12858_s1 + $0x324] ss:$16 sps:$4 sm:$0xff]   ;;  %vm1888_vm12 = vmor %vm1887_vm11, %vm10402_vm10 }
  0x2d   : > { %vm10435_vm15 = vmand %vm1929_vm13, %vm1884_vm6 }
  0x2f   : > { %1161 = vmatpush1.bf16.msra.mxu0 %v9392_v42  ;;  %1243 = vmatpush1.bf16.msra.mxu1 %v9393_v43  ;;  %v9486_v42 = vld [vmem:[%s12858_s1 + $0x32c] ss:$16 sps:$4 sm:$0xff]   ;;  %v9481_v43 = vld [vmem:[%s12858_s1 + $0x320] ss:$16 sps:$4 sm:$0xff]  }
  0x30   : > { %1162 = vmatprep.subr.bf16.mxu0 %v9394_v44  ;;  %1244 = vmatprep.subr.bf16.mxu1 %v9396_v45  ;;  %v9484_v44 = vld [vmem:[%s12858_s1 + $0x328] ss:$16 sps:$4 sm:$0xff]   ;;  %v9489_v45 = vld [vmem:[%s12858_s1 + $0x344] ss:$16 sps:$4 sm:$0xff]  }
  0x33   : > { %1163 = vmatpush1.bf16.msra.mxu0 %v9398_v48  ;;  %1245 = vmatpush1.bf16.msra.mxu1 %v9399_v49  ;;  %v9490_v48 = vld [vmem:[%s12858_s1 + $0x348] ss:$16 sps:$4 sm:$0xff]   ;;  %v9495_v49 = vld [vmem:[%s12858_s1 + $0x364] ss:$16 sps:$4 sm:$0xff]  }
  0x34   : > { %1164 = vmatprep.subr.bf16.mxu0 %v9400_v50  ;;  %1246 = vmatprep.subr.bf16.mxu1 %v9402_v51  ;;  %v9498_v50 = vld [vmem:[%s12858_s1 + $0x36c] ss:$16 sps:$4 sm:$0xff]   ;;  %v9493_v51 = vld [vmem:[%s12858_s1 + $0x360] ss:$16 sps:$4 sm:$0xff]  }
  0x37   : > { %1165 = vmatpush1.bf16.msra.mxu0 %v9404_v52  ;;  %1247 = vmatpush1.bf16.msra.mxu1 %v9405_v53  ;;  %v9496_v52 = vld [vmem:[%s12858_s1 + $0x368] ss:$16 sps:$4 sm:$0xff]   ;;  %v9501_v53 = vld [vmem:[%s12858_s1 + $0x384] ss:$16 sps:$4 sm:$0xff]  }
  0x38   : > { %1166 = vmatprep.subr.bf16.mxu0 %v9406_v54  ;;  %1248 = vmatprep.subr.bf16.mxu1 %v9408_v55  ;;  %v9504_v54 = vld [vmem:[%s12858_s1 + $0x38c] ss:$16 sps:$4 sm:$0xff]   ;;  %v9499_v55 = vld [vmem:[%s12858_s1 + $0x380] ss:$16 sps:$4 sm:$0xff]  }
  0x3b   : > { %1167 = vmatpush1.bf16.msra.mxu0 %v9410_v56  ;;  %1249 = vmatpush1.bf16.msra.mxu1 %v9411_v57  ;;  %v9502_v56 = vld [vmem:[%s12858_s1 + $0x388] ss:$16 sps:$4 sm:$0xff]   ;;  %v9507_v57 = vld [vmem:[%s12858_s1 + $0x3a4] ss:$16 sps:$4 sm:$0xff]  }
  0x3c   : > { %1168 = vmatprep.subr.bf16.mxu0 %v9412_v58  ;;  %1250 = vmatprep.subr.bf16.mxu1 %v9414_v59  ;;  %v9510_v58 = vld [vmem:[%s12858_s1 + $0x3ac] ss:$16 sps:$4 sm:$0xff]   ;;  %v9505_v59 = vld [vmem:[%s12858_s1 + $0x3a0] ss:$16 sps:$4 sm:$0xff]  }
  0x3f   : > { %1169 = vmatpush1.bf16.msra.mxu0 %v9416_v60  ;;  %1251 = vmatpush1.bf16.msra.mxu1 %v9417_v61  ;;  %v9508_v60 = vld [vmem:[%s12858_s1 + $0x3a8] ss:$16 sps:$4 sm:$0xff]   ;;  %v9513_v61 = vld [vmem:[%s12858_s1 + $0x3c4] ss:$16 sps:$4 sm:$0xff]  }
  0x40   : > { %1170 = vmatprep.subr.bf16.mxu0 %v9418_v62  ;;  %1252 = vmatprep.subr.bf16.mxu1 %v9420_v63  ;;  %v9516_v62 = vld [vmem:[%s12858_s1 + $0x3cc] ss:$16 sps:$4 sm:$0xff]   ;;  %v9511_v63 = vld [vmem:[%s12858_s1 + $0x3c0] ss:$16 sps:$4 sm:$0xff]  }
  0x43   : > { %1171 = vmatpush1.bf16.msra.mxu0 %v9422_v0  ;;  %1253 = vmatpush1.bf16.msra.mxu1 %v9423_v1  ;;  %v9514_v0 = vld [vmem:[%s12858_s1 + $0x3c8] ss:$16 sps:$4 sm:$0xff]   ;;  %v9519_v1 = vld [vmem:[%s12858_s1 + $0x3e4] ss:$16 sps:$4 sm:$0xff]  }
  0x44   : > { %1181 = vmatprep.subr.bf16.mxu0 %v9429_v2  ;;  %1263 = vmatprep.subr.bf16.mxu1 %v9432_v3  ;;  %v9522_v2 = vld [vmem:[%s12858_s1 + $0x3ec] ss:$16 sps:$4 sm:$0xff]   ;;  %v1377_v3 = vld [vmem:[%s12862_s5 + $0x80] sm:$0xff] }
  0x46   : > { %1173 = vmatmul.mubr.bf16.vlgmr.msra.gmra.mrb[0].mxu0 %v7738_v5  ;;  %1255 = vmatmul.mubr.bf16.vlgmr.msra.gmra.mrb[0].mxu1 %v7738_v5  ;;  %v1378_v5 = vld [vmem:[%s12862_s5 + $0x88] sm:$0xff] }
  0x47   : > { %1182 = vmatpush1.bf16.msra.mxu0 %v9427_v6  ;;  %1264 = vmatpush1.bf16.msra.mxu1 %v9430_v7  ;;  %v1409_v6 = vld [vmem:[%s12862_s5 + $0x180] sm:$0xff]  ;;  %v1410_v7 = vld [vmem:[%s12862_s5 + $0x188] sm:$0xff] }
  0x48   : > { %1183 = vmatprep.subr.bf16.mxu0 %v9435_v8  ;;  %1265 = vmatprep.subr.bf16.mxu1 %v9438_v9  ;;  %v9517_v8 = vld [vmem:[%s12858_s1 + $0x3e0] ss:$16 sps:$4 sm:$0xff]   ;;  %v9520_v9 = vld [vmem:[%s12858_s1 + $0x3e8] ss:$16 sps:$4 sm:$0xff]  }
  0x49   : > { %1213 = vmatprep.mubr.bf16.mxu0 %v7741_v10  ;;  %1295 = vmatprep.mubr.bf16.mxu1 %v7741_v10  ;;  %v1361_v10 = vld [vmem:[%s12862_s5] sm:$0xff] }
  0x4b   : > { %1184 = vmatpush1.bf16.msra.mxu0 %v9433_v11  ;;  %1266 = vmatpush1.bf16.msra.mxu1 %v9436_v12  ;;  %v1362_v11 = vld [vmem:[%s12862_s5 + $0x8] sm:$0xff]  ;;  %v9242_v12 = vpack.c.bf16 %v1378_v5, %v1377_v3  ;;  %v1388_v3 = vld [vmem:[%s12862_s5 + $0xd8] sm:$0xff]  ;;  %v1419_v5 = vld [vmem:[%s12862_s5 + $0x1d0] sm:$0xff] }
  0x4c   : > { %1185 = vmatprep.subr.bf16.mxu0 %v9441_v13  ;;  %1267 = vmatprep.subr.bf16.mxu1 %v9444_v14  ;;  %v9274_v13 = vpack.c.bf16 %v1410_v7, %v1409_v6  ;;  %v1393_v14 = vld [vmem:[%s12862_s5 + $0x100] sm:$0xff]  ;;  %v1420_v7 = vld [vmem:[%s12862_s5 + $0x1d8] sm:$0xff] }
  0x4f   : > { %1186 = vmatpush1.bf16.msra.mxu0 %v9439_v15  ;;  %1268 = vmatpush1.bf16.msra.mxu1 %v9442_v16  ;;  %v1394_v15 = vld [vmem:[%s12862_s5 + $0x108] sm:$0xff]  ;;  %v1379_v16 = vld [vmem:[%s12862_s5 + $0x90] sm:$0xff] }
  0x50   : > { %1187 = vmatprep.subr.bf16.mxu0 %v9447_v17  ;;  %1269 = vmatprep.subr.bf16.mxu1 %v9450_v18  ;;  %v1380_v17 = vld [vmem:[%s12862_s5 + $0x98] sm:$0xff]  ;;  %v1411_v18 = vld [vmem:[%s12862_s5 + $0x190] sm:$0xff] }
  0x53   : > { %1188 = vmatpush1.bf16.msra.mxu0 %v9445_v19  ;;  %1270 = vmatpush1.bf16.msra.mxu1 %v9448_v20  ;;  %v1412_v19 = vld [vmem:[%s12862_s5 + $0x198] sm:$0xff]  ;;  %v7740_v20 = vcombine.low %v9824_v4, %v9824_v4  ;;  %v1395_v4 = vld [vmem:[%s12862_s5 + $0x110] sm:$0xff] }
  0x54   : > { %1189 = vmatprep.subr.bf16.mxu0 %v9453_v21  ;;  %1271 = vmatprep.subr.bf16.mxu1 %v9456_v22  ;;  %v9244_v21 = vpack.c.bf16 %v1362_v11, %v1361_v10  ;;  %v9276_v22 = vpack.c.bf16 %v1394_v15, %v1393_v14  ;;  %v9294_v10 = vpack.c.bf16 %v1420_v7, %v1419_v5  ;;  %v1389_v14 = vld [vmem:[%s12862_s5 + $0xe0] sm:$0xff] }
  0x57   : > { %1190 = vmatpush1.bf16.msra.mxu0 %v9451_v23  ;;  %1272 = vmatpush1.bf16.msra.mxu1 %v9454_v24  ;;  %v1363_v23 = vld [vmem:[%s12862_s5 + $0x10] sm:$0xff]  ;;  %v1364_v24 = vld [vmem:[%s12862_s5 + $0x18] sm:$0xff] }
  0x58   : > { %1191 = vmatprep.subr.bf16.mxu0 %v9459_v25  ;;  %1273 = vmatprep.subr.bf16.mxu1 %v9462_v26  ;;  %v9246_v25 = vpack.c.bf16 %v1380_v17, %v1379_v16  ;;  %v9278_v26 = vpack.c.bf16 %v1412_v19, %v1411_v18  ;;  %v1390_v16 = vld [vmem:[%s12862_s5 + $0xe8] sm:$0xff]  ;;  %v1421_v17 = vld [vmem:[%s12862_s5 + $0x1e0] sm:$0xff] }
  0x59   : > { %v1422_v18 = vld [vmem:[%s12862_s5 + $0x1e8] sm:$0xff]  ;;  %v9266_v19 = vpack.c.bf16 %v1390_v16, %v1389_v14 }
  0x5b   : > { %1192 = vmatpush1.bf16.msra.mxu0 %v9457_v27  ;;  %1274 = vmatpush1.bf16.msra.mxu1 %v9460_v28  ;;  %v1396_v27 = vld [vmem:[%s12862_s5 + $0x118] sm:$0xff]  ;;  %v1381_v28 = vld [vmem:[%s12862_s5 + $0xa0] sm:$0xff] }
  0x5c   : > { %1193 = vmatprep.subr.bf16.mxu0 %v9465_v29  ;;  %1275 = vmatprep.subr.bf16.mxu1 %v9468_v30  ;;  %v1382_v29 = vld [vmem:[%s12862_s5 + $0xa8] sm:$0xff]  ;;  %v1413_v30 = vld [vmem:[%s12862_s5 + $0x1a0] sm:$0xff] }
  0x5f   : > { %1194 = vmatpush1.bf16.msra.mxu0 %v9463_v31  ;;  %1276 = vmatpush1.bf16.msra.mxu1 %v9466_v32  ;;  %v1414_v31 = vld [vmem:[%s12862_s5 + $0x1a8] sm:$0xff]  ;;  %v9248_v32 = vpack.c.bf16 %v1364_v24, %v1363_v23  ;;  %v1405_v23 = vld [vmem:[%s12862_s5 + $0x160] sm:$0xff] }
  0x60   : > { %1195 = vmatprep.subr.bf16.mxu0 %v9471_v33  ;;  %1277 = vmatprep.subr.bf16.mxu1 %v9474_v34  ;;  %v9280_v33 = vpack.c.bf16 %v1396_v27, %v1395_v4  ;;  %v1365_v34 = vld [vmem:[%s12862_s5 + $0x20] sm:$0xff]  ;;  %v1392_v4 = vld [vmem:[%s12862_s5 + $0xf8] sm:$0xff] }
  0x63   : > { %1196 = vmatpush1.bf16.msra.mxu0 %v9469_v35  ;;  %1278 = vmatpush1.bf16.msra.mxu1 %v9472_v36  ;;  %v9250_v35 = vpack.c.bf16 %v1382_v29, %v1381_v28  ;;  %v9282_v36 = vpack.c.bf16 %v1414_v31, %v1413_v30  ;;  %v1423_v29 = vld [vmem:[%s12862_s5 + $0x1f0] sm:$0xff]  ;;  %v1424_v30 = vld [vmem:[%s12862_s5 + $0x1f8] sm:$0xff] }
  0x64   : > { %1197 = vmatprep.subr.bf16.mxu0 %v9477_v37  ;;  %1279 = vmatprep.subr.bf16.mxu1 %v9480_v38  ;;  %v1366_v37 = vld [vmem:[%s12862_s5 + $0x28] sm:$0xff]  ;;  %v1397_v38 = vld [vmem:[%s12862_s5 + $0x120] sm:$0xff]  ;;  %v1375_v31 = vld [vmem:[%s12862_s5 + $0x70] sm:$0xff] }
  0x67   : > { %1198 = vmatpush1.bf16.msra.mxu0 %v9475_v39  ;;  %1280 = vmatpush1.bf16.msra.mxu1 %v9478_v40  ;;  %v1398_v39 = vld [vmem:[%s12862_s5 + $0x128] sm:$0xff]  ;;  %v9252_v40 = vpack.c.bf16 %v1366_v37, %v1365_v34  ;;  %v1407_v34 = vld [vmem:[%s12862_s5 + $0x170] sm:$0xff] }
  0x68   : > { %1199 = vmatprep.subr.bf16.mxu0 %v9483_v41  ;;  %1281 = vmatprep.subr.bf16.mxu1 %v9486_v42  ;;  %v9284_v41 = vpack.c.bf16 %v1398_v39, %v1397_v38  ;;  %v1383_v42 = vld [vmem:[%s12862_s5 + $0xb0] sm:$0xff]  ;;  %v466_v38 = vlaneseq }
  0x6a   : > { %v10208_v39 = vshrl.u32 %v466_v38, 7 }
  0x6b   : > { %1200 = vmatpush1.bf16.msra.mxu0 %v9481_v43  ;;  %1282 = vmatpush1.bf16.msra.mxu1 %v9484_v44  ;;  %v1384_v43 = vld [vmem:[%s12862_s5 + $0xb8] sm:$0xff]  ;;  %v1415_v44 = vld [vmem:[%s12862_s5 + $0x1b0] sm:$0xff] }
  0x6c   : > { %1201 = vmatprep.subr.bf16.mxu0 %v9489_v45  ;;  %1283 = vmatprep.subr.bf16.mxu1 %v9492_v46  ;;  %v9254_v45 = vpack.c.bf16 %v1384_v43, %v1383_v42  ;;  %v1416_v46 = vld [vmem:[%s12862_s5 + $0x1b8] sm:$0xff]  ;;  %v464_v42 = vld [vmem:[%s12859_s2] sm:$0xf]  ;;  %v10220_v43 = vsub.s32 1, %v10208_v39 }
  0x6f   : > { %1202 = vmatpush1.bf16.msra.mxu0 %v9487_v47  ;;  %1284 = vmatpush1.bf16.msra.mxu1 %v9490_v48  ;;  %v1367_v47 = vld [vmem:[%s12862_s5 + $0x30] sm:$0xff]  ;;  %v1368_v48 = vld [vmem:[%s12862_s5 + $0x38] sm:$0xff] }
  0x70   : > { %1203 = vmatprep.subr.bf16.mxu0 %v9495_v49  ;;  %1285 = vmatprep.subr.bf16.mxu1 %v9498_v50  ;;  %v9286_v49 = vpack.c.bf16 %v1416_v46, %v1415_v44  ;;  %v9256_v50 = vpack.c.bf16 %v1368_v48, %v1367_v47  ;;  %v10223_v44 = vsub.s32 3, %v10208_v39  ;;  %v473_v47 = vrot.slane %v464_v42, %v10220_v43 }
  0x72   : > { %v481_v48 = vrot.slane %v464_v42, %v10223_v44 }
  0x73   : > { %1204 = vmatpush1.bf16.msra.mxu0 %v9493_v51  ;;  %1286 = vmatpush1.bf16.msra.mxu1 %v9496_v52  ;;  %v1399_v51 = vld [vmem:[%s12862_s5 + $0x130] sm:$0xff]  ;;  %v1400_v52 = vld [vmem:[%s12862_s5 + $0x138] sm:$0xff] }
  0x74   : > { %1205 = vmatprep.subr.bf16.mxu0 %v9501_v53  ;;  %1287 = vmatprep.subr.bf16.mxu1 %v9504_v54  ;;  %v9288_v53 = vpack.c.bf16 %v1400_v52, %v1399_v51  ;;  %v1385_v54 = vld [vmem:[%s12862_s5 + $0xc0] sm:$0xff] }
  0x77   : > { %1206 = vmatpush1.bf16.msra.mxu0 %v9499_v55  ;;  %1288 = vmatpush1.bf16.msra.mxu1 %v9502_v56  ;;  %v1386_v55 = vld [vmem:[%s12862_s5 + $0xc8] sm:$0xff]  ;;  %v1417_v56 = vld [vmem:[%s12862_s5 + $0x1c0] sm:$0xff] }
  0x78   : > { %1207 = vmatprep.subr.bf16.mxu0 %v9507_v57  ;;  %1289 = vmatprep.subr.bf16.mxu1 %v9510_v58  ;;  %v9258_v57 = vpack.c.bf16 %v1386_v55, %v1385_v54  ;;  %v1418_v58 = vld [vmem:[%s12862_s5 + $0x1c8] sm:$0xff] }
  0x7b   : > { %1208 = vmatpush1.bf16.msra.mxu0 %v9505_v59  ;;  %1290 = vmatpush1.bf16.msra.mxu1 %v9508_v60  ;;  %v1369_v59 = vld [vmem:[%s12862_s5 + $0x40] sm:$0xff]  ;;  %v1370_v60 = vld [vmem:[%s12862_s5 + $0x48] sm:$0xff] }
  0x7c   : > { %1209 = vmatprep.subr.bf16.mxu0 %v9513_v61  ;;  %1291 = vmatprep.subr.bf16.mxu1 %v9516_v62  ;;  %v9290_v61 = vpack.c.bf16 %v1418_v58, %v1417_v56  ;;  %v9260_v62 = vpack.c.bf16 %v1370_v60, %v1369_v59 }
  0x7f   : > { %1210 = vmatpush1.bf16.msra.mxu0 %v9511_v63  ;;  %1292 = vmatpush1.bf16.msra.mxu1 %v9514_v0  ;;  %v1401_v63 = vld [vmem:[%s12862_s5 + $0x140] sm:$0xff]  ;;  %v1402_v0 = vld [vmem:[%s12862_s5 + $0x148] sm:$0xff] }
  0x80   : > { %1211 = vmatprep.subr.bf16.mxu0 %v9519_v1  ;;  %1293 = vmatprep.subr.bf16.mxu1 %v9522_v2  ;;  %v9292_v1 = vpack.c.bf16 %v1402_v0, %v1401_v63  ;;  %v1387_v2 = vld [vmem:[%s12862_s5 + $0xd0] sm:$0xff] }
  0x81   : > { %v9262_v6 = vpack.c.bf16 %v1388_v3, %v1387_v2 }
  0x83   : > { %1212 = vmatpush1.bf16.msra.mxu0 %v9517_v8  ;;  %1294 = vmatpush1.bf16.msra.mxu1 %v9520_v9  ;;  %v1371_v8 = vld [vmem:[%s12862_s5 + $0x50] sm:$0xff]  ;;  %v1372_v9 = vld [vmem:[%s12862_s5 + $0x58] sm:$0xff] }
  0x84   : > { %9243 = vmatprep.subr.bf16.mxu0 %v9242_v12  ;;  %9275 = vmatprep.subr.bf16.mxu1 %v9274_v13  ;;  %v9264_v11 = vpack.c.bf16 %v1372_v9, %v1371_v8  ;;  %v1403_v12 = vld [vmem:[%s12862_s5 + $0x150] sm:$0xff]  ;;  %v1404_v13 = vld [vmem:[%s12862_s5 + $0x158] sm:$0xff] }
  0x85   : > { %v9296_v15 = vpack.c.bf16 %v1404_v13, %v1403_v12 }
  0x86   : > { %1214 = vmatmul.mubr.bf16.vlgmr.msra.gmra.mrb[0].mxu0 %v7740_v20  ;;  %1296 = vmatmul.mubr.bf16.vlgmr.msra.gmra.mrb[0].mxu1 %v7740_v20  ;;  %v9298_v20 = vpack.c.bf16 %v1422_v18, %v1421_v17 }
  0x87   : > { %9245 = vmatpush3.bf16.msra.mxu0 %v9244_v21  ;;  %9277 = vmatpush3.bf16.msra.mxu1 %v9276_v22  ;;  %v1373_v21 = vld [vmem:[%s12862_s5 + $0x60] sm:$0xff]  ;;  %v1374_v22 = vld [vmem:[%s12862_s5 + $0x68] sm:$0xff] }
  0x88   : > { %9247 = vmatprep.subr.bf16.mxu0 %v9246_v25  ;;  %9279 = vmatprep.subr.bf16.mxu1 %v9278_v26  ;;  %v9268_v24 = vpack.c.bf16 %v1374_v22, %v1373_v21  ;;  %v1406_v25 = vld [vmem:[%s12862_s5 + $0x168] sm:$0xff]  ;;  %v1391_v26 = vld [vmem:[%s12862_s5 + $0xf0] sm:$0xff] }
  0x89   : > { %v9300_v27 = vpack.c.bf16 %v1406_v25, %v1405_v23  ;;  %v9270_v28 = vpack.c.bf16 %v1392_v4, %v1391_v26 }
  0x8b   : > { %9249 = vmatpush3.bf16.msra.mxu0 %v9248_v32  ;;  %9281 = vmatpush3.bf16.msra.mxu1 %v9280_v33  ;;  %v9302_v32 = vpack.c.bf16 %v1424_v30, %v1423_v29  ;;  %v1376_v33 = vld [vmem:[%s12862_s5 + $0x78] sm:$0xff] }
  0x8c   : > { %9251 = vmatprep.subr.bf16.mxu0 %v9250_v35  ;;  %9283 = vmatprep.subr.bf16.mxu1 %v9282_v36  ;;  %v1408_v35 = vld [vmem:[%s12862_s5 + $0x178] sm:$0xff]  ;;  %v9272_v36 = vpack.c.bf16 %v1376_v33, %v1375_v31 }
  0x8d   : > { %v9304_v37 = vpack.c.bf16 %v1408_v35, %v1407_v34 }
  0x8f   : > { %9253 = vmatpush3.bf16.msra.mxu0 %v9252_v40  ;;  %9285 = vmatpush3.bf16.msra.mxu1 %v9284_v41  ;;  %v10211_v40 = vsub.s32 0, %v10208_v39  ;;  %v10214_v41 = vsub.s32 2, %v10208_v39 }
  0x90   : > { %9255 = vmatprep.subr.bf16.mxu0 %v9254_v45  ;;  %9287 = vmatprep.subr.bf16.mxu1 %v9286_v49 }
  0x91   : > { %v469_v45 = vrot.slane %v464_v42, %v10211_v40  ;;  %v477_v46 = vrot.slane %v464_v42, %v10214_v41 }
  0x93   : > { %9257 = vmatpush3.bf16.msra.mxu0 %v9256_v50  ;;  %9289 = vmatpush3.bf16.msra.mxu1 %v9288_v53 }
  0x94   : > { %9259 = vmatprep.subr.bf16.mxu0 %v9258_v57  ;;  %9291 = vmatprep.subr.bf16.mxu1 %v9290_v61 }
  0x97   : > { %9261 = vmatpush3.bf16.msra.mxu0 %v9260_v62  ;;  %9293 = vmatpush3.bf16.msra.mxu1 %v9292_v1 }
  0x98   : > { %9263 = vmatprep.subr.bf16.mxu0 %v9262_v6  ;;  %9295 = vmatprep.subr.bf16.mxu1 %v9294_v10 }
  0x9b   : > { %9265 = vmatpush3.bf16.msra.mxu0 %v9264_v11  ;;  %9297 = vmatpush3.bf16.msra.mxu1 %v9296_v15 }
  0x9c   : > { %9267 = vmatprep.subr.bf16.mxu0 %v9266_v19  ;;  %9299 = vmatprep.subr.bf16.mxu1 %v9298_v20 }
  0x9f   : > { %9269 = vmatpush3.bf16.msra.mxu0 %v9268_v24  ;;  %9301 = vmatpush3.bf16.msra.mxu1 %v9300_v27 }
  0xa0   : > { %9271 = vmatprep.subr.bf16.mxu0 %v9270_v28  ;;  %9303 = vmatprep.subr.bf16.mxu1 %v9302_v32 }
  0xa3   : > { %9273 = vmatpush3.bf16.msra.mxu0 %v9272_v36  ;;  %9305 = vmatpush3.bf16.msra.mxu1 %v9304_v37 }
 0x159   : > { %v1215_v49 = vpop.f32.mrb[0].mxu0  ;;  %v1297_v50 = vpop.f32.mrb[0].mxu1 }
 0x15a   : > { %v10229_v51 = vadd.f32 %v1215_v49, %v469_v45  ;;  %v10231_v52 = vadd.f32 %v1297_v50, %v477_v46  ;;  %v1217_v53 = vpop.f32.mrb[1].mxu0  ;;  %v1299_v54 = vpop.f32.mrb[1].mxu1 }
 0x15b   : > { %v10233_v55 = vadd.f32 %v1217_v53, %v473_v47  ;;  %v10235_v56 = vadd.f32 %v1299_v54, %v481_v48  ;;  %v1219_v57 = vpop.f32.mrb[2].mxu0  ;;  %v1301_v58 = vpop.f32.mrb[2].mxu1 }
 0x15c   : > { %v1304_v59 = vrot.slane %v10229_v51, 4  ;;  %v1328_v60 = vmul.f32 %v10229_v51, %v10229_v51  ;;  %v1316_v61 = vrot.slane %v10231_v52, 4  ;;  %v1330_v62 = vmul.f32 %v10231_v52, %v10231_v52  ;;  %v1220_v63 = vpop.f32.mrb[3].mxu0  ;;  %v1302_v0 = vpop.f32.mrb[3].mxu1 }
 0x15d   : > { %v1310_v1 = vrot.slane %v10233_v55, 4  ;;  %v1329_v2 = vmul.f32 %v10233_v55, %v10233_v55  ;;  %v1322_v3 = vrot.slane %v10235_v56, 4  ;;  %v1331_v5 = vmul.f32 %v10235_v56, %v10235_v56  ;;  %v1578_v63 = vld [vmem:[%s12863_s6 + $0x18] sm:$0xff]  ;;  %v1575_v0 = vld [vmem:[%s12863_s6] sm:$0xff] }
 0x15e   : > { %v1305_v6 = vadd.f32 %v10229_v51, %v1304_v59  ;;  %v1332_v7 = vrot.slane %v1328_v60, 4  ;;  %v1317_v8 = vadd.f32 %v10231_v52, %v1316_v61  ;;  %v1344_v9 = vrot.slane %v1330_v62, 4  ;;  %1654 = vmatprep.subr.mxu1 %v1578_v63 }
 0x15f   : > { %v1311_v10 = vadd.f32 %v10233_v55, %v1310_v1  ;;  %v1338_v11 = vrot.slane %v1329_v2, 4  ;;  %v1323_v12 = vadd.f32 %v10235_v56, %v1322_v3  ;;  %v1350_v13 = vrot.slane %v1331_v5, 4  ;;  %v1577_v1 = vld [vmem:[%s12863_s6 + $0x10] sm:$0xff] }
 0x160   : > { %v1306_v14 = vrot.slane %v1305_v6, 2  ;;  %v1333_v15 = vadd.f32 %v1332_v7, %v1328_v60  ;;  %v1318_v16 = vrot.slane %v1317_v8, 2  ;;  %v1345_v17 = vadd.f32 %v1344_v9, %v1330_v62  ;;  %v1576_v62 = vld [vmem:[%s12863_s6 + $0x8] sm:$0xff] }
 0x161   : > { %v1312_v18 = vrot.slane %v1311_v10, 2  ;;  %v1339_v19 = vadd.f32 %v1338_v11, %v1329_v2  ;;  %v1324_v20 = vrot.slane %v1323_v12, 2  ;;  %v1351_v21 = vadd.f32 %v1350_v13, %v1331_v5  ;;  %1583 = vmatprep.subr.mxu0 %v1576_v62  ;;  %v8042_v62 = vld [vmem:[%s12864_s7 + $0xd20] sm:$0xff] }
 0x162   : > { %v1307_v22 = vadd.f32 %v1306_v14, %v1305_v6  ;;  %v1334_v23 = vrot.slane %v1333_v15, 2  ;;  %v1319_v24 = vadd.f32 %v1318_v16, %v1317_v8  ;;  %v1346_v25 = vrot.slane %v1345_v17, 2 }
 0x163   : > { %v1313_v26 = vadd.f32 %v1312_v18, %v1311_v10  ;;  %v1340_v4 = vrot.slane %v1339_v19, 2  ;;  %v1325_v27 = vadd.f32 %v1324_v20, %v1323_v12  ;;  %v1352_v28 = vrot.slane %v1351_v21, 2  ;;  %v7878_v18 = vld [vmem:[%s12864_s7 + $0x800] sm:$0xff] }
 0x164   : > { %v1335_v29 = vadd.f32 %v1334_v23, %v1333_v15  ;;  %v1347_v30 = vadd.f32 %v1346_v25, %v1345_v17  ;;  %v1308_v35 = vrot.slane %v1307_v22, 1  ;;  %v1320_v37 = vrot.slane %v1319_v24, 1  ;;  %v8006_v20 = vld [vmem:[%s12864_s7 + $0xc00] sm:$0xff] }
 0x165   : > { %v1314_v31 = vrot.slane %v1313_v26, 1  ;;  %v1341_v32 = vadd.f32 %v1340_v4, %v1339_v19  ;;  %v1326_v33 = vrot.slane %v1325_v27, 1  ;;  %v1353_v34 = vadd.f32 %v1352_v28, %v1351_v21  ;;  %v7882_v19 = vld [vmem:[%s12864_s7 + $0x820] sm:$0xff] }
 0x166   : > { %v1336_v36 = vrot.slane %v1335_v29, 1  ;;  %v1348_v38 = vrot.slane %v1347_v30, 1  ;;  %v1309_v54 = vadd.f32 %v1308_v35, %v1307_v22  ;;  %v1321_v57 = vadd.f32 %v1320_v37, %v1319_v24  ;;  %v8010_v22 = vld [vmem:[%s12864_s7 + $0xc20] sm:$0xff] }
 0x167   : > { %v1342_v42 = vrot.slane %v1341_v32, 1  ;;  %v1354_v45 = vrot.slane %v1353_v34, 1  ;;  %v1315_v48 = vadd.f32 %v1314_v31, %v1313_v26  ;;  %v1327_v50 = vadd.f32 %v1326_v33, %v1325_v27  ;;  %v7886_v26 = vld [vmem:[%s12864_s7 + $0x840] sm:$0xff] }
 0x168   : > { %v1337_v46 = vadd.f32 %v1336_v36, %v1335_v29  ;;  %v1349_v47 = vadd.f32 %v1348_v38, %v1347_v30  ;;  %v9552_v2 = vmov 0.0   ;;  %v8139_v21 = vcombine.high %v7878_v18, %v7882_v19  ;;  %v7890_v4 = vld [vmem:[%s12864_s7 + $0x860] sm:$0xff] }
 0x169   : > { %v1343_v49 = vadd.f32 %v1342_v42, %v1341_v32  ;;  %v1355_v53 = vadd.f32 %v1354_v45, %v1353_v34  ;;  %v8138_v23 = vcombine.low %v7878_v18, %v7882_v19  ;;  %v8266_v24 = vcombine.low %v8006_v20, %v8010_v22  ;;  %v8014_v27 = vld [vmem:[%s12864_s7 + $0xc40] sm:$0xff] }
 0x16a   : > { %v1357_v60 = vsel %vm1356_vm0, %v1309_v54, %v1337_v46  ;;  %v1359_v61 = vsel %vm1356_vm0, %v1321_v57, %v1349_v47  ;;  %v8267_v25 = vcombine.high %v8006_v20, %v8010_v22  ;;  %v8147_v28 = vcombine.high %v7886_v26, %v7890_v4  ;;  %v8018_v29 = vld [vmem:[%s12864_s7 + $0xc60] sm:$0xff] }
 0x16b   : > { %v1358_v58 = vsel %vm1356_vm0, %v1315_v48, %v1343_v49  ;;  %v1360_v59 = vsel %vm1356_vm0, %v1327_v50, %v1355_v53  ;;  %v8146_v30 = vcombine.low %v7886_v26, %v7890_v4  ;;  %v8274_v31 = vcombine.low %v8014_v27, %v8018_v29  ;;  %v7894_v33 = vld [vmem:[%s12864_s7 + $0x880] sm:$0xff] }
 0x16c   : > { %1489 = vmatprep.mubr.f32.mxu0 %v1358_v58  ;;  %1559 = vmatprep.mubr.f32.mxu1 %v1360_v59  ;;  %v8275_v32 = vcombine.high %v8014_v27, %v8018_v29  ;;  %v7898_v34 = vld [vmem:[%s12864_s7 + $0x8a0] sm:$0xff] }
 0x16d   : > { %1490 = vmatmul.mubr.f32.vlgmr.msra.gmra.mrb[4].mxu0 %v1357_v60  ;;  %1560 = vmatmul.mubr.f32.vlgmr.msra.gmra.mrb[4].mxu1 %v1359_v61  ;;  %v8022_v35 = vld [vmem:[%s12864_s7 + $0xc80] sm:$0xff]  ;;  %v8155_v36 = vcombine.high %v7894_v33, %v7898_v34  ;;  %v8154_v38 = vcombine.low %v7894_v33, %v7898_v34 }
 0x16e   : > { %1584 = vmatpush1.msra.mxu0 %v1575_v0  ;;  %1655 = vmatpush1.msra.mxu1 %v1577_v1  ;;  %v8026_v37 = vld [vmem:[%s12864_s7 + $0xca0] sm:$0xff] }
 0x16f   : > { %1647 = vmatprep.mubr.f32.mxu0 %v9552_v2  ;;  %1718 = vmatprep.mubr.f32.mxu1 %v9552_v2  ;;  %v8282_v42 = vcombine.low %v8022_v35, %v8026_v37  ;;  %v8283_v45 = vcombine.high %v8022_v35, %v8026_v37  ;;  %v7902_v46 = vld [vmem:[%s12864_s7 + $0x8c0] sm:$0xff] }
 0x170   : > { %3791 = vmatprep.subr.bf16.mxu0 %v8139_v21  ;;  %3832 = vmatprep.subr.bf16.mxu1 %v8267_v25  ;;  %v7906_v47 = vld [vmem:[%s12864_s7 + $0x8e0] sm:$0xff] }
 0x171   : > { %v8030_v48 = vld [vmem:[%s12864_s7 + $0xcc0] sm:$0xff]  ;;  %v8163_v49 = vcombine.high %v7902_v46, %v7906_v47  ;;  %v8162_v53 = vcombine.low %v7902_v46, %v7906_v47 }
 0x172   : > { %v8034_v50 = vld [vmem:[%s12864_s7 + $0xce0] sm:$0xff] }
 0x173   : > { %v8290_v54 = vcombine.low %v8030_v48, %v8034_v50  ;;  %v8291_v57 = vcombine.high %v8030_v48, %v8034_v50  ;;  %v7910_v58 = vld [vmem:[%s12864_s7 + $0x900] sm:$0xff]  ;;  %v1881_v48 = vld [vmem:[#allocation2 + $0x8] sm:$0x11]  ;;  %v1889_v50 = vld [vmem:[#allocation2 + $0x10] sm:$0x11] }
 0x174   : > { %v7914_v59 = vld [vmem:[%s12864_s7 + $0x920] sm:$0xff] }
 0x175   : > { %v8038_v60 = vld [vmem:[%s12864_s7 + $0xd00] sm:$0xff]  ;;  %v8171_v61 = vcombine.high %v7910_v58, %v7914_v59  ;;  %v8170_v63 = vcombine.low %v7910_v58, %v7914_v59  ;;  %v10504_v58 = vld [vmem:[%s12864_s7 + $0x828] sm:$0xff] }
 0x176   : > { %v8298_v0 = vcombine.low %v8038_v60, %v8042_v62  ;;  %v8299_v1 = vcombine.high %v8038_v60, %v8042_v62  ;;  %v7918_v2 = vld [vmem:[%s12864_s7 + $0x940] sm:$0xff] }
 0x177   : > { %v7934_v19 = vld [vmem:[%s12864_s7 + $0x9c0] sm:$0xff] }
 0x178   : > { %v7938_v20 = vld [vmem:[%s12864_s7 + $0x9e0] sm:$0xff] }
 0x179   : > { %v8062_v21 = vld [vmem:[%s12864_s7 + $0xdc0] sm:$0xff]  ;;  %v8195_v22 = vcombine.high %v7934_v19, %v7938_v20 }
 0x17a   : > { %v7942_v4 = vld [vmem:[%s12864_s7 + $0xa00] sm:$0xff] }
 0x17b   : > { %v7946_v27 = vld [vmem:[%s12864_s7 + $0xa20] sm:$0xff] }
 0x17c   : > { %v8203_v29 = vcombine.high %v7942_v4, %v7946_v27  ;;  %v7950_v34 = vld [vmem:[%s12864_s7 + $0xa40] sm:$0xff] }
 0x17d   : > { %v7954_v35 = vld [vmem:[%s12864_s7 + $0xa60] sm:$0xff] }
 0x17e   : > { %v8211_v37 = vcombine.high %v7950_v34, %v7954_v35  ;;  %v1878_v47 = vld [vmem:[#allocation2] sm:$0x11] }
 0x17f   : > { %v7958_v59 = vld [vmem:[%s12864_s7 + $0xa80] sm:$0xff] }
 0x180   : > { %v7962_v60 = vld [vmem:[%s12864_s7 + $0xaa0] sm:$0xff] }
 0x181   : > { %v8219_v62 = vcombine.high %v7958_v59, %v7962_v60 }
 0x240   : > { %v9204_v3 = vpop.f32.mrb[4].mxu0  ;;  %v9239_v5 = vpop.f32.mrb[4].mxu1 }
 0x241   : > { %v9205_v6 = vpop.f32.mrb[5].mxu0  ;;  %v9240_v7 = vpop.f32.mrb[5].mxu1 }
 0x242   : > { %v9206_v8 = vadd.f32 %v9205_v6, %v9204_v3  ;;  %v9241_v9 = vadd.f32 %v9240_v7, %v9239_v5  ;;  %v7922_v3 = vld [vmem:[%s12864_s7 + $0x960] sm:$0xff] }
 0x243   : > { %v8046_v5 = vld [vmem:[%s12864_s7 + $0xd40] sm:$0xff]  ;;  %v8179_v6 = vcombine.high %v7918_v2, %v7922_v3 }
 0x244   : > { %v1562_v10 = vadd.f32 %v9241_v9, %v9206_v8  ;;  %v8050_v7 = vld [vmem:[%s12864_s7 + $0xd60] sm:$0xff]  ;;  %v8178_v8 = vcombine.low %v7918_v2, %v7922_v3 }
 0x245   : > { %v8306_v9 = vcombine.low %v8046_v5, %v8050_v7  ;;  %v7966_v3 = vld [vmem:[%s12864_s7 + $0xac0] sm:$0xff] }
 0x246   : > { %v1566_v11 = vmul.f32 0.001953125, %v1562_v10  ;;  %v8307_v10 = vcombine.high %v8046_v5, %v8050_v7  ;;  %v7970_v5 = vld [vmem:[%s12864_s7 + $0xae0] sm:$0xff] }
 0x248   : > { %v1567_v12 = vmul.f32 %v1566_v11, %v1566_v11 }
 0x24a   : > { %v1569_v13 = vrot.slane %v1567_v12, 7  ;;  %v7930_v12 = vld [vmem:[%s12864_s7 + $0x9a0] sm:$0xff] }
 0x24c   : > { %v1571_v14 = vsub.f32 %v1566_v11, %v1569_v13  ;;  %v8054_v13 = vld [vmem:[%s12864_s7 + $0xd80] sm:$0xff] }
 0x24e   : > { %v1572_v15 = vadd.f32 1e-05, %v1571_v14 }
 0x250   : > { %9524 = vrsqrt.f32 %v1572_v15  ;;  %v8058_v15 = vld [vmem:[%s12864_s7 + $0xda0] sm:$0xff] }
 0x251   : > { %v8315_v18 = vcombine.high %v8054_v13, %v8058_v15 }
 0x25a   : > { %v9525_v16 = vpop.eup %9524 }
 0x25b   : > { %v1574_v17 = vsel %vm1356_vm0, %v1566_v11, %v9525_v16  ;;  %v7926_v11 = vld [vmem:[%s12864_s7 + $0x980] sm:$0xff]  ;;  %vm10446_vm0 = vmand %vm1931_vm14, %vm1886_vm8 }
 0x25c   : > { %7870 = vmatmul.mubr.msk.f32.vlgmr.msra.gmra.mrb[6].mxu0 %vm1579_vm1, %v1574_v17  ;;  %7871 = vmatmul.mubr.msk.f32.vlgmr.msra.gmra.mrb[6].mxu1 %vm1579_vm1, %v1574_v17  ;;  %v8187_v14 = vcombine.high %v7926_v11, %v7930_v12  ;;  %v8186_v16 = vcombine.low %v7926_v11, %v7930_v12  ;;  %v8314_v17 = vcombine.low %v8054_v13, %v8058_v15  ;;  %v7974_v15 = vld [vmem:[%s12864_s7 + $0xb00] sm:$0xff]  ;;  %vm1933_vm1 = vmor %vm10446_vm0, %vm10435_vm15 }
 0x25d   : > { %3792 = vmatpush1.bf16.msra.mxu0 %v8138_v23  ;;  %3833 = vmatpush1.bf16.msra.mxu1 %v8266_v24  ;;  %v8066_v23 = vld [vmem:[%s12864_s7 + $0xde0] sm:$0xff]  ;;  %v8194_v24 = vcombine.low %v7934_v19, %v7938_v20  ;;  %v8226_v11 = vcombine.low %v7966_v3, %v7970_v5 }
 0x25e   : > { %3793 = vmatprep.subr.bf16.mxu0 %v8147_v28  ;;  %3834 = vmatprep.subr.bf16.mxu1 %v8275_v32  ;;  %v8322_v25 = vcombine.low %v8062_v21, %v8066_v23  ;;  %v8323_v26 = vcombine.high %v8062_v21, %v8066_v23  ;;  %v8070_v28 = vld [vmem:[%s12864_s7 + $0xe00] sm:$0xff] }
 0x25f   : > { %v8102_v19 = vld [vmem:[%s12864_s7 + $0xf00] sm:$0xff] }
 0x260   : > { %v8106_v20 = vld [vmem:[%s12864_s7 + $0xf20] sm:$0xff] }
 0x261   : > { %3794 = vmatpush1.bf16.msra.mxu0 %v8146_v30  ;;  %3835 = vmatpush1.bf16.msra.mxu1 %v8274_v31  ;;  %v8074_v30 = vld [vmem:[%s12864_s7 + $0xe20] sm:$0xff]  ;;  %v8202_v31 = vcombine.low %v7942_v4, %v7946_v27  ;;  %v8362_v23 = vcombine.low %v8102_v19, %v8106_v20 }
 0x262   : > { %3795 = vmatprep.subr.bf16.mxu0 %v8155_v36  ;;  %3836 = vmatprep.subr.bf16.mxu1 %v8283_v45  ;;  %v8330_v32 = vcombine.low %v8070_v28, %v8074_v30  ;;  %v8331_v33 = vcombine.high %v8070_v28, %v8074_v30  ;;  %v8078_v36 = vld [vmem:[%s12864_s7 + $0xe40] sm:$0xff] }
 0x263   : > { %v8114_v27 = vld [vmem:[%s12864_s7 + $0xf60] sm:$0xff] }
 0x264   : > { %v7990_v28 = vld [vmem:[%s12864_s7 + $0xb80] sm:$0xff] }
 0x265   : > { %3796 = vmatpush1.bf16.msra.mxu0 %v8154_v38  ;;  %3837 = vmatpush1.bf16.msra.mxu1 %v8282_v42  ;;  %v8082_v38 = vld [vmem:[%s12864_s7 + $0xe60] sm:$0xff]  ;;  %v8210_v42 = vcombine.low %v7950_v34, %v7954_v35 }
 0x266   : > { %3797 = vmatprep.subr.bf16.mxu0 %v8163_v49  ;;  %3838 = vmatprep.subr.bf16.mxu1 %v8291_v57  ;;  %v8338_v45 = vcombine.low %v8078_v36, %v8082_v38  ;;  %v8339_v46 = vcombine.high %v8078_v36, %v8082_v38  ;;  %v1882_v57 = vsel %vm10392_vm9, 0, %v1881_v48  ;;  %v8002_v38 = vld [vmem:[%s12864_s7 + $0xbe0] sm:$0xff] }
 0x267   : > { %1883 = vst [vmem:[#allocation2 + $0x8] sm:$0x11] %v1882_v57  ;;  %v10499_v57 = vld [vmem:[%s12864_s7 + $0x808] sm:$0xff] }
 0x269   : > { %3798 = vmatpush1.bf16.msra.mxu0 %v8162_v53  ;;  %3839 = vmatpush1.bf16.msra.mxu1 %v8290_v54  ;;  %v1892_v53 = vld [vmem:[#allocation2 + $0x18] sm:$0x11]  ;;  %v1879_v54 = vsel %vm10392_vm9, 0, %v1878_v47 }
 0x26a   : > { %3799 = vmatprep.subr.bf16.mxu0 %v8171_v61  ;;  %3840 = vmatprep.subr.bf16.mxu1 %v8299_v1  ;;  %1880 = vst [vmem:[#allocation2] sm:$0x11] %v1879_v54  ;;  %v8218_v61 = vcombine.low %v7958_v59, %v7962_v60  ;;  %v1893_v7 = vsel %vm1888_vm12, 0, %v1892_v53  ;;  %v10509_v59 = vld [vmem:[%s12864_s7 + $0xc08] sm:$0xff]  ;;  %v8141_v60 = vcombine.high %v10499_v57, %v10504_v58 }
 0x26b   : > { %1894 = vst [vmem:[#allocation2 + $0x18] sm:$0x11] %v1893_v7 }
 0x26d   : > { %3800 = vmatpush1.bf16.msra.mxu0 %v8170_v63  ;;  %3841 = vmatpush1.bf16.msra.mxu1 %v8298_v0  ;;  %v8086_v63 = vld [vmem:[%s12864_s7 + $0xe80] sm:$0xff] }
 0x26e   : > { %3801 = vmatprep.subr.bf16.mxu0 %v8179_v6  ;;  %3842 = vmatprep.subr.bf16.mxu1 %v8307_v10  ;;  %v8090_v0 = vld [vmem:[%s12864_s7 + $0xea0] sm:$0xff]  ;;  %v1890_v6 = vsel %vm1888_vm12, 0, %v1889_v50 }
 0x26f   : > { %v8346_v1 = vcombine.low %v8086_v63, %v8090_v0  ;;  %v8347_v2 = vcombine.high %v8086_v63, %v8090_v0  ;;  %v8098_v10 = vld [vmem:[%s12864_s7 + $0xee0] sm:$0xff]  ;;  %1891 = vst [vmem:[#allocation2 + $0x10] sm:$0x11] %v1890_v6  ;;  %v9553_v6 = vmov 1966171168  }
 0x270   : > { %v1775_v7 = vunpack.c.l.s4 %v9553_v6 }
 0x271   : > { %3802 = vmatpush1.bf16.msra.mxu0 %v8178_v8  ;;  %3843 = vmatpush1.bf16.msra.mxu1 %v8306_v9  ;;  %v8227_v8 = vcombine.high %v7966_v3, %v7970_v5  ;;  %v8094_v9 = vld [vmem:[%s12864_s7 + $0xec0] sm:$0xff] }
 0x272   : > { %3803 = vmatprep.subr.bf16.mxu0 %v8187_v14  ;;  %3844 = vmatprep.subr.bf16.mxu1 %v8315_v18  ;;  %v8355_v12 = vcombine.high %v8094_v9, %v8098_v10  ;;  %v8354_v13 = vcombine.low %v8094_v9, %v8098_v10 }
 0x275   : > { %3804 = vmatpush1.bf16.msra.mxu0 %v8186_v16  ;;  %3845 = vmatpush1.bf16.msra.mxu1 %v8314_v17  ;;  %v7978_v16 = vld [vmem:[%s12864_s7 + $0xb20] sm:$0xff] }
 0x276   : > { %3805 = vmatprep.subr.bf16.mxu0 %v8195_v22  ;;  %3846 = vmatprep.subr.bf16.mxu1 %v8323_v26  ;;  %v8235_v18 = vcombine.high %v7974_v15, %v7978_v16  ;;  %v8234_v21 = vcombine.low %v7974_v15, %v7978_v16  ;;  %v8363_v22 = vcombine.high %v8102_v19, %v8106_v20  ;;  %v8110_v26 = vld [vmem:[%s12864_s7 + $0xf40] sm:$0xff] }
 0x277   : > { %v8371_v30 = vcombine.high %v8110_v26, %v8114_v27  ;;  %v8370_v34 = vcombine.low %v8110_v26, %v8114_v27 }
 0x279   : > { %3806 = vmatpush1.bf16.msra.mxu0 %v8194_v24  ;;  %3847 = vmatpush1.bf16.msra.mxu1 %v8322_v25  ;;  %v7982_v24 = vld [vmem:[%s12864_s7 + $0xb40] sm:$0xff] }
 0x27a   : > { %3807 = vmatprep.subr.bf16.mxu0 %v8203_v29  ;;  %3848 = vmatprep.subr.bf16.mxu1 %v8331_v33  ;;  %v7986_v25 = vld [vmem:[%s12864_s7 + $0xb60] sm:$0xff] }
 0x27b   : > { %v8243_v4 = vcombine.high %v7982_v24, %v7986_v25  ;;  %v7994_v29 = vld [vmem:[%s12864_s7 + $0xba0] sm:$0xff] }
 0x27c   : > { %v8122_v33 = vld [vmem:[%s12864_s7 + $0xfa0] sm:$0xff]  ;;  %v8251_v35 = vcombine.high %v7990_v28, %v7994_v29 }
 0x27d   : > { %3808 = vmatpush1.bf16.msra.mxu0 %v8202_v31  ;;  %3849 = vmatpush1.bf16.msra.mxu1 %v8330_v32  ;;  %v8118_v31 = vld [vmem:[%s12864_s7 + $0xf80] sm:$0xff]  ;;  %v8242_v32 = vcombine.low %v7982_v24, %v7986_v25 }
 0x27e   : > { %3809 = vmatprep.subr.bf16.mxu0 %v8211_v37  ;;  %3850 = vmatprep.subr.bf16.mxu1 %v8339_v46  ;;  %v8379_v36 = vcombine.high %v8118_v31, %v8122_v33  ;;  %v7998_v37 = vld [vmem:[%s12864_s7 + $0xbc0] sm:$0xff]  ;;  %v8250_v46 = vcombine.low %v7990_v28, %v7994_v29  ;;  %v8378_v47 = vcombine.low %v8118_v31, %v8122_v33 }
 0x27f   : > { %v8259_v48 = vcombine.high %v7998_v37, %v8002_v38  ;;  %v8258_v53 = vcombine.low %v7998_v37, %v8002_v38 }
 0x281   : > { %3810 = vmatpush1.bf16.msra.mxu0 %v8210_v42  ;;  %3851 = vmatpush1.bf16.msra.mxu1 %v8338_v45  ;;  %v8126_v42 = vld [vmem:[%s12864_s7 + $0xfc0] sm:$0xff] }
 0x282   : > { %3811 = vmatprep.subr.bf16.mxu0 %v8219_v62  ;;  %3852 = vmatprep.subr.bf16.mxu1 %v8347_v2  ;;  %v8130_v45 = vld [vmem:[%s12864_s7 + $0xfe0] sm:$0xff]  ;;  %v8140_v62 = vcombine.low %v10499_v57, %v10504_v58  ;;  %v7903_v58 = vld [vmem:[%s12864_s7 + $0x8c8] sm:$0xff] }
 0x283   : > { %v8387_v50 = vcombine.high %v8126_v42, %v8130_v45  ;;  %v8386_v54 = vcombine.low %v8126_v42, %v8130_v45 }
 0x285   : > { %3812 = vmatpush1.bf16.msra.mxu0 %v8218_v61  ;;  %3853 = vmatpush1.bf16.msra.mxu1 %v8346_v1  ;;  %v10516_v61 = vld [vmem:[%s12864_s7 + $0xc28] sm:$0xff]  ;;  %v1725_v1 = vld [vmem:[%s12860_s3] sm:$0xf] }
 0x286   : > { %3813 = vmatprep.subr.bf16.mxu0 %v8227_v8  ;;  %3854 = vmatprep.subr.bf16.mxu1 %v8355_v12  ;;  %v8268_v63 = vcombine.low %v10509_v59, %v10516_v61  ;;  %v8269_v0 = vcombine.high %v10509_v59, %v10516_v61  ;;  %v1730_v2 = vrot.slane %v1725_v1, %v10211_v40  ;;  %v8031_v59 = vld [vmem:[%s12864_s7 + $0xcc8] sm:$0xff] }
 0x287   : > { %v1738_v3 = vrot.slane %v1725_v1, %v10214_v41  ;;  %v1734_v5 = vrot.slane %v1725_v1, %v10220_v43  ;;  %v1742_v8 = vrot.slane %v1725_v1, %v10223_v44  ;;  %v8035_v61 = vld [vmem:[%s12864_s7 + $0xce8] sm:$0xff] }
 0x289   : > { %3814 = vmatpush1.bf16.msra.mxu0 %v8226_v11  ;;  %3855 = vmatpush1.bf16.msra.mxu1 %v8354_v13 }
 0x28a   : > { %3815 = vmatprep.subr.bf16.mxu0 %v8235_v18  ;;  %3856 = vmatprep.subr.bf16.mxu1 %v8363_v22  ;;  %v1776_v18 = vunpack.c.0.s8 %v1775_v7 }
 0x28d   : > { %3816 = vmatpush1.bf16.msra.mxu0 %v8234_v21  ;;  %3857 = vmatpush1.bf16.msra.mxu1 %v8362_v23 }
 0x28e   : > { %3817 = vmatprep.subr.bf16.mxu0 %v8243_v4  ;;  %3858 = vmatprep.subr.bf16.mxu1 %v8371_v30  ;;  %v1779_v4 = vsub.s32 %v1776_v18, %v10208_v39 }
 0x291   : > { %3818 = vmatpush1.bf16.msra.mxu0 %v8242_v32  ;;  %3859 = vmatpush1.bf16.msra.mxu1 %v8370_v34 }
 0x292   : > { %3819 = vmatprep.subr.bf16.mxu0 %v8251_v35  ;;  %3860 = vmatprep.subr.bf16.mxu1 %v8379_v36  ;;  %v1751_v36 = vld [vmem:[%s12861_s4] sm:$0xf] }
 0x295   : > { %3820 = vmatpush1.bf16.msra.mxu0 %v8250_v46  ;;  %3861 = vmatpush1.bf16.msra.mxu1 %v8378_v47 }
 0x296   : > { %3821 = vmatprep.subr.bf16.mxu0 %v8259_v48  ;;  %3862 = vmatprep.subr.bf16.mxu1 %v8387_v50 }
 0x299   : > { %3822 = vmatpush1.bf16.msra.mxu0 %v8258_v53  ;;  %3863 = vmatpush1.bf16.msra.mxu1 %v8386_v54 }
 0x29a   : > { %3873 = vmatprep.subr.bf16.mxu0 %v8141_v60  ;;  %3914 = vmatprep.subr.bf16.mxu1 %v8269_v0 }
 0x32f   : > { %v1649_v9 = vpop.f32.mrb[6].mxu0  ;;  %v1720_v10 = vpop.f32.mrb[6].mxu1 }
 0x330   : > { %v1747_v11 = vmul.f32 %v1730_v2, %v1649_v9  ;;  %v1749_v12 = vmul.f32 %v1738_v3, %v1720_v10  ;;  %v1651_v13 = vpop.f32.mrb[7].mxu0  ;;  %v1722_v15 = vpop.f32.mrb[7].mxu1 }
 0x331   : > { %v1748_v16 = vmul.f32 %v1734_v5, %v1651_v13  ;;  %v1750_v19 = vmul.f32 %v1742_v8, %v1722_v15 }
 0x332   : > { %v1756_v20 = vrot.slane %v1747_v11, 1  ;;  %v1758_v21 = vrot.slane %v1749_v12, 1  ;;  %v1801_v33 = vrot.slane %v1747_v11, %v10220_v43  ;;  %v1809_v34 = vrot.slane %v1749_v12, %v10220_v43 }
 0x333   : > { %v1757_v22 = vrot.slane %v1748_v16, 1  ;;  %v1759_v23 = vrot.slane %v1750_v19, 1  ;;  %v1805_v35 = vrot.slane %v1748_v16, %v10220_v43  ;;  %v1813_v37 = vrot.slane %v1750_v19, %v10220_v43 }
 0x334   : > { %v1764_v24 = vmul.f32 %v1756_v20, %v1649_v9  ;;  %v1766_v25 = vmul.f32 %v1758_v21, %v1720_v10  ;;  %v1814_v45 = vmul.f32 %v10229_v51, %v1801_v33  ;;  %v1816_v46 = vmul.f32 %v10231_v52, %v1809_v34  ;;  %v1937_v34 = vld [vmem:[#allocation2 + $0x8] sm:$0xff] }
 0x335   : > { %v1765_v26 = vmul.f32 %v1757_v22, %v1651_v13  ;;  %v1767_v27 = vmul.f32 %v1759_v23, %v1722_v15  ;;  %v1815_v47 = vmul.f32 %v10233_v55, %v1805_v35  ;;  %v1817_v48 = vmul.f32 %v10235_v56, %v1813_v37  ;;  %v1943_v35 = vld [vmem:[#allocation2 + $0x18] sm:$0x11] }
 0x337   : > { %v1772_v28 = vcombine.low %v1764_v24, %v1765_v26  ;;  %v1773_v29 = vcombine.low %v1766_v25, %v1767_v27 }
 0x339   : > { %v1780_v30 = vrot.slane %v1772_v28, %v1779_v4  ;;  %v1787_v31 = vrot.slane %v1773_v29, %v1779_v4  ;;  %v1934_v28 = vld [vmem:[#allocation2] sm:$0xff]  ;;  %v1940_v29 = vld [vmem:[#allocation2 + $0x10] sm:$0x11] }
 0x33b   : > { %v1788_v32 = vcombine.low %v1780_v30, %v1787_v31 }
 0x33d   : > { %v1795_v38 = vrot.slane %v1788_v32, %v1779_v4 }
 0x33f   : > { %v1797_v42 = vsub.f32 %v1751_v36, %v1795_v38 }
 0x341   : > { %v1822_v50 = vrot.slane %v1797_v42, %v10211_v40  ;;  %v1826_v53 = vrot.slane %v1797_v42, %v10220_v43  ;;  %v1830_v54 = vrot.slane %v1797_v42, %v10214_v41  ;;  %v1834_v60 = vrot.slane %v1797_v42, %v10223_v44 }
 0x343   : > { %v1839_v0 = vadd.f32 %v1822_v50, %v1814_v45  ;;  %v1840_v1 = vadd.f32 %v1826_v53, %v1815_v47  ;;  %v1841_v2 = vadd.f32 %v1830_v54, %v1816_v46  ;;  %v1842_v3 = vadd.f32 %v1834_v60, %v1817_v48 }
 0x345   : > { %v7872_v5 = vmul.f32 -1.442695, %v1839_v0  ;;  %v7873_v51 = vmul.f32 -1.442695, %v1840_v1  ;;  %v7874_v6 = vmul.f32 -1.442695, %v1841_v2 }
 0x346   : > { %v7875_v52 = vmul.f32 -1.442695, %v1842_v3 }
 0x347   : > { %9526 = vpow2.f32 %v7872_v5 }
 0x348   : > { %9528 = vpow2.f32 %v7873_v51  ;;  %v7887_v51 = vld [vmem:[%s12864_s7 + $0x848] sm:$0xff] }
 0x349   : > { %9530 = vpow2.f32 %v7874_v6 }
 0x34a   : > { %9532 = vpow2.f32 %v7875_v52 }
 0x351   : > { %v9527_v55 = vpop.eup %9526 }
 0x352   : > { %v9529_v56 = vpop.eup %9528  ;;  %v1855_v7 = vadd.f32 1.0, %v9527_v55 }
 0x353   : > { %v9531_v8 = vpop.eup %9530  ;;  %v1856_v9 = vadd.f32 1.0, %v9529_v56  ;;  %v7891_v56 = vld [vmem:[%s12864_s7 + $0x868] sm:$0xff] }
 0x354   : > { %v9533_v10 = vpop.eup %9532  ;;  %v1857_v11 = vadd.f32 1.0, %v9531_v8  ;;  %9534 = vrcp.f32 %v1855_v7  ;;  %v8015_v7 = vld [vmem:[%s12864_s7 + $0xc48] sm:$0xff] }
 0x355   : > { %v1858_v12 = vadd.f32 1.0, %v9533_v10  ;;  %9536 = vrcp.f32 %v1856_v9  ;;  %v8019_v8 = vld [vmem:[%s12864_s7 + $0xc68] sm:$0xff] }
 0x356   : > { %9538 = vrcp.f32 %v1857_v11  ;;  %v8276_v57 = vcombine.low %v8015_v7, %v8019_v8 }
 0x357   : > { %9540 = vrcp.f32 %v1858_v12 }
 0x35e   : > { %v9535_v13 = vpop.eup %9534 }
 0x35f   : > { %v9537_v15 = vpop.eup %9536  ;;  %v1867_v16 = vmul.f32 %v9535_v13, %v1839_v0  ;;  %v7895_v13 = vld [vmem:[%s12864_s7 + $0x888] sm:$0xff] }
 0x360   : > { %v9539_v18 = vpop.eup %9538  ;;  %v1868_v19 = vmul.f32 %v9537_v15, %v1840_v1  ;;  %v7899_v15 = vld [vmem:[%s12864_s7 + $0x8a8] sm:$0xff] }
 0x361   : > { %v9541_v20 = vpop.eup %9540  ;;  %v1869_v21 = vmul.f32 %v9539_v18, %v1841_v2  ;;  %v8149_v18 = vcombine.high %v7887_v51, %v7891_v56 }
 0x362   : > { %v1870_v22 = vmul.f32 %v9541_v20, %v1842_v3  ;;  %v9170_v23 = vpack.c.bf16 %v1868_v19, %v1867_v16  ;;  %v8277_v19 = vcombine.high %v8015_v7, %v8019_v8  ;;  %v8148_v20 = vcombine.low %v7887_v51, %v7891_v56  ;;  %v8067_v56 = vld [vmem:[%s12864_s7 + $0xde8] sm:$0xff] }
 0x364   : > { %v9171_v24 = vpack.c.bf16 %v1870_v22, %v1869_v21  ;;  %v1910_v25 = vshrl.u32 %v9170_v23, 16  ;;  %v1913_v4 = vshll.u32 %v9170_v23, 16  ;;  %v8023_v21 = vld [vmem:[%s12864_s7 + $0xc88] sm:$0xff]  ;;  %v8157_v23 = vcombine.high %v7895_v13, %v7899_v15 }
 0x365   : > { %v8027_v22 = vld [vmem:[%s12864_s7 + $0xca8] sm:$0xff] }
 0x366   : > { %v1912_v26 = vrot.slane %v1910_v25, 7  ;;  %v1917_v27 = vshrl.u32 %v9171_v24, 16  ;;  %v1920_v32 = vshll.u32 %v9171_v24, 16  ;;  %v8285_v24 = vcombine.high %v8023_v21, %v8027_v22 }
 0x367   : > { %v8156_v25 = vcombine.low %v7895_v13, %v7899_v15 }
 0x368   : > { %v1915_v30 = vor.u32 %v1913_v4, %v1912_v26  ;;  %v1919_v31 = vrot.slane %v1917_v27, 7  ;;  %v1923_v33 = vrot.slane %v1912_v26, 4  ;;  %v8284_v26 = vcombine.low %v8023_v21, %v8027_v22  ;;  %v7911_v4 = vld [vmem:[%s12864_s7 + $0x908] sm:$0xff] }
 0x369   : > { %v7915_v27 = vld [vmem:[%s12864_s7 + $0x928] sm:$0xff] }
 0x36a   : > { %v1922_v36 = vor.u32 %v1920_v32, %v1919_v31  ;;  %v1924_v37 = vrot.slane %v1919_v31, 4  ;;  %v1935_v38 = vsel %vm1933_vm1, %v1915_v30, %v1934_v28  ;;  %v1941_v42 = vsel %vm10392_vm9, %v1923_v33, %v1940_v29  ;;  %v8039_v30 = vld [vmem:[%s12864_s7 + $0xd08] sm:$0xff] }
 0x36b   : > { %1936 = vst [vmem:[#allocation2] sm:$0xff] %v1935_v38  ;;  %1942 = vst [vmem:[#allocation2 + $0x10] sm:$0x11] %v1941_v42  ;;  %v8293_v28 = vcombine.high %v8031_v59, %v8035_v61  ;;  %v8043_v31 = vld [vmem:[%s12864_s7 + $0xd28] sm:$0xff]  ;;  %v8173_v32 = vcombine.high %v7911_v4, %v7915_v27  ;;  %v8292_v33 = vcombine.low %v8031_v59, %v8035_v61 }
 0x36c   : > { %v1938_v45 = vsel %vm1933_vm1, %v1922_v36, %v1937_v34  ;;  %v1944_v46 = vsel %vm10392_vm9, %v1924_v37, %v1943_v35  ;;  %v7919_v34 = vld [vmem:[%s12864_s7 + $0x948] sm:$0xff]  ;;  %v8301_v36 = vcombine.high %v8039_v30, %v8043_v31  ;;  %v8172_v37 = vcombine.low %v7911_v4, %v7915_v27 }
 0x36d   : > { %1939 = vst [vmem:[#allocation2 + $0x8] sm:$0xff] %v1938_v45  ;;  %1945 = vst [vmem:[#allocation2 + $0x18] sm:$0x11] %v1944_v46  ;;  %v7923_v35 = vld [vmem:[%s12864_s7 + $0x968] sm:$0xff]  ;;  %v8300_v46 = vcombine.low %v8039_v30, %v8043_v31 }
 0x36e   : > { %v8051_v42 = vld [vmem:[%s12864_s7 + $0xd68] sm:$0xff] }
 0x36f   : > { %v7951_v22 = vld [vmem:[%s12864_s7 + $0xa48] sm:$0xff] }
 0x370   : > { %v7959_v61 = vld [vmem:[%s12864_s7 + $0xa88] sm:$0xff] }
 0x371   : > { %v8087_v27 = vld [vmem:[%s12864_s7 + $0xe88] sm:$0xff] }
 0x372   : > { %v1948_v47 = vld [vmem:[#allocation2 + $0x10] sm:$0x11]  ;;  %v7967_v31 = vld [vmem:[%s12864_s7 + $0xac8] sm:$0xff] }
 0x373   : > { %v10561_v48 = vcombine.high %v1935_v38, %v1948_v47  ;;  %v10563_v50 = vcombine.low %v1935_v38, %v1948_v47  ;;  %v8047_v38 = vld [vmem:[%s12864_s7 + $0xd48] sm:$0xff] }
 0x374   : > { %v1949_v53 = vld [vmem:[#allocation2 + $0x18] sm:$0x11]  ;;  %v7927_v47 = vld [vmem:[%s12864_s7 + $0x988] sm:$0xff] }
 0x375   : > { %v2489_v54 = vshll.u32 %v10561_v48, 16  ;;  %v10566_v60 = vcombine.high %v1938_v45, %v1949_v53  ;;  %v2482_v17 = vshll.u32 %v10563_v50, 16  ;;  %v10569_v14 = vcombine.low %v1938_v45, %v1949_v53  ;;  %v7931_v53 = vld [vmem:[%s12864_s7 + $0x9a8] sm:$0xff] }
 0x376   : > { %v2487_v0 = vshrl.u32 %v10561_v48, 16  ;;  %v2480_v2 = vshrl.u32 %v10563_v50, 16  ;;  %v8181_v45 = vcombine.high %v7919_v34, %v7923_v35 }
 0x377   : > { %v2491_v49 = vrot.slane %v2489_v54, 1  ;;  %v2503_v1 = vshll.u32 %v10566_v60, 16  ;;  %v2484_v3 = vrot.slane %v2482_v17, 1  ;;  %v2496_v5 = vshll.u32 %v10569_v14, 16 }
 0x378   : > { %v2501_v52 = vshrl.u32 %v10566_v60, 16  ;;  %v2494_v10 = vshrl.u32 %v10569_v14, 16  ;;  %v8309_v54 = vcombine.high %v8047_v38, %v8051_v42  ;;  %v8180_v17 = vcombine.low %v7919_v34, %v7923_v35  ;;  %v8095_v35 = vld [vmem:[%s12864_s7 + $0xec8] sm:$0xff] }
 0x379   : > { %v10578_v6 = vor.u32 %v2491_v49, %v2487_v0  ;;  %v2505_v55 = vrot.slane %v2503_v1, 1  ;;  %v10590_v9 = vor.u32 %v2484_v3, %v2480_v2  ;;  %v2498_v11 = vrot.slane %v2496_v5, 1  ;;  %v8055_v0 = vld [vmem:[%s12864_s7 + $0xd88] sm:$0xff] }
 0x37a   : > { %v8059_v49 = vld [vmem:[%s12864_s7 + $0xda8] sm:$0xff]  ;;  %v8189_v1 = vcombine.high %v7927_v47, %v7931_v53  ;;  %v8308_v2 = vcombine.low %v8047_v38, %v8051_v42 }
 0x37b   : > { %3823 = vmatprep.mubr.bf16.mxu0 %v10578_v6  ;;  %v10594_v12 = vor.u32 %v2505_v55, %v2501_v52  ;;  %v10603_v16 = vor.u32 %v2498_v11, %v2494_v10  ;;  %v7935_v3 = vld [vmem:[%s12864_s7 + $0x9c8] sm:$0xff]  ;;  %v8317_v51 = vcombine.high %v8055_v0, %v8059_v49  ;;  %v8188_v52 = vcombine.low %v7927_v47, %v7931_v53 }
 0x37c   : > { %3824 = vmatmul.mubr.bf16.vlgmr.msra.gmra.mrb[8].mxu0 %v10590_v9  ;;  %v7939_v5 = vld [vmem:[%s12864_s7 + $0x9e8] sm:$0xff]  ;;  %v8316_v8 = vcombine.low %v8055_v0, %v8059_v49 }
 0x37d   : > { %3864 = vmatprep.mubr.bf16.mxu1 %v10594_v12  ;;  %3874 = vmatpush1.bf16.msra.mxu0 %v8140_v62  ;;  %v7907_v62 = vld [vmem:[%s12864_s7 + $0x8e8] sm:$0xff]  ;;  %v8197_v7 = vcombine.high %v7935_v3, %v7939_v5  ;;  %v8196_v15 = vcombine.low %v7935_v3, %v7939_v5 }
 0x37e   : > { %3865 = vmatmul.mubr.bf16.vlgmr.msra.gmra.mrb[8].mxu1 %v10603_v16  ;;  %3905 = vmatprep.mubr.bf16.mxu0 %v10578_v6  ;;  %v8164_v29 = vcombine.low %v7903_v58, %v7907_v62  ;;  %v8063_v55 = vld [vmem:[%s12864_s7 + $0xdc8] sm:$0xff] }
 0x37f   : > { %3915 = vmatpush1.bf16.msra.mxu1 %v8268_v63  ;;  %3946 = vmatprep.mubr.bf16.mxu1 %v10594_v12  ;;  %v8165_v63 = vcombine.high %v7903_v58, %v7907_v62  ;;  %v7943_v10 = vld [vmem:[%s12864_s7 + $0xa08] sm:$0xff]  ;;  %v8325_v13 = vcombine.high %v8063_v55, %v8067_v56  ;;  %v8324_v21 = vcombine.low %v8063_v55, %v8067_v56 }
 0x380   : > { %3875 = vmatprep.subr.bf16.mxu0 %v8149_v18  ;;  %3916 = vmatprep.subr.bf16.mxu1 %v8277_v19  ;;  %v7947_v11 = vld [vmem:[%s12864_s7 + $0xa28] sm:$0xff] }
 0x381   : > { %3876 = vmatpush1.bf16.msra.mxu0 %v8148_v20  ;;  %v8071_v18 = vld [vmem:[%s12864_s7 + $0xe08] sm:$0xff]  ;;  %v8205_v20 = vcombine.high %v7943_v10, %v7947_v11  ;;  %v8204_v58 = vcombine.low %v7943_v10, %v7947_v11 }
 0x382   : > { %3877 = vmatprep.subr.bf16.mxu0 %v8157_v23  ;;  %v8075_v19 = vld [vmem:[%s12864_s7 + $0xe28] sm:$0xff] }
 0x383   : > { %3917 = vmatpush1.bf16.msra.mxu1 %v8276_v57  ;;  %v7955_v23 = vld [vmem:[%s12864_s7 + $0xa68] sm:$0xff]  ;;  %v8333_v57 = vcombine.high %v8071_v18, %v8075_v19  ;;  %v8332_v59 = vcombine.low %v8071_v18, %v8075_v19 }
 0x384   : > { %3918 = vmatprep.subr.bf16.mxu1 %v8285_v24  ;;  %v8079_v62 = vld [vmem:[%s12864_s7 + $0xe48] sm:$0xff]  ;;  %v8212_v4 = vcombine.low %v7951_v22, %v7955_v23 }
 0x385   : > { %3878 = vmatpush1.bf16.msra.mxu0 %v8156_v25  ;;  %v8083_v24 = vld [vmem:[%s12864_s7 + $0xe68] sm:$0xff]  ;;  %v8213_v25 = vcombine.high %v7951_v22, %v7955_v23 }
 0x386   : > { %3879 = vmatprep.subr.bf16.mxu0 %v8165_v63  ;;  %v7963_v63 = vld [vmem:[%s12864_s7 + $0xaa8] sm:$0xff]  ;;  %v8340_v30 = vcombine.low %v8079_v62, %v8083_v24 }
 0x387   : > { %3919 = vmatpush1.bf16.msra.mxu1 %v8284_v26  ;;  %v8341_v26 = vcombine.high %v8079_v62, %v8083_v24  ;;  %v8220_v34 = vcombine.low %v7959_v61, %v7963_v63  ;;  %v7975_v42 = vld [vmem:[%s12864_s7 + $0xb08] sm:$0xff]  ;;  %v7880_v24 = vld [vmem:[%s12864_s7 + $0x810] sm:$0xff] }
 0x388   : > { %3920 = vmatprep.subr.bf16.mxu1 %v8293_v28  ;;  %v8091_v28 = vld [vmem:[%s12864_s7 + $0xea8] sm:$0xff] }
 0x389   : > { %3880 = vmatpush1.bf16.msra.mxu0 %v8164_v29  ;;  %v8221_v29 = vcombine.high %v7959_v61, %v7963_v63  ;;  %v8348_v38 = vcombine.low %v8087_v27, %v8091_v28  ;;  %v8103_v53 = vld [vmem:[%s12864_s7 + $0xf08] sm:$0xff]  ;;  %v8008_v63 = vld [vmem:[%s12864_s7 + $0xc10] sm:$0xff] }
 0x38a   : > { %3881 = vmatprep.subr.bf16.mxu0 %v8173_v32  ;;  %v7971_v32 = vld [vmem:[%s12864_s7 + $0xae8] sm:$0xff] }
 0x38b   : > { %3921 = vmatpush1.bf16.msra.mxu1 %v8292_v33  ;;  %v8349_v33 = vcombine.high %v8087_v27, %v8091_v28  ;;  %v8228_v47 = vcombine.low %v7967_v31, %v7971_v32  ;;  %v7983_v49 = vld [vmem:[%s12864_s7 + $0xb48] sm:$0xff]  ;;  %v7888_v28 = vld [vmem:[%s12864_s7 + $0x850] sm:$0xff] }
 0x38c   : > { %3922 = vmatprep.subr.bf16.mxu1 %v8301_v36  ;;  %v8099_v36 = vld [vmem:[%s12864_s7 + $0xee8] sm:$0xff] }
 0x38d   : > { %3882 = vmatpush1.bf16.msra.mxu0 %v8172_v37  ;;  %v8229_v37 = vcombine.high %v7967_v31, %v7971_v32  ;;  %v8356_v0 = vcombine.low %v8095_v35, %v8099_v36  ;;  %v8111_v5 = vld [vmem:[%s12864_s7 + $0xf48] sm:$0xff]  ;;  %v8016_v32 = vld [vmem:[%s12864_s7 + $0xc50] sm:$0xff] }
 0x38e   : > { %3883 = vmatprep.subr.bf16.mxu0 %v8181_v45  ;;  %v7979_v45 = vld [vmem:[%s12864_s7 + $0xb28] sm:$0xff] }
 0x38f   : > { %3923 = vmatpush1.bf16.msra.mxu1 %v8300_v46  ;;  %v8357_v46 = vcombine.high %v8095_v35, %v8099_v36  ;;  %v8236_v3 = vcombine.low %v7975_v42, %v7979_v45  ;;  %v7991_v56 = vld [vmem:[%s12864_s7 + $0xb88] sm:$0xff]  ;;  %v7896_v36 = vld [vmem:[%s12864_s7 + $0x890] sm:$0xff] }
 0x390   : > { %3924 = vmatprep.subr.bf16.mxu1 %v8309_v54  ;;  %v8107_v54 = vld [vmem:[%s12864_s7 + $0xf28] sm:$0xff] }
 0x391   : > { %3884 = vmatpush1.bf16.msra.mxu0 %v8180_v17  ;;  %v8237_v17 = vcombine.high %v7975_v42, %v7979_v45  ;;  %v8364_v55 = vcombine.low %v8103_v53, %v8107_v54  ;;  %v8119_v11 = vld [vmem:[%s12864_s7 + $0xf88] sm:$0xff]  ;;  %v8024_v45 = vld [vmem:[%s12864_s7 + $0xc90] sm:$0xff] }
 0x392   : > { %3885 = vmatprep.subr.bf16.mxu0 %v8189_v1  ;;  %v7987_v1 = vld [vmem:[%s12864_s7 + $0xb68] sm:$0xff] }
 0x393   : > { %3925 = vmatpush1.bf16.msra.mxu1 %v8308_v2  ;;  %v8365_v2 = vcombine.high %v8103_v53, %v8107_v54  ;;  %v8244_v10 = vcombine.low %v7983_v49, %v7987_v1  ;;  %v7999_v19 = vld [vmem:[%s12864_s7 + $0xbc8] sm:$0xff]  ;;  %v7904_v54 = vld [vmem:[%s12864_s7 + $0x8d0] sm:$0xff] }
 0x394   : > { %3926 = vmatprep.subr.bf16.mxu1 %v8317_v51  ;;  %v8115_v51 = vld [vmem:[%s12864_s7 + $0xf68] sm:$0xff] }
 0x395   : > { %3886 = vmatpush1.bf16.msra.mxu0 %v8188_v52  ;;  %v8245_v52 = vcombine.high %v7983_v49, %v7987_v1  ;;  %v8372_v18 = vcombine.low %v8111_v5, %v8115_v51  ;;  %v8127_v23 = vld [vmem:[%s12864_s7 + $0xfc8] sm:$0xff]  ;;  %v8032_v1 = vld [vmem:[%s12864_s7 + $0xcd0] sm:$0xff] }
 0x396   : > { %3887 = vmatprep.subr.bf16.mxu0 %v8197_v7  ;;  %v7995_v7 = vld [vmem:[%s12864_s7 + $0xba8] sm:$0xff] }
 0x397   : > { %3927 = vmatpush1.bf16.msra.mxu1 %v8316_v8  ;;  %v8373_v8 = vcombine.high %v8111_v5, %v8115_v51  ;;  %v8252_v22 = vcombine.low %v7991_v56, %v7995_v7  ;;  %v7912_v51 = vld [vmem:[%s12864_s7 + $0x910] sm:$0xff] }
 0x398   : > { %3928 = vmatprep.subr.bf16.mxu1 %v8325_v13  ;;  %v8123_v13 = vld [vmem:[%s12864_s7 + $0xfa8] sm:$0xff] }
 0x399   : > { %3888 = vmatpush1.bf16.msra.mxu0 %v8196_v15  ;;  %v8253_v15 = vcombine.high %v7991_v56, %v7995_v7  ;;  %v8380_v62 = vcombine.low %v8119_v11, %v8123_v13  ;;  %v8040_v7 = vld [vmem:[%s12864_s7 + $0xd10] sm:$0xff] }
 0x39a   : > { %3889 = vmatprep.subr.bf16.mxu0 %v8205_v20  ;;  %v8003_v20 = vld [vmem:[%s12864_s7 + $0xbe8] sm:$0xff] }
 0x39b   : > { %3929 = vmatpush1.bf16.msra.mxu1 %v8324_v21  ;;  %v8381_v21 = vcombine.high %v8119_v11, %v8123_v13  ;;  %v8260_v61 = vcombine.low %v7999_v19, %v8003_v20  ;;  %v7920_v13 = vld [vmem:[%s12864_s7 + $0x950] sm:$0xff] }
 0x39c   : > { %3930 = vmatprep.subr.bf16.mxu1 %v8333_v57  ;;  %v8131_v57 = vld [vmem:[%s12864_s7 + $0xfe8] sm:$0xff] }
 0x39d   : > { %3890 = vmatpush1.bf16.msra.mxu0 %v8204_v58  ;;  %v8261_v58 = vcombine.high %v7999_v19, %v8003_v20  ;;  %v8388_v27 = vcombine.low %v8127_v23, %v8131_v57  ;;  %v8048_v20 = vld [vmem:[%s12864_s7 + $0xd50] sm:$0xff] }
 0x39e   : > { %3891 = vmatprep.subr.bf16.mxu0 %v8213_v25  ;;  %v7884_v25 = vld [vmem:[%s12864_s7 + $0x830] sm:$0xff] }
 0x39f   : > { %3931 = vmatpush1.bf16.msra.mxu1 %v8332_v59  ;;  %v8389_v59 = vcombine.high %v8127_v23, %v8131_v57  ;;  %v8142_v31 = vcombine.low %v7880_v24, %v7884_v25  ;;  %v7928_v57 = vld [vmem:[%s12864_s7 + $0x990] sm:$0xff] }
 0x3a0   : > { %3932 = vmatprep.subr.bf16.mxu1 %v8341_v26  ;;  %v8012_v26 = vld [vmem:[%s12864_s7 + $0xc30] sm:$0xff] }
 0x3a1   : > { %3892 = vmatpush1.bf16.msra.mxu0 %v8212_v4  ;;  %v8143_v4 = vcombine.high %v7880_v24, %v7884_v25  ;;  %v8270_v35 = vcombine.low %v8008_v63, %v8012_v26  ;;  %v8056_v25 = vld [vmem:[%s12864_s7 + $0xd90] sm:$0xff] }
 0x3a2   : > { %3893 = vmatprep.subr.bf16.mxu0 %v8221_v29  ;;  %v7892_v29 = vld [vmem:[%s12864_s7 + $0x870] sm:$0xff] }
 0x3a3   : > { %3933 = vmatpush1.bf16.msra.mxu1 %v8340_v30  ;;  %v8271_v30 = vcombine.high %v8008_v63, %v8012_v26  ;;  %v8150_v42 = vcombine.low %v7888_v28, %v7892_v29  ;;  %v7936_v26 = vld [vmem:[%s12864_s7 + $0x9d0] sm:$0xff] }
 0x3a4   : > { %3934 = vmatprep.subr.bf16.mxu1 %v8349_v33  ;;  %v8020_v33 = vld [vmem:[%s12864_s7 + $0xc70] sm:$0xff] }
 0x3a5   : > { %3894 = vmatpush1.bf16.msra.mxu0 %v8220_v34  ;;  %v8151_v34 = vcombine.high %v7888_v28, %v7892_v29  ;;  %v8278_v53 = vcombine.low %v8016_v32, %v8020_v33  ;;  %v8064_v29 = vld [vmem:[%s12864_s7 + $0xdd0] sm:$0xff] }
 0x3a6   : > { %3895 = vmatprep.subr.bf16.mxu0 %v8229_v37  ;;  %v7900_v37 = vld [vmem:[%s12864_s7 + $0x8b0] sm:$0xff] }
 0x3a7   : > { %3935 = vmatpush1.bf16.msra.mxu1 %v8348_v38  ;;  %v8279_v38 = vcombine.high %v8016_v32, %v8020_v33  ;;  %v8158_v49 = vcombine.low %v7896_v36, %v7900_v37  ;;  %v7944_v33 = vld [vmem:[%s12864_s7 + $0xa10] sm:$0xff] }
 0x3a8   : > { %3936 = vmatprep.subr.bf16.mxu1 %v8357_v46  ;;  %v8028_v46 = vld [vmem:[%s12864_s7 + $0xcb0] sm:$0xff] }
 0x3a9   : > { %3896 = vmatpush1.bf16.msra.mxu0 %v8228_v47  ;;  %v8159_v47 = vcombine.high %v7896_v36, %v7900_v37  ;;  %v8286_v5 = vcombine.low %v8024_v45, %v8028_v46  ;;  %v8072_v37 = vld [vmem:[%s12864_s7 + $0xe10] sm:$0xff] }
 0x3aa   : > { %3897 = vmatprep.subr.bf16.mxu0 %v8237_v17  ;;  %v7908_v17 = vld [vmem:[%s12864_s7 + $0x8f0] sm:$0xff] }
 0x3ab   : > { %3937 = vmatpush1.bf16.msra.mxu1 %v8356_v0  ;;  %v8287_v0 = vcombine.high %v8024_v45, %v8028_v46  ;;  %v8166_v56 = vcombine.low %v7904_v54, %v7908_v17  ;;  %v7952_v46 = vld [vmem:[%s12864_s7 + $0xa50] sm:$0xff] }
 0x3ac   : > { %3938 = vmatprep.subr.bf16.mxu1 %v8365_v2  ;;  %v8036_v2 = vld [vmem:[%s12864_s7 + $0xcf0] sm:$0xff] }
 0x3ad   : > { %3898 = vmatpush1.bf16.msra.mxu0 %v8236_v3  ;;  %v8167_v3 = vcombine.high %v7904_v54, %v7908_v17  ;;  %v8294_v11 = vcombine.low %v8032_v1, %v8036_v2  ;;  %v8080_v17 = vld [vmem:[%s12864_s7 + $0xe50] sm:$0xff] }
 0x3ae   : > { %3899 = vmatprep.subr.bf16.mxu0 %v8245_v52  ;;  %v7916_v52 = vld [vmem:[%s12864_s7 + $0x930] sm:$0xff] }
 0x3af   : > { %3939 = vmatpush1.bf16.msra.mxu1 %v8364_v55  ;;  %v8295_v55 = vcombine.high %v8032_v1, %v8036_v2  ;;  %v8174_v19 = vcombine.low %v7912_v51, %v7916_v52  ;;  %v7960_v2 = vld [vmem:[%s12864_s7 + $0xa90] sm:$0xff] }
 0x3b0   : > { %3940 = vmatprep.subr.bf16.mxu1 %v8373_v8  ;;  %v8044_v8 = vld [vmem:[%s12864_s7 + $0xd30] sm:$0xff] }
 0x3b1   : > { %3900 = vmatpush1.bf16.msra.mxu0 %v8244_v10  ;;  %v8175_v10 = vcombine.high %v7912_v51, %v7916_v52  ;;  %v8302_v23 = vcombine.low %v8040_v7, %v8044_v8  ;;  %v8088_v52 = vld [vmem:[%s12864_s7 + $0xe90] sm:$0xff] }
 0x3b2   : > { %3901 = vmatprep.subr.bf16.mxu0 %v8253_v15  ;;  %v7924_v15 = vld [vmem:[%s12864_s7 + $0x970] sm:$0xff] }
 0x3b3   : > { %3941 = vmatpush1.bf16.msra.mxu1 %v8372_v18  ;;  %v8303_v18 = vcombine.high %v8040_v7, %v8044_v8  ;;  %v8182_v24 = vcombine.low %v7920_v13, %v7924_v15  ;;  %v7968_v8 = vld [vmem:[%s12864_s7 + $0xad0] sm:$0xff] }
 0x3b4   : > { %3942 = vmatprep.subr.bf16.mxu1 %v8381_v21  ;;  %v8052_v21 = vld [vmem:[%s12864_s7 + $0xd70] sm:$0xff] }
 0x3b5   : > { %3902 = vmatpush1.bf16.msra.mxu0 %v8252_v22  ;;  %v8183_v22 = vcombine.high %v7920_v13, %v7924_v15  ;;  %v8310_v63 = vcombine.low %v8048_v20, %v8052_v21  ;;  %v8096_v15 = vld [vmem:[%s12864_s7 + $0xed0] sm:$0xff] }
 0x3b6   : > { %3903 = vmatprep.subr.bf16.mxu0 %v8261_v58  ;;  %v7932_v58 = vld [vmem:[%s12864_s7 + $0x9b0] sm:$0xff] }
 0x3b7   : > { %3943 = vmatpush1.bf16.msra.mxu1 %v8380_v62  ;;  %v8311_v62 = vcombine.high %v8048_v20, %v8052_v21  ;;  %v8190_v28 = vcombine.low %v7928_v57, %v7932_v58  ;;  %v7976_v21 = vld [vmem:[%s12864_s7 + $0xb10] sm:$0xff] }
 0x3b8   : > { %3944 = vmatprep.subr.bf16.mxu1 %v8389_v59  ;;  %v8060_v59 = vld [vmem:[%s12864_s7 + $0xdb0] sm:$0xff] }
 0x3b9   : > { %3904 = vmatpush1.bf16.msra.mxu0 %v8260_v61  ;;  %v8191_v61 = vcombine.high %v7928_v57, %v7932_v58  ;;  %v8318_v32 = vcombine.low %v8056_v25, %v8060_v59  ;;  %v8104_v58 = vld [vmem:[%s12864_s7 + $0xf10] sm:$0xff] }
 0x3ba   : > { %3955 = vmatprep.subr.bf16.mxu0 %v8143_v4  ;;  %v7940_v4 = vld [vmem:[%s12864_s7 + $0x9f0] sm:$0xff] }
 0x3bb   : > { %3945 = vmatpush1.bf16.msra.mxu1 %v8388_v27  ;;  %v8319_v27 = vcombine.high %v8056_v25, %v8060_v59  ;;  %v8198_v36 = vcombine.low %v7936_v26, %v7940_v4  ;;  %v7984_v59 = vld [vmem:[%s12864_s7 + $0xb50] sm:$0xff] }
 0x3bc   : > { %3906 = vmatmul.mubr.bf16.vlgmr.msra.gmra.mrb[12].mxu0 %v10590_v9  ;;  %3996 = vmatprep.subr.bf16.mxu1 %v8271_v30  ;;  %v8068_v30 = vld [vmem:[%s12864_s7 + $0xdf0] sm:$0xff] }
 0x3bd   : > { %3956 = vmatpush1.bf16.msra.mxu0 %v8142_v31  ;;  %3987 = vmatprep.mubr.bf16.mxu0 %v10578_v6  ;;  %v8199_v31 = vcombine.high %v7936_v26, %v7940_v4  ;;  %v8326_v45 = vcombine.low %v8064_v29, %v8068_v30  ;;  %v8112_v4 = vld [vmem:[%s12864_s7 + $0xf50] sm:$0xff] }
 0x3be   : > { %3947 = vmatmul.mubr.bf16.vlgmr.msra.gmra.mrb[12].mxu1 %v10603_v16  ;;  %3957 = vmatprep.subr.bf16.mxu0 %v8151_v34  ;;  %v7948_v34 = vld [vmem:[%s12864_s7 + $0xa30] sm:$0xff] }
 0x3bf   : > { %3997 = vmatpush1.bf16.msra.mxu1 %v8270_v35  ;;  %4028 = vmatprep.mubr.bf16.mxu1 %v10594_v12  ;;  %v8327_v35 = vcombine.high %v8064_v29, %v8068_v30  ;;  %v8206_v54 = vcombine.low %v7944_v33, %v7948_v34  ;;  %v7992_v30 = vld [vmem:[%s12864_s7 + $0xb90] sm:$0xff] }
 0x3c0   : > { %3998 = vmatprep.subr.bf16.mxu1 %v8279_v38  ;;  %v8076_v38 = vld [vmem:[%s12864_s7 + $0xe30] sm:$0xff] }
 0x3c1   : > { %3958 = vmatpush1.bf16.msra.mxu0 %v8150_v42  ;;  %v8207_v42 = vcombine.high %v7944_v33, %v7948_v34  ;;  %v8334_v1 = vcombine.low %v8072_v37, %v8076_v38  ;;  %v8120_v34 = vld [vmem:[%s12864_s7 + $0xf90] sm:$0xff] }
 0x3c2   : > { %3959 = vmatprep.subr.bf16.mxu0 %v8159_v47  ;;  %v7956_v47 = vld [vmem:[%s12864_s7 + $0xa70] sm:$0xff] }
 0x3c3   : > { %3999 = vmatpush1.bf16.msra.mxu1 %v8278_v53  ;;  %v8335_v53 = vcombine.high %v8072_v37, %v8076_v38  ;;  %v8214_v51 = vcombine.low %v7952_v46, %v7956_v47  ;;  %v8000_v38 = vld [vmem:[%s12864_s7 + $0xbd0] sm:$0xff] }
 0x3c4   : > { %4000 = vmatprep.subr.bf16.mxu1 %v8287_v0  ;;  %v8084_v0 = vld [vmem:[%s12864_s7 + $0xe70] sm:$0xff] }
 0x3c5   : > { %3960 = vmatpush1.bf16.msra.mxu0 %v8158_v49  ;;  %v8215_v49 = vcombine.high %v7952_v46, %v7956_v47  ;;  %v8342_v7 = vcombine.low %v8080_v17, %v8084_v0  ;;  %v8128_v47 = vld [vmem:[%s12864_s7 + $0xfd0] sm:$0xff] }
 0x3c6   : > { %3961 = vmatprep.subr.bf16.mxu0 %v8167_v3  ;;  %v7964_v3 = vld [vmem:[%s12864_s7 + $0xab0] sm:$0xff] }
 0x3c7   : > { %4001 = vmatpush1.bf16.msra.mxu1 %v8286_v5  ;;  %v8343_v5 = vcombine.high %v8080_v17, %v8084_v0  ;;  %v8222_v13 = vcombine.low %v7960_v2, %v7964_v3  ;;  %v7881_v0 = vld [vmem:[%s12864_s7 + $0x818] sm:$0xff] }
 0x3c8   : > { %4002 = vmatprep.subr.bf16.mxu1 %v8295_v55  ;;  %v8092_v55 = vld [vmem:[%s12864_s7 + $0xeb0] sm:$0xff] }
 0x3c9   : > { %3962 = vmatpush1.bf16.msra.mxu0 %v8166_v56  ;;  %v8223_v56 = vcombine.high %v7960_v2, %v7964_v3  ;;  %v8350_v20 = vcombine.low %v8088_v52, %v8092_v55  ;;  %v8009_v3 = vld [vmem:[%s12864_s7 + $0xc18] sm:$0xff] }
 0x3ca   : > { %3963 = vmatprep.subr.bf16.mxu0 %v8175_v10  ;;  %v7972_v10 = vld [vmem:[%s12864_s7 + $0xaf0] sm:$0xff] }
 0x3cb   : > { %4003 = vmatpush1.bf16.msra.mxu1 %v8294_v11  ;;  %v8351_v11 = vcombine.high %v8088_v52, %v8092_v55  ;;  %v8230_v57 = vcombine.low %v7968_v8, %v7972_v10  ;;  %v7889_v55 = vld [vmem:[%s12864_s7 + $0x858] sm:$0xff] }
 0x3cc   : > { %4004 = vmatprep.subr.bf16.mxu1 %v8303_v18  ;;  %v8100_v18 = vld [vmem:[%s12864_s7 + $0xef0] sm:$0xff] }
 0x3cd   : > { %3964 = vmatpush1.bf16.msra.mxu0 %v8174_v19  ;;  %v8231_v19 = vcombine.high %v7968_v8, %v7972_v10  ;;  %v8358_v25 = vcombine.low %v8096_v15, %v8100_v18  ;;  %v8017_v10 = vld [vmem:[%s12864_s7 + $0xc58] sm:$0xff] }
 0x3ce   : > { %3965 = vmatprep.subr.bf16.mxu0 %v8183_v22  ;;  %v7980_v22 = vld [vmem:[%s12864_s7 + $0xb30] sm:$0xff] }
 0x3cf   : > { %4005 = vmatpush1.bf16.msra.mxu1 %v8302_v23  ;;  %v8359_v23 = vcombine.high %v8096_v15, %v8100_v18  ;;  %v8238_v26 = vcombine.low %v7976_v21, %v7980_v22  ;;  %v7897_v18 = vld [vmem:[%s12864_s7 + $0x898] sm:$0xff] }
 0x3d0   : > { %4006 = vmatprep.subr.bf16.mxu1 %v8311_v62  ;;  %v8108_v62 = vld [vmem:[%s12864_s7 + $0xf30] sm:$0xff] }
 0x3d1   : > { %3966 = vmatpush1.bf16.msra.mxu0 %v8182_v24  ;;  %v8239_v24 = vcombine.high %v7976_v21, %v7980_v22  ;;  %v8366_v29 = vcombine.low %v8104_v58, %v8108_v62  ;;  %v8025_v22 = vld [vmem:[%s12864_s7 + $0xc98] sm:$0xff] }
 0x3d2   : > { %3967 = vmatprep.subr.bf16.mxu0 %v8191_v61  ;;  %v7988_v61 = vld [vmem:[%s12864_s7 + $0xb70] sm:$0xff] }
 0x3d3   : > { %4007 = vmatpush1.bf16.msra.mxu1 %v8310_v63  ;;  %v8367_v63 = vcombine.high %v8104_v58, %v8108_v62  ;;  %v8246_v33 = vcombine.low %v7984_v59, %v7988_v61  ;;  %v7909_v62 = vld [vmem:[%s12864_s7 + $0x8f8] sm:$0xff] }
 0x3d4   : > { %4008 = vmatprep.subr.bf16.mxu1 %v8319_v27  ;;  %v8116_v27 = vld [vmem:[%s12864_s7 + $0xf70] sm:$0xff] }
 0x3d5   : > { %3968 = vmatpush1.bf16.msra.mxu0 %v8190_v28  ;;  %v8247_v28 = vcombine.high %v7984_v59, %v7988_v61  ;;  %v8374_v37 = vcombine.low %v8112_v4, %v8116_v27  ;;  %v8033_v59 = vld [vmem:[%s12864_s7 + $0xcd8] sm:$0xff] }
 0x3d6   : > { %3969 = vmatprep.subr.bf16.mxu0 %v8199_v31  ;;  %v7996_v31 = vld [vmem:[%s12864_s7 + $0xbb0] sm:$0xff] }
 0x3d7   : > { %4009 = vmatpush1.bf16.msra.mxu1 %v8318_v32  ;;  %v8375_v32 = vcombine.high %v8112_v4, %v8116_v27  ;;  %v8254_v46 = vcombine.low %v7992_v30, %v7996_v31  ;;  %v7917_v4 = vld [vmem:[%s12864_s7 + $0x938] sm:$0xff] }
 0x3d8   : > { %4010 = vmatprep.subr.bf16.mxu1 %v8327_v35  ;;  %v8124_v35 = vld [vmem:[%s12864_s7 + $0xfb0] sm:$0xff] }
 0x3d9   : > { %3970 = vmatpush1.bf16.msra.mxu0 %v8198_v36  ;;  %v8255_v36 = vcombine.high %v7992_v30, %v7996_v31  ;;  %v8382_v17 = vcombine.low %v8120_v34, %v8124_v35  ;;  %v8045_v30 = vld [vmem:[%s12864_s7 + $0xd38] sm:$0xff] }
 0x3da   : > { %3971 = vmatprep.subr.bf16.mxu0 %v8207_v42  ;;  %v8004_v42 = vld [vmem:[%s12864_s7 + $0xbf0] sm:$0xff] }
 0x3db   : > { %4011 = vmatpush1.bf16.msra.mxu1 %v8326_v45  ;;  %v8383_v45 = vcombine.high %v8120_v34, %v8124_v35  ;;  %v8262_v2 = vcombine.low %v8000_v38, %v8004_v42  ;;  %v7925_v34 = vld [vmem:[%s12864_s7 + $0x978] sm:$0xff] }
 0x3dc   : > { %4012 = vmatprep.subr.bf16.mxu1 %v8335_v53  ;;  %v8132_v53 = vld [vmem:[%s12864_s7 + $0xff0] sm:$0xff] }
 0x3dd   : > { %3972 = vmatpush1.bf16.msra.mxu0 %v8206_v54  ;;  %v8263_v54 = vcombine.high %v8000_v38, %v8004_v42  ;;  %v8390_v52 = vcombine.low %v8128_v47, %v8132_v53  ;;  %v8053_v38 = vld [vmem:[%s12864_s7 + $0xd78] sm:$0xff] }
 0x3de   : > { %3973 = vmatprep.subr.bf16.mxu0 %v8215_v49  ;;  %v7885_v49 = vld [vmem:[%s12864_s7 + $0x838] sm:$0xff] }
 0x3df   : > { %4013 = vmatpush1.bf16.msra.mxu1 %v8334_v1  ;;  %v8391_v1 = vcombine.high %v8128_v47, %v8132_v53  ;;  %v8144_v8 = vcombine.low %v7881_v0, %v7885_v49  ;;  %v7933_v47 = vld [vmem:[%s12864_s7 + $0x9b8] sm:$0xff] }
 0x3e0   : > { %4014 = vmatprep.subr.bf16.mxu1 %v8343_v5  ;;  %v8013_v5 = vld [vmem:[%s12864_s7 + $0xc38] sm:$0xff] }
 0x3e1   : > { %3974 = vmatpush1.bf16.msra.mxu0 %v8214_v51  ;;  %v8145_v51 = vcombine.high %v7881_v0, %v7885_v49  ;;  %v8272_v15 = vcombine.low %v8009_v3, %v8013_v5  ;;  %v8061_v0 = vld [vmem:[%s12864_s7 + $0xdb8] sm:$0xff] }
 0x3e2   : > { %3975 = vmatprep.subr.bf16.mxu0 %v8223_v56  ;;  %v7893_v56 = vld [vmem:[%s12864_s7 + $0x878] sm:$0xff] }
 0x3e3   : > { %4015 = vmatpush1.bf16.msra.mxu1 %v8342_v7  ;;  %v8273_v7 = vcombine.high %v8009_v3, %v8013_v5  ;;  %v8152_v21 = vcombine.low %v7889_v55, %v7893_v56  ;;  %v7941_v3 = vld [vmem:[%s12864_s7 + $0x9f8] sm:$0xff] }
 0x3e4   : > { %4016 = vmatprep.subr.bf16.mxu1 %v8351_v11  ;;  %v8021_v11 = vld [vmem:[%s12864_s7 + $0xc78] sm:$0xff] }
 0x3e5   : > { %3976 = vmatpush1.bf16.msra.mxu0 %v8222_v13  ;;  %v8153_v13 = vcombine.high %v7889_v55, %v7893_v56  ;;  %v8280_v58 = vcombine.low %v8017_v10, %v8021_v11  ;;  %v8069_v55 = vld [vmem:[%s12864_s7 + $0xdf8] sm:$0xff] }
 0x3e6   : > { %3977 = vmatprep.subr.bf16.mxu0 %v8231_v19  ;;  %v7901_v19 = vld [vmem:[%s12864_s7 + $0x8b8] sm:$0xff] }
 0x3e7   : > { %4017 = vmatpush1.bf16.msra.mxu1 %v8350_v20  ;;  %v8281_v20 = vcombine.high %v8017_v10, %v8021_v11  ;;  %v7949_v10 = vld [vmem:[%s12864_s7 + $0xa38] sm:$0xff] }
 0x3e8   : > { %4018 = vmatprep.subr.bf16.mxu1 %v8359_v23  ;;  %v8029_v23 = vld [vmem:[%s12864_s7 + $0xcb8] sm:$0xff] }
 0x3e9   : > { %3978 = vmatpush1.bf16.msra.mxu0 %v8230_v57  ;;  %v8161_v57 = vcombine.high %v7897_v18, %v7901_v19 }
 0x3ea   : > { %3979 = vmatprep.subr.bf16.mxu0 %v8239_v24  ;;  %v8289_v24 = vcombine.high %v8025_v22, %v8029_v23 }
 0x3eb   : > { %4019 = vmatpush1.bf16.msra.mxu1 %v8358_v25  ;;  %v8160_v25 = vcombine.low %v7897_v18, %v7901_v19  ;;  %v8077_v18 = vld [vmem:[%s12864_s7 + $0xe38] sm:$0xff] }
 0x3ec   : > { %4020 = vmatprep.subr.bf16.mxu1 %v8367_v63  ;;  %v8288_v63 = vcombine.low %v8025_v22, %v8029_v23  ;;  %v7957_v22 = vld [vmem:[%s12864_s7 + $0xa78] sm:$0xff] }
 0x3ed   : > { %3980 = vmatpush1.bf16.msra.mxu0 %v8238_v26  ;;  %v7913_v26 = vld [vmem:[%s12864_s7 + $0x918] sm:$0xff] }
 0x3ee   : > { %3981 = vmatprep.subr.bf16.mxu0 %v8247_v28  ;;  %v8177_v31 = vcombine.high %v7913_v26, %v7917_v4 }
 0x3ef   : > { %4021 = vmatpush1.bf16.msra.mxu1 %v8366_v29  ;;  %v8041_v29 = vld [vmem:[%s12864_s7 + $0xd18] sm:$0xff] }
 0x3f0   : > { %4022 = vmatprep.subr.bf16.mxu1 %v8375_v32  ;;  %v8305_v35 = vcombine.high %v8041_v29, %v8045_v30 }
 0x3f1   : > { %3982 = vmatpush1.bf16.msra.mxu0 %v8246_v33  ;;  %v7921_v33 = vld [vmem:[%s12864_s7 + $0x958] sm:$0xff] }
 0x3f2   : > { %3983 = vmatprep.subr.bf16.mxu0 %v8255_v36  ;;  %v8176_v36 = vcombine.low %v7913_v26, %v7917_v4  ;;  %v8185_v42 = vcombine.high %v7921_v33, %v7925_v34  ;;  %v8093_v26 = vld [vmem:[%s12864_s7 + $0xeb8] sm:$0xff] }
 0x3f3   : > { %4023 = vmatpush1.bf16.msra.mxu1 %v8374_v37  ;;  %v8049_v37 = vld [vmem:[%s12864_s7 + $0xd58] sm:$0xff] }
 0x3f4   : > { %4024 = vmatprep.subr.bf16.mxu1 %v8383_v45  ;;  %v8304_v45 = vcombine.low %v8041_v29, %v8045_v30  ;;  %v8313_v53 = vcombine.high %v8049_v37, %v8053_v38  ;;  %v7973_v29 = vld [vmem:[%s12864_s7 + $0xaf8] sm:$0xff] }
 0x3f5   : > { %3984 = vmatpush1.bf16.msra.mxu0 %v8254_v46  ;;  %v7929_v46 = vld [vmem:[%s12864_s7 + $0x998] sm:$0xff] }
 0x3f6   : > { %3985 = vmatprep.subr.bf16.mxu0 %v8263_v54  ;;  %v8184_v54 = vcombine.low %v7921_v33, %v7925_v34  ;;  %v8193_v49 = vcombine.high %v7929_v46, %v7933_v47  ;;  %v8101_v33 = vld [vmem:[%s12864_s7 + $0xef8] sm:$0xff] }
 0x3f7   : > { %4025 = vmatpush1.bf16.msra.mxu1 %v8382_v17  ;;  %v8057_v17 = vld [vmem:[%s12864_s7 + $0xd98] sm:$0xff] }
 0x3f8   : > { %4026 = vmatprep.subr.bf16.mxu1 %v8391_v1  ;;  %v8312_v1 = vcombine.low %v8049_v37, %v8053_v38  ;;  %v8321_v5 = vcombine.high %v8057_v17, %v8061_v0  ;;  %v7981_v37 = vld [vmem:[%s12864_s7 + $0xb38] sm:$0xff] }
 0x3f9   : > { %3986 = vmatpush1.bf16.msra.mxu0 %v8262_v2  ;;  %v7937_v2 = vld [vmem:[%s12864_s7 + $0x9d8] sm:$0xff] }
 0x3fa   : > { %4037 = vmatprep.subr.bf16.mxu0 %v8145_v51  ;;  %v8192_v51 = vcombine.low %v7929_v46, %v7933_v47  ;;  %v8201_v56 = vcombine.high %v7937_v2, %v7941_v3  ;;  %v8109_v46 = vld [vmem:[%s12864_s7 + $0xf38] sm:$0xff] }
 0x3fb   : > { %4027 = vmatpush1.bf16.msra.mxu1 %v8390_v52  ;;  %v8065_v52 = vld [vmem:[%s12864_s7 + $0xdd8] sm:$0xff] }
 0x3fc   : > { %3988 = vmatmul.mubr.bf16.vlgmr.msra.gmra.mrb[16].mxu0 %v10590_v9  ;;  %4078 = vmatprep.subr.bf16.mxu1 %v8273_v7  ;;  %v8320_v7 = vcombine.low %v8057_v17, %v8061_v0  ;;  %v8329_v11 = vcombine.high %v8065_v52, %v8069_v55  ;;  %v7989_v17 = vld [vmem:[%s12864_s7 + $0xb78] sm:$0xff] }
 0x3fd   : > { %4038 = vmatpush1.bf16.msra.mxu0 %v8144_v8  ;;  %4069 = vmatprep.mubr.bf16.mxu0 %v10578_v6  ;;  %v7905_v6 = vld [vmem:[%s12864_s7 + $0x8d8] sm:$0xff] }
 0x3fe   : > { %4029 = vmatmul.mubr.bf16.vlgmr.msra.gmra.mrb[16].mxu1 %v10603_v16  ;;  %4039 = vmatprep.subr.bf16.mxu0 %v8153_v13  ;;  %v8169_v61 = vcombine.high %v7905_v6, %v7909_v62  ;;  %v8168_v28 = vcombine.low %v7905_v6, %v7909_v62  ;;  %v7945_v8 = vld [vmem:[%s12864_s7 + $0xa18] sm:$0xff]  ;;  %v8200_v13 = vcombine.low %v7937_v2, %v7941_v3 }
 0x3ff   : > { %4079 = vmatpush1.bf16.msra.mxu1 %v8272_v15  ;;  %4110 = vmatprep.mubr.bf16.mxu1 %v10594_v12  ;;  %v8037_v12 = vld [vmem:[%s12864_s7 + $0xcf8] sm:$0xff]  ;;  %v8209_v19 = vcombine.high %v7945_v8, %v7949_v10 }
 0x400   : > { %4080 = vmatprep.subr.bf16.mxu1 %v8281_v20  ;;  %v8297_v27 = vcombine.high %v8033_v59, %v8037_v12  ;;  %v8296_v32 = vcombine.low %v8033_v59, %v8037_v12  ;;  %v8073_v15 = vld [vmem:[%s12864_s7 + $0xe18] sm:$0xff]  ;;  %v8328_v20 = vcombine.low %v8065_v52, %v8069_v55 }
 0x401   : > { %4040 = vmatpush1.bf16.msra.mxu0 %v8152_v21  ;;  %v7953_v21 = vld [vmem:[%s12864_s7 + $0xa58] sm:$0xff]  ;;  %v8337_v23 = vcombine.high %v8073_v15, %v8077_v18 }
 0x402   : > { %4041 = vmatprep.subr.bf16.mxu0 %v8161_v57  ;;  %v8208_v57 = vcombine.low %v7945_v8, %v7949_v10  ;;  %v8085_v6 = vld [vmem:[%s12864_s7 + $0xe78] sm:$0xff]  ;;  %v8217_v62 = vcombine.high %v7953_v21, %v7957_v22 }
 0x403   : > { %4081 = vmatpush1.bf16.msra.mxu1 %v8280_v58  ;;  %v8081_v58 = vld [vmem:[%s12864_s7 + $0xe58] sm:$0xff] }
 0x404   : > { %4082 = vmatprep.subr.bf16.mxu1 %v8289_v24  ;;  %v8336_v24 = vcombine.low %v8073_v15, %v8077_v18  ;;  %v7965_v59 = vld [vmem:[%s12864_s7 + $0xab8] sm:$0xff]  ;;  %v8345_v12 = vcombine.high %v8081_v58, %v8085_v6 }
 0x405   : > { %4042 = vmatpush1.bf16.msra.mxu0 %v8160_v25  ;;  %v7961_v25 = vld [vmem:[%s12864_s7 + $0xa98] sm:$0xff] }
 0x406   : > { %4043 = vmatprep.subr.bf16.mxu0 %v8169_v61  ;;  %v8216_v61 = vcombine.low %v7953_v21, %v7957_v22  ;;  %v8225_v4 = vcombine.high %v7961_v25, %v7965_v59  ;;  %v8117_v2 = vld [vmem:[%s12864_s7 + $0xf78] sm:$0xff] }
 0x407   : > { %4083 = vmatpush1.bf16.msra.mxu1 %v8288_v63  ;;  %v8089_v63 = vld [vmem:[%s12864_s7 + $0xe98] sm:$0xff] }
 0x408   : > { %4084 = vmatprep.subr.bf16.mxu1 %v8297_v27  ;;  %v8344_v27 = vcombine.low %v8081_v58, %v8085_v6  ;;  %v8353_v30 = vcombine.high %v8089_v63, %v8093_v26  ;;  %v7997_v52 = vld [vmem:[%s12864_s7 + $0xbb8] sm:$0xff]  ;;  %v1954_v58 = vld [vmem:[%s12864_s7 + $0x20] sm:$0xff] }
 0x409   : > { %4044 = vmatpush1.bf16.msra.mxu0 %v8168_v28  ;;  %v7969_v28 = vld [vmem:[%s12864_s7 + $0xad8] sm:$0xff] }
 0x40a   : > { %4045 = vmatprep.subr.bf16.mxu0 %v8177_v31  ;;  %v8224_v31 = vcombine.low %v7961_v25, %v7965_v59  ;;  %v8233_v34 = vcombine.high %v7969_v28, %v7973_v29  ;;  %v8125_v8 = vld [vmem:[%s12864_s7 + $0xfb8] sm:$0xff]  ;;  %v2082_v25 = vld [vmem:[%s12864_s7 + $0x420] sm:$0xff] }
 0x40b   : > { %4085 = vmatpush1.bf16.msra.mxu1 %v8296_v32  ;;  %v8097_v32 = vld [vmem:[%s12864_s7 + $0xed8] sm:$0xff] }
 0x40c   : > { %4086 = vmatprep.subr.bf16.mxu1 %v8305_v35  ;;  %v8352_v35 = vcombine.low %v8089_v63, %v8093_v26  ;;  %v8361_v38 = vcombine.high %v8097_v32, %v8101_v33  ;;  %v8005_v15 = vld [vmem:[%s12864_s7 + $0xbf8] sm:$0xff]  ;;  %v1962_v63 = vld [vmem:[%s12864_s7 + $0x60] sm:$0xff] }
 0x40d   : > { %4046 = vmatpush1.bf16.msra.mxu0 %v8176_v36  ;;  %v7977_v36 = vld [vmem:[%s12864_s7 + $0xb18] sm:$0xff] }
 0x40e   : > { %4047 = vmatprep.subr.bf16.mxu0 %v8185_v42  ;;  %v8232_v42 = vcombine.low %v7969_v28, %v7973_v29  ;;  %v8241_v47 = vcombine.high %v7977_v36, %v7981_v37  ;;  %v8133_v21 = vld [vmem:[%s12864_s7 + $0xff8] sm:$0xff]  ;;  %v2090_v28 = vld [vmem:[%s12864_s7 + $0x460] sm:$0xff] }
 0x40f   : > { %4087 = vmatpush1.bf16.msra.mxu1 %v8304_v45  ;;  %v8105_v45 = vld [vmem:[%s12864_s7 + $0xf18] sm:$0xff] }
 0x410   : > { %4088 = vmatprep.subr.bf16.mxu1 %v8313_v53  ;;  %v8360_v53 = vcombine.low %v8097_v32, %v8101_v33  ;;  %v8369_v0 = vcombine.high %v8105_v45, %v8109_v46  ;;  %v1966_v33 = vld [vmem:[%s12864_s7 + $0x80] sm:$0xff] }
 0x411   : > { %4048 = vmatpush1.bf16.msra.mxu0 %v8184_v54  ;;  %v7985_v54 = vld [vmem:[%s12864_s7 + $0xb58] sm:$0xff] }
 0x412   : > { %4049 = vmatprep.subr.bf16.mxu0 %v8193_v49  ;;  %v8240_v49 = vcombine.low %v7977_v36, %v7981_v37  ;;  %v8249_v3 = vcombine.high %v7985_v54, %v7989_v17  ;;  %v11207_v36 = vld [vmem:[#allocation2 + $0x8] sm:$0xff] }
 0x413   : > { %4089 = vmatpush1.bf16.msra.mxu1 %v8312_v1  ;;  %v8113_v1 = vld [vmem:[%s12864_s7 + $0xf58] sm:$0xff]  ;;  %v11211_v37 = vcombine.high %v11207_v36, %v11207_v36 }
 0x414   : > { %4090 = vmatprep.subr.bf16.mxu1 %v8321_v5  ;;  %v8368_v5 = vcombine.low %v8105_v45, %v8109_v46  ;;  %v8377_v55 = vcombine.high %v8113_v1, %v8117_v2 }
 0x415   : > { %4050 = vmatpush1.bf16.msra.mxu0 %v8192_v51  ;;  %v7993_v51 = vld [vmem:[%s12864_s7 + $0xb98] sm:$0xff] }
 0x416   : > { %4051 = vmatprep.subr.bf16.mxu0 %v8201_v56  ;;  %v8248_v56 = vcombine.low %v7985_v54, %v7989_v17  ;;  %v8257_v10 = vcombine.high %v7993_v51, %v7997_v52 }
 0x417   : > { %4091 = vmatpush1.bf16.msra.mxu1 %v8320_v7  ;;  %v8121_v7 = vld [vmem:[%s12864_s7 + $0xf98] sm:$0xff] }
 0x418   : > { %4092 = vmatprep.subr.bf16.mxu1 %v8329_v11  ;;  %v8376_v11 = vcombine.low %v8113_v1, %v8117_v2  ;;  %v8385_v18 = vcombine.high %v8121_v7, %v8125_v8  ;;  %v1982_v2 = vld [vmem:[%s12864_s7 + $0x100] sm:$0xff] }
 0x419   : > { %4052 = vmatpush1.bf16.msra.mxu0 %v8200_v13  ;;  %v8001_v13 = vld [vmem:[%s12864_s7 + $0xbd8] sm:$0xff] }
 0x41a   : > { %4053 = vmatprep.subr.bf16.mxu0 %v8209_v19  ;;  %v8256_v19 = vcombine.low %v7993_v51, %v7997_v52  ;;  %v8265_v22 = vcombine.high %v8001_v13, %v8005_v15  ;;  %v2110_v52 = vld [vmem:[%s12864_s7 + $0x500] sm:$0xff] }
 0x41b   : > { %4093 = vmatpush1.bf16.msra.mxu1 %v8328_v20  ;;  %v8129_v20 = vld [vmem:[%s12864_s7 + $0xfd8] sm:$0xff] }
 0x41c   : > { %4094 = vmatprep.subr.bf16.mxu1 %v8337_v23  ;;  %v8384_v23 = vcombine.low %v8121_v7, %v8125_v8  ;;  %v8393_v6 = vcombine.high %v8129_v20, %v8133_v21  ;;  %v1990_v8 = vld [vmem:[%s12864_s7 + $0x140] sm:$0xff] }
 0x41d   : > { %4054 = vmatpush1.bf16.msra.mxu0 %v8208_v57  ;;  %v1950_v57 = vld [vmem:[%s12864_s7] sm:$0xff] }
 0x41e   : > { %4055 = vmatprep.subr.bf16.mxu0 %v8217_v62  ;;  %v8264_v62 = vcombine.low %v8001_v13, %v8005_v15  ;;  %v8399_v59 = vcombine.high %v1950_v57, %v1954_v58  ;;  %v2118_v15 = vld [vmem:[%s12864_s7 + $0x540] sm:$0xff] }
 0x41f   : > { %4095 = vmatpush1.bf16.msra.mxu1 %v8336_v24  ;;  %v2078_v24 = vld [vmem:[%s12864_s7 + $0x400] sm:$0xff] }
 0x420   : > { %4096 = vmatprep.subr.bf16.mxu1 %v8345_v12  ;;  %v8392_v12 = vcombine.low %v8129_v20, %v8133_v21  ;;  %v8527_v26 = vcombine.high %v2078_v24, %v2082_v25  ;;  %v1998_v21 = vld [vmem:[%s12864_s7 + $0x180] sm:$0xff] }
 0x421   : > { %4056 = vmatpush1.bf16.msra.mxu0 %v8216_v61  ;;  %v1958_v61 = vld [vmem:[%s12864_s7 + $0x40] sm:$0xff] }
 0x422   : > { %4057 = vmatprep.subr.bf16.mxu0 %v8225_v4  ;;  %v8398_v4 = vcombine.low %v1950_v57, %v1954_v58  ;;  %v8407_v29 = vcombine.high %v1958_v61, %v1962_v63  ;;  %v2126_v58 = vld [vmem:[%s12864_s7 + $0x580] sm:$0xff] }
 0x423   : > { %4097 = vmatpush1.bf16.msra.mxu1 %v8344_v27  ;;  %v2086_v27 = vld [vmem:[%s12864_s7 + $0x440] sm:$0xff] }
 0x424   : > { %4098 = vmatprep.subr.bf16.mxu1 %v8353_v30  ;;  %v8526_v30 = vcombine.low %v2078_v24, %v2082_v25  ;;  %v8534_v46 = vcombine.low %v2086_v27, %v2090_v28 }
 0x425   : > { %4058 = vmatpush1.bf16.msra.mxu0 %v8224_v31  ;;  %v11193_v31 = vld [vmem:[#allocation2] sm:$0xff] }
 0x426   : > { %4059 = vmatprep.subr.bf16.mxu0 %v8233_v34  ;;  %v11197_v32 = vcombine.high %v11193_v31, %v11193_v31  ;;  %v1970_v34 = vld [vmem:[%s12864_s7 + $0xa0] sm:$0xff] }
 0x427   : > { %4099 = vmatpush1.bf16.msra.mxu1 %v8352_v35  ;;  %v8535_v35 = vcombine.high %v2086_v27, %v2090_v28  ;;  %v8415_v45 = vcombine.high %v1966_v33, %v1970_v34  ;;  %v8414_v17 = vcombine.low %v1966_v33, %v1970_v34  ;;  %v2134_v28 = vld [vmem:[%s12864_s7 + $0x5c0] sm:$0xff] }
 0x428   : > { %4100 = vmatprep.subr.bf16.mxu1 %v8361_v38  ;;  %v8406_v38 = vcombine.low %v1958_v61, %v1962_v63 }
 0x429   : > { %4060 = vmatpush1.bf16.msra.mxu0 %v8232_v42  ;;  %v2094_v42 = vld [vmem:[%s12864_s7 + $0x480] sm:$0xff] }
 0x42a   : > { %4061 = vmatprep.subr.bf16.mxu0 %v8241_v47  ;;  %v1974_v47 = vld [vmem:[%s12864_s7 + $0xc0] sm:$0xff] }
 0x42b   : > { %4101 = vmatpush1.bf16.msra.mxu1 %v8360_v53  ;;  %v1978_v53 = vld [vmem:[%s12864_s7 + $0xe0] sm:$0xff] }
 0x42c   : > { %4102 = vmatprep.subr.bf16.mxu1 %v8369_v0  ;;  %v2106_v0 = vld [vmem:[%s12864_s7 + $0x4e0] sm:$0xff]  ;;  %v8422_v51 = vcombine.low %v1974_v47, %v1978_v53 }
 0x42d   : > { %4062 = vmatpush1.bf16.msra.mxu0 %v8240_v49  ;;  %v8423_v49 = vcombine.high %v1974_v47, %v1978_v53 }
 0x42e   : > { %4063 = vmatprep.subr.bf16.mxu0 %v8249_v3  ;;  %v1986_v3 = vld [vmem:[%s12864_s7 + $0x120] sm:$0xff] }
 0x42f   : > { %4103 = vmatpush1.bf16.msra.mxu1 %v8368_v5  ;;  %v8430_v13 = vcombine.low %v1982_v2, %v1986_v3 }
 0x430   : > { %4104 = vmatprep.subr.bf16.mxu1 %v8377_v55  ;;  %v2114_v55 = vld [vmem:[%s12864_s7 + $0x520] sm:$0xff] }
 0x431   : > { %4064 = vmatpush1.bf16.msra.mxu0 %v8248_v56  ;;  %v8431_v56 = vcombine.high %v1982_v2, %v1986_v3  ;;  %v8558_v20 = vcombine.low %v2110_v52, %v2114_v55  ;;  %v2026_v2 = vld [vmem:[%s12864_s7 + $0x260] sm:$0xff] }
 0x432   : > { %4065 = vmatprep.subr.bf16.mxu0 %v8257_v10  ;;  %v1994_v10 = vld [vmem:[%s12864_s7 + $0x160] sm:$0xff] }
 0x433   : > { %4105 = vmatpush1.bf16.msra.mxu1 %v8376_v11  ;;  %v8559_v11 = vcombine.high %v2110_v52, %v2114_v55  ;;  %v8438_v57 = vcombine.low %v1990_v8, %v1994_v10  ;;  %v2154_v52 = vld [vmem:[%s12864_s7 + $0x660] sm:$0xff] }
 0x434   : > { %4106 = vmatprep.subr.bf16.mxu1 %v8385_v18  ;;  %v2122_v18 = vld [vmem:[%s12864_s7 + $0x560] sm:$0xff] }
 0x435   : > { %4066 = vmatpush1.bf16.msra.mxu0 %v8256_v19  ;;  %v8439_v19 = vcombine.high %v1990_v8, %v1994_v10  ;;  %v8566_v25 = vcombine.low %v2118_v15, %v2122_v18  ;;  %v2034_v8 = vld [vmem:[%s12864_s7 + $0x2a0] sm:$0xff] }
 0x436   : > { %4067 = vmatprep.subr.bf16.mxu0 %v8265_v22  ;;  %v2002_v22 = vld [vmem:[%s12864_s7 + $0x1a0] sm:$0xff] }
 0x437   : > { %4107 = vmatpush1.bf16.msra.mxu1 %v8384_v23  ;;  %v8567_v23 = vcombine.high %v2118_v15, %v2122_v18  ;;  %v8446_v27 = vcombine.low %v1998_v21, %v2002_v22  ;;  %v2162_v15 = vld [vmem:[%s12864_s7 + $0x6a0] sm:$0xff] }
 0x438   : > { %4108 = vmatprep.subr.bf16.mxu1 %v8393_v6  ;;  %v2130_v6 = vld [vmem:[%s12864_s7 + $0x5a0] sm:$0xff] }
 0x439   : > { %4068 = vmatpush1.bf16.msra.mxu0 %v8264_v62  ;;  %v8447_v62 = vcombine.high %v1998_v21, %v2002_v22  ;;  %v8575_v63 = vcombine.high %v2126_v58, %v2130_v6  ;;  %v2042_v21 = vld [vmem:[%s12864_s7 + $0x2e0] sm:$0xff] }
 0x43a   : > { %5407 = vmatprep.subr.bf16.mxu0 %v8399_v59  ;;  %v2006_v59 = vld [vmem:[%s12864_s7 + $0x1c0] sm:$0xff] }
 0x43b   : > { %4109 = vmatpush1.bf16.msra.mxu1 %v8392_v12  ;;  %v2010_v12 = vld [vmem:[%s12864_s7 + $0x1e0] sm:$0xff] }
 0x43c   : > { %4070 = vmatmul.mubr.bf16.vlgmr.msra.gmra.mrb[20].mxu0 %v10590_v9  ;;  %5448 = vmatprep.subr.bf16.mxu1 %v8527_v26  ;;  %v2098_v9 = vld [vmem:[%s12864_s7 + $0x4a0] sm:$0xff] }
 0x43d   : > { %5408 = vmatpush1.bf16.msra.mxu0 %v8398_v4  ;;  %5439 = vmatprep.mubr.bf16.mxu0 %v11197_v32  ;;  %v8543_v54 = vcombine.high %v2094_v42, %v2098_v9  ;;  %v8542_v1 = vcombine.low %v2094_v42, %v2098_v9  ;;  %v8574_v9 = vcombine.low %v2126_v58, %v2130_v6  ;;  %v2170_v58 = vld [vmem:[%s12864_s7 + $0x6e0] sm:$0xff] }
 0x43e   : > { %4111 = vmatmul.mubr.bf16.vlgmr.msra.gmra.mrb[20].mxu1 %v10603_v16  ;;  %5409 = vmatprep.subr.bf16.mxu0 %v8407_v29  ;;  %v2102_v16 = vld [vmem:[%s12864_s7 + $0x4c0] sm:$0xff] }
 0x43f   : > { %5449 = vmatpush1.bf16.msra.mxu1 %v8526_v30  ;;  %5480 = vmatprep.mubr.bf16.mxu1 %v11211_v37  ;;  %v8551_v5 = vcombine.high %v2102_v16, %v2106_v0  ;;  %v8550_v7 = vcombine.low %v2102_v16, %v2106_v0  ;;  %v2138_v29 = vld [vmem:[%s12864_s7 + $0x5e0] sm:$0xff] }
 0x440   : > { %5450 = vmatprep.subr.bf16.mxu1 %v8535_v35  ;;  %v8455_v35 = vcombine.high %v2006_v59, %v2010_v12  ;;  %v8583_v53 = vcombine.high %v2134_v28, %v2138_v29  ;;  %v2146_v16 = vld [vmem:[%s12864_s7 + $0x620] sm:$0xff] }
 0x441   : > { %5410 = vmatpush1.bf16.msra.mxu0 %v8406_v38 }
 0x442   : > { %5411 = vmatprep.subr.bf16.mxu0 %v8415_v45  ;;  %v2014_v45 = vld [vmem:[%s12864_s7 + $0x200] sm:$0xff] }
 0x443   : > { %5451 = vmatpush1.bf16.msra.mxu1 %v8534_v46  ;;  %v2018_v46 = vld [vmem:[%s12864_s7 + $0x220] sm:$0xff] }
 0x444   : > { %5452 = vmatprep.subr.bf16.mxu1 %v8543_v54  ;;  %v8454_v54 = vcombine.low %v2006_v59, %v2010_v12  ;;  %v8463_v0 = vcombine.high %v2014_v45, %v2018_v46 }
 0x445   : > { %5412 = vmatpush1.bf16.msra.mxu0 %v8414_v17  ;;  %v2142_v17 = vld [vmem:[%s12864_s7 + $0x600] sm:$0xff] }
 0x446   : > { %5413 = vmatprep.subr.bf16.mxu0 %v8423_v49  ;;  %v8582_v49 = vcombine.low %v2134_v28, %v2138_v29  ;;  %v8591_v3 = vcombine.high %v2142_v17, %v2146_v16  ;;  %v2058_v28 = vld [vmem:[%s12864_s7 + $0x360] sm:$0xff] }
 0x447   : > { %5453 = vmatpush1.bf16.msra.mxu1 %v8542_v1  ;;  %v2022_v1 = vld [vmem:[%s12864_s7 + $0x240] sm:$0xff] }
 0x448   : > { %5454 = vmatprep.subr.bf16.mxu1 %v8551_v5  ;;  %v8462_v5 = vcombine.low %v2014_v45, %v2018_v46  ;;  %v8471_v55 = vcombine.high %v2022_v1, %v2026_v2  ;;  %v2062_v45 = vld [vmem:[%s12864_s7 + $0x380] sm:$0xff] }
 0x449   : > { %5414 = vmatpush1.bf16.msra.mxu0 %v8422_v51  ;;  %v2150_v51 = vld [vmem:[%s12864_s7 + $0x640] sm:$0xff] }
 0x44a   : > { %5415 = vmatprep.subr.bf16.mxu0 %v8431_v56  ;;  %v8590_v56 = vcombine.low %v2142_v17, %v2146_v16  ;;  %v8599_v10 = vcombine.high %v2150_v51, %v2154_v52  ;;  %v2066_v46 = vld [vmem:[%s12864_s7 + $0x3a0] sm:$0xff] }
 0x44b   : > { %5455 = vmatpush1.bf16.msra.mxu1 %v8550_v7  ;;  %v2030_v7 = vld [vmem:[%s12864_s7 + $0x280] sm:$0xff]  ;;  %v8511_v16 = vcombine.high %v2062_v45, %v2066_v46 }
 0x44c   : > { %5456 = vmatprep.subr.bf16.mxu1 %v8559_v11  ;;  %v8470_v11 = vcombine.low %v2022_v1, %v2026_v2  ;;  %v8479_v18 = vcombine.high %v2030_v7, %v2034_v8  ;;  %v2194_v17 = vld [vmem:[%s12864_s7 + $0x7a0] sm:$0xff] }
 0x44d   : > { %5416 = vmatpush1.bf16.msra.mxu0 %v8430_v13  ;;  %v2158_v13 = vld [vmem:[%s12864_s7 + $0x680] sm:$0xff] }
 0x44e   : > { %5417 = vmatprep.subr.bf16.mxu0 %v8439_v19  ;;  %v8598_v19 = vcombine.low %v2150_v51, %v2154_v52  ;;  %v8607_v22 = vcombine.high %v2158_v13, %v2162_v15  ;;  %v2074_v1 = vld [vmem:[%s12864_s7 + $0x3e0] sm:$0xff] }
 0x44f   : > { %5457 = vmatpush1.bf16.msra.mxu1 %v8558_v20  ;;  %v3825_v24 = vpop.f32.mrb[8].mxu0  ;;  %v2038_v20 = vld [vmem:[%s12864_s7 + $0x2c0] sm:$0xff] }
 0x450   : > { %5458 = vmatprep.subr.bf16.mxu1 %v8567_v23  ;;  %v3827_v61 = vpop.f32.mrb[9].mxu0  ;;  %v8478_v23 = vcombine.low %v2030_v7, %v2034_v8  ;;  %v8487_v6 = vcombine.high %v2038_v20, %v2042_v21  ;;  %v8486_v12 = vcombine.low %v2038_v20, %v2042_v21  ;;  %v2202_v51 = vld [vmem:[%s12864_s7 + $0x7e0] sm:$0xff]  ;;  %v1955_v7 = vld [vmem:[%s12864_s7 + $0x28] sm:$0xff] }
 0x451   : > { %v3866_v26 = vpop.f32.mrb[8].mxu1  ;;  %5418 = vmatpush1.bf16.msra.mxu0 %v8438_v57  ;;  %v3829_v4 = vpop.f32.mrb[10].mxu0  ;;  %v2166_v57 = vld [vmem:[%s12864_s7 + $0x6c0] sm:$0xff]  ;;  %v1963_v20 = vld [vmem:[%s12864_s7 + $0x68] sm:$0xff] }
 0x452   : > { %v11281_v30 = vadd.f32 %v3866_v26, %v3825_v24  ;;  %v3868_v33 = vpop.f32.mrb[9].mxu1  ;;  %v3830_v34 = vpop.f32.mrb[11].mxu0  ;;  %5419 = vmatprep.subr.bf16.mxu0 %v8447_v62  ;;  %v8606_v62 = vcombine.low %v2158_v13, %v2162_v15  ;;  %v2046_v24 = vld [vmem:[%s12864_s7 + $0x300] sm:$0xff]  ;;  %v8615_v59 = vcombine.high %v2166_v57, %v2170_v58  ;;  %v8614_v4 = vcombine.low %v2166_v57, %v2170_v58  ;;  %v2083_v13 = vld [vmem:[%s12864_s7 + $0x428] sm:$0xff] }
 0x453   : > { %v11283_v38 = vadd.f32 %v3868_v33, %v3827_v61  ;;  %5459 = vmatpush1.bf16.msra.mxu1 %v8566_v25  ;;  %v3870_v42 = vpop.f32.mrb[10].mxu1  ;;  %v2050_v25 = vld [vmem:[%s12864_s7 + $0x320] sm:$0xff]  ;;  %v2091_v57 = vld [vmem:[%s12864_s7 + $0x468] sm:$0xff]  ;;  %v11407_v58 = vcombine.low %v11193_v31, %v11193_v31 }
 0x454   : > { %v3871_v47 = vpop.f32.mrb[11].mxu1  ;;  %5460 = vmatprep.subr.bf16.mxu1 %v8575_v63  ;;  %v2174_v61 = vld [vmem:[%s12864_s7 + $0x700] sm:$0xff]  ;;  %v8495_v26 = vcombine.high %v2046_v24, %v2050_v25  ;;  %v8494_v33 = vcombine.low %v2046_v24, %v2050_v25  ;;  %v1967_v24 = vld [vmem:[%s12864_s7 + $0x88] sm:$0xff] }
 0x455   : > { %5420 = vmatpush1.bf16.msra.mxu0 %v8446_v27  ;;  %v2178_v63 = vld [vmem:[%s12864_s7 + $0x720] sm:$0xff]  ;;  %v1971_v25 = vld [vmem:[%s12864_s7 + $0xa8] sm:$0xff] }
 0x456   : > { %5421 = vmatprep.subr.bf16.mxu0 %v8455_v35  ;;  %v2054_v27 = vld [vmem:[%s12864_s7 + $0x340] sm:$0xff]  ;;  %v8623_v29 = vcombine.high %v2174_v61, %v2178_v63 }
 0x457   : > { %5461 = vmatpush1.bf16.msra.mxu1 %v8574_v9  ;;  %v2182_v34 = vld [vmem:[%s12864_s7 + $0x740] sm:$0xff]  ;;  %v8503_v42 = vcombine.high %v2054_v27, %v2058_v28  ;;  %v8622_v9 = vcombine.low %v2174_v61, %v2178_v63  ;;  %v2095_v61 = vld [vmem:[%s12864_s7 + $0x488] sm:$0xff] }
 0x458   : > { %5462 = vmatprep.subr.bf16.mxu1 %v8583_v53  ;;  %v2186_v35 = vld [vmem:[%s12864_s7 + $0x760] sm:$0xff]  ;;  %v8502_v53 = vcombine.low %v2054_v27, %v2058_v28  ;;  %v2099_v63 = vld [vmem:[%s12864_s7 + $0x4a8] sm:$0xff] }
 0x459   : > { %5422 = vmatpush1.bf16.msra.mxu0 %v8454_v54  ;;  %v8631_v47 = vcombine.high %v2182_v34, %v2186_v35  ;;  %v2190_v54 = vld [vmem:[%s12864_s7 + $0x780] sm:$0xff]  ;;  %v1979_v27 = vld [vmem:[%s12864_s7 + $0xe8] sm:$0xff]  ;;  %v8545_v28 = vcombine.high %v2095_v61, %v2099_v63 }
 0x45a   : > { %5423 = vmatprep.subr.bf16.mxu0 %v8463_v0  ;;  %v8630_v0 = vcombine.low %v2182_v34, %v2186_v35  ;;  %v8639_v2 = vcombine.high %v2190_v54, %v2194_v17  ;;  %v2107_v34 = vld [vmem:[%s12864_s7 + $0x4e8] sm:$0xff] }
 0x45b   : > { %5463 = vmatpush1.bf16.msra.mxu1 %v8582_v49  ;;  %v2070_v49 = vld [vmem:[%s12864_s7 + $0x3c0] sm:$0xff] }
 0x45c   : > { %5464 = vmatprep.subr.bf16.mxu1 %v8591_v3  ;;  %v8510_v3 = vcombine.low %v2062_v45, %v2066_v46  ;;  %v8519_v52 = vcombine.high %v2070_v49, %v2074_v1  ;;  %v1987_v45 = vld [vmem:[%s12864_s7 + $0x128] sm:$0xff] }
 0x45d   : > { %5424 = vmatpush1.bf16.msra.mxu0 %v8462_v5  ;;  %v2198_v5 = vld [vmem:[%s12864_s7 + $0x7c0] sm:$0xff] }
 0x45e   : > { %5425 = vmatprep.subr.bf16.mxu0 %v8471_v55  ;;  %v8638_v55 = vcombine.low %v2190_v54, %v2194_v17  ;;  %v8647_v8 = vcombine.high %v2198_v5, %v2202_v51  ;;  %v2115_v54 = vld [vmem:[%s12864_s7 + $0x528] sm:$0xff] }
 0x45f   : > { %5465 = vmatpush1.bf16.msra.mxu1 %v8590_v56  ;;  %v1951_v56 = vld [vmem:[%s12864_s7 + $0x8] sm:$0xff] }
 0x460   : > { %5466 = vmatprep.subr.bf16.mxu1 %v8599_v10  ;;  %v8518_v10 = vcombine.low %v2070_v49, %v2074_v1  ;;  %v8401_v15 = vcombine.high %v1951_v56, %v1955_v7  ;;  %v1995_v49 = vld [vmem:[%s12864_s7 + $0x168] sm:$0xff] }
 0x461   : > { %5426 = vmatpush1.bf16.msra.mxu0 %v8470_v11  ;;  %v2079_v11 = vld [vmem:[%s12864_s7 + $0x408] sm:$0xff] }
 0x462   : > { %5427 = vmatprep.subr.bf16.mxu0 %v8479_v18  ;;  %v8646_v18 = vcombine.low %v2198_v5, %v2202_v51  ;;  %v8529_v21 = vcombine.high %v2079_v11, %v2083_v13  ;;  %v2123_v5 = vld [vmem:[%s12864_s7 + $0x568] sm:$0xff] }
 0x463   : > { %5467 = vmatpush1.bf16.msra.mxu1 %v8598_v19  ;;  %v1959_v19 = vld [vmem:[%s12864_s7 + $0x48] sm:$0xff] }
 0x464   : > { %5468 = vmatprep.subr.bf16.mxu1 %v8607_v22  ;;  %v8400_v22 = vcombine.low %v1951_v56, %v1955_v7  ;;  %v2003_v56 = vld [vmem:[%s12864_s7 + $0x1a8] sm:$0xff] }
 0x465   : > { %5428 = vmatpush1.bf16.msra.mxu0 %v8478_v23  ;;  %v2087_v23 = vld [vmem:[%s12864_s7 + $0x448] sm:$0xff] }
 0x466   : > { %5429 = vmatprep.subr.bf16.mxu0 %v8487_v6  ;;  %v8409_v6 = vcombine.high %v1959_v19, %v1963_v20  ;;  %v8537_v31 = vcombine.high %v2087_v23, %v2091_v57 }
 0x467   : > { %5469 = vmatpush1.bf16.msra.mxu1 %v8606_v62  ;;  %v8528_v62 = vcombine.low %v2079_v11, %v2083_v13  ;;  %v2131_v11 = vld [vmem:[%s12864_s7 + $0x5a8] sm:$0xff] }
 0x468   : > { %5470 = vmatprep.subr.bf16.mxu1 %v8615_v59  ;;  %v11418_v59 = vcombine.low %v11207_v36, %v11207_v36  ;;  %v8536_v36 = vcombine.low %v2087_v23, %v2091_v57 }
 0x469   : > { %5430 = vmatpush1.bf16.msra.mxu0 %v8486_v12  ;;  %v8408_v12 = vcombine.low %v1959_v19, %v1963_v20  ;;  %v2007_v19 = vld [vmem:[%s12864_s7 + $0x1c8] sm:$0xff] }
 0x46a   : > { %5431 = vmatprep.subr.bf16.mxu0 %v8495_v26  ;;  %v8417_v26 = vcombine.high %v1967_v24, %v1971_v25  ;;  %v2011_v20 = vld [vmem:[%s12864_s7 + $0x1e8] sm:$0xff] }
 0x46b   : > { %5471 = vmatpush1.bf16.msra.mxu1 %v8614_v4  ;;  %v1975_v4 = vld [vmem:[%s12864_s7 + $0xc8] sm:$0xff] }
 0x46c   : > { %5472 = vmatprep.subr.bf16.mxu1 %v8623_v29  ;;  %v8416_v29 = vcombine.low %v1967_v24, %v1971_v25  ;;  %v8425_v35 = vcombine.high %v1975_v4, %v1979_v27  ;;  %v2139_v24 = vld [vmem:[%s12864_s7 + $0x5e8] sm:$0xff] }
 0x46d   : > { %5432 = vmatpush1.bf16.msra.mxu0 %v8494_v33  ;;  %v2103_v33 = vld [vmem:[%s12864_s7 + $0x4c8] sm:$0xff] }
 0x46e   : > { %5433 = vmatprep.subr.bf16.mxu0 %v8503_v42  ;;  %v8544_v42 = vcombine.low %v2095_v61, %v2099_v63  ;;  %v8553_v46 = vcombine.high %v2103_v33, %v2107_v34  ;;  %v8457_v61 = vcombine.high %v2007_v19, %v2011_v20 }
 0x46f   : > { %5473 = vmatpush1.bf16.msra.mxu1 %v8622_v9  ;;  %v1983_v9 = vld [vmem:[%s12864_s7 + $0x108] sm:$0xff] }
 0x470   : > { %5474 = vmatprep.subr.bf16.mxu1 %v8631_v47  ;;  %v8424_v47 = vcombine.low %v1975_v4, %v1979_v27  ;;  %v8433_v17 = vcombine.high %v1983_v9, %v1987_v45  ;;  %v2015_v4 = vld [vmem:[%s12864_s7 + $0x208] sm:$0xff] }
 0x471   : > { %5434 = vmatpush1.bf16.msra.mxu0 %v8502_v53  ;;  %v2111_v53 = vld [vmem:[%s12864_s7 + $0x508] sm:$0xff] }
 0x472   : > { %5435 = vmatprep.subr.bf16.mxu0 %v8511_v16  ;;  %v8552_v16 = vcombine.low %v2103_v33, %v2107_v34  ;;  %v8561_v1 = vcombine.high %v2111_v53, %v2115_v54  ;;  %v2019_v27 = vld [vmem:[%s12864_s7 + $0x228] sm:$0xff]  ;;  %v8456_v33 = vcombine.low %v2007_v19, %v2011_v20 }
 0x473   : > { %5475 = vmatpush1.bf16.msra.mxu1 %v8630_v0  ;;  %v1991_v0 = vld [vmem:[%s12864_s7 + $0x148] sm:$0xff] }
 0x474   : > { %5476 = vmatprep.subr.bf16.mxu1 %v8639_v2  ;;  %v8432_v2 = vcombine.low %v1983_v9, %v1987_v45  ;;  %v8441_v51 = vcombine.high %v1991_v0, %v1995_v49  ;;  %v2143_v34 = vld [vmem:[%s12864_s7 + $0x608] sm:$0xff] }
 0x475   : > { %5436 = vmatpush1.bf16.msra.mxu0 %v8510_v3  ;;  %v2119_v3 = vld [vmem:[%s12864_s7 + $0x548] sm:$0xff] }
 0x476   : > { %5437 = vmatprep.subr.bf16.mxu0 %v8519_v52  ;;  %v8560_v52 = vcombine.low %v2111_v53, %v2115_v54  ;;  %v8569_v7 = vcombine.high %v2119_v3, %v2123_v5  ;;  %v2023_v45 = vld [vmem:[%s12864_s7 + $0x248] sm:$0xff]  ;;  %v8464_v53 = vcombine.low %v2015_v4, %v2019_v27 }
 0x477   : > { %5477 = vmatpush1.bf16.msra.mxu1 %v8638_v55  ;;  %v1999_v55 = vld [vmem:[%s12864_s7 + $0x188] sm:$0xff] }
 0x478   : > { %5478 = vmatprep.subr.bf16.mxu1 %v8647_v8  ;;  %v8440_v8 = vcombine.low %v1991_v0, %v1995_v49  ;;  %v8449_v13 = vcombine.high %v1999_v55, %v2003_v56  ;;  %v2151_v54 = vld [vmem:[%s12864_s7 + $0x648] sm:$0xff] }
 0x479   : > { %5438 = vmatpush1.bf16.msra.mxu0 %v8518_v10  ;;  %v2127_v10 = vld [vmem:[%s12864_s7 + $0x588] sm:$0xff] }
 0x47a   : > { %5489 = vmatprep.subr.bf16.mxu0 %v8401_v15  ;;  %v2031_v49 = vld [vmem:[%s12864_s7 + $0x288] sm:$0xff] }
 0x47b   : > { %5479 = vmatpush1.bf16.msra.mxu1 %v8646_v18  ;;  %v8568_v18 = vcombine.low %v2119_v3, %v2123_v5  ;;  %v2159_v5 = vld [vmem:[%s12864_s7 + $0x688] sm:$0xff] }
 0x47c   : > { %5440 = vmatmul.mubr.bf16.vlgmr.msra.gmra.mrb[24].mxu0 %v11407_v58  ;;  %5530 = vmatprep.subr.bf16.mxu1 %v8529_v21  ;;  %v2047_v19 = vld [vmem:[%s12864_s7 + $0x308] sm:$0xff] }
 0x47d   : > { %5490 = vmatpush1.bf16.msra.mxu0 %v8400_v22  ;;  %5521 = vmatprep.mubr.bf16.mxu0 %v11197_v32  ;;  %v8577_v22 = vcombine.high %v2127_v10, %v2131_v11  ;;  %v2051_v20 = vld [vmem:[%s12864_s7 + $0x328] sm:$0xff] }
 0x47e   : > { %5481 = vmatmul.mubr.bf16.vlgmr.msra.gmra.mrb[24].mxu1 %v11418_v59  ;;  %5491 = vmatprep.subr.bf16.mxu0 %v8409_v6  ;;  %v8448_v6 = vcombine.low %v1999_v55, %v2003_v56  ;;  %v2039_v56 = vld [vmem:[%s12864_s7 + $0x2c8] sm:$0xff] }
 0x47f   : > { %5531 = vmatpush1.bf16.msra.mxu1 %v8528_v62  ;;  %5562 = vmatprep.mubr.bf16.mxu1 %v11211_v37  ;;  %v2135_v62 = vld [vmem:[%s12864_s7 + $0x5c8] sm:$0xff] }
 0x480   : > { %5532 = vmatprep.subr.bf16.mxu1 %v8537_v31  ;;  %v8584_v9 = vcombine.low %v2135_v62, %v2139_v24 }
 0x481   : > { %5492 = vmatpush1.bf16.msra.mxu0 %v8408_v12 }
 0x482   : > { %5493 = vmatprep.subr.bf16.mxu0 %v8417_v26 }
 0x483   : > { %5533 = vmatpush1.bf16.msra.mxu1 %v8536_v36  ;;  %v8576_v36 = vcombine.low %v2127_v10, %v2131_v11  ;;  %v2167_v11 = vld [vmem:[%s12864_s7 + $0x6c8] sm:$0xff] }
 0x484   : > { %5534 = vmatprep.subr.bf16.mxu1 %v8545_v28 }
 0x485   : > { %5494 = vmatpush1.bf16.msra.mxu0 %v8416_v29  ;;  %v8585_v29 = vcombine.high %v2135_v62, %v2139_v24  ;;  %v2055_v24 = vld [vmem:[%s12864_s7 + $0x348] sm:$0xff] }
 0x486   : > { %5495 = vmatprep.subr.bf16.mxu0 %v8425_v35  ;;  %v2147_v35 = vld [vmem:[%s12864_s7 + $0x628] sm:$0xff] }
 0x487   : > { %5535 = vmatpush1.bf16.msra.mxu1 %v8544_v42  ;;  %v8465_v42 = vcombine.high %v2015_v4, %v2019_v27  ;;  %v8592_v0 = vcombine.low %v2143_v34, %v2147_v35 }
 0x488   : > { %5536 = vmatprep.subr.bf16.mxu1 %v8553_v46  ;;  %v2027_v46 = vld [vmem:[%s12864_s7 + $0x268] sm:$0xff] }
 0x489   : > { %5496 = vmatpush1.bf16.msra.mxu0 %v8424_v47  ;;  %v8593_v47 = vcombine.high %v2143_v34, %v2147_v35  ;;  %v8472_v3 = vcombine.low %v2023_v45, %v2027_v46  ;;  %v2191_v35 = vld [vmem:[%s12864_s7 + $0x788] sm:$0xff] }
 0x48a   : > { %5497 = vmatprep.subr.bf16.mxu0 %v8433_v17  ;;  %v2155_v17 = vld [vmem:[%s12864_s7 + $0x668] sm:$0xff] }
 0x48b   : > { %5537 = vmatpush1.bf16.msra.mxu1 %v8552_v16  ;;  %v8473_v16 = vcombine.high %v2023_v45, %v2027_v46  ;;  %v8600_v55 = vcombine.low %v2151_v54, %v2155_v17  ;;  %v2071_v46 = vld [vmem:[%s12864_s7 + $0x3c8] sm:$0xff] }
 0x48c   : > { %5538 = vmatprep.subr.bf16.mxu1 %v8561_v1  ;;  %v2035_v1 = vld [vmem:[%s12864_s7 + $0x2a8] sm:$0xff] }
 0x48d   : > { %5498 = vmatpush1.bf16.msra.mxu0 %v8432_v2  ;;  %v8601_v2 = vcombine.high %v2151_v54, %v2155_v17  ;;  %v8480_v10 = vcombine.low %v2031_v49, %v2035_v1  ;;  %v2199_v17 = vld [vmem:[%s12864_s7 + $0x7c8] sm:$0xff] }
 0x48e   : > { %5499 = vmatprep.subr.bf16.mxu0 %v8441_v51  ;;  %v2163_v51 = vld [vmem:[%s12864_s7 + $0x6a8] sm:$0xff] }
 0x48f   : > { %5539 = vmatpush1.bf16.msra.mxu1 %v8560_v52  ;;  %v3907_v15 = vpop.f32.mrb[12].mxu0  ;;  %v8481_v52 = vcombine.high %v2031_v49, %v2035_v1  ;;  %v1952_v1 = vld [vmem:[%s12864_s7 + $0x10] sm:$0xff] }
 0x490   : > { %v3909_v21 = vpop.f32.mrb[13].mxu0  ;;  %5540 = vmatprep.subr.bf16.mxu1 %v8569_v7  ;;  %v2043_v7 = vld [vmem:[%s12864_s7 + $0x2e8] sm:$0xff] }
 0x491   : > { %v3948_v23 = vpop.f32.mrb[12].mxu1  ;;  %v3911_v57 = vpop.f32.mrb[14].mxu0  ;;  %5500 = vmatpush1.bf16.msra.mxu0 %v8440_v8  ;;  %v8609_v8 = vcombine.high %v2159_v5, %v2163_v51 }
 0x492   : > { %v11489_v25 = vadd.f32 %v3948_v23, %v3907_v15  ;;  %v3950_v31 = vpop.f32.mrb[13].mxu1  ;;  %v3912_v12 = vpop.f32.mrb[15].mxu0  ;;  %5501 = vmatprep.subr.bf16.mxu0 %v8449_v13  ;;  %v2171_v13 = vld [vmem:[%s12864_s7 + $0x6e8] sm:$0xff]  ;;  %v8489_v15 = vcombine.high %v2039_v56, %v2043_v7 }
 0x493   : > { %v11491_v63 = vadd.f32 %v3950_v31, %v3909_v21  ;;  %v3952_v26 = vpop.f32.mrb[14].mxu1  ;;  %5541 = vmatpush1.bf16.msra.mxu1 %v8568_v18  ;;  %v8608_v18 = vcombine.low %v2159_v5, %v2163_v51  ;;  %v8617_v21 = vcombine.high %v2167_v11, %v2171_v13  ;;  %v2175_v23 = vld [vmem:[%s12864_s7 + $0x708] sm:$0xff]  ;;  %v8616_v62 = vcombine.low %v2167_v11, %v2171_v13  ;;  %v2080_v51 = vld [vmem:[%s12864_s7 + $0x410] sm:$0xff] }
 0x494   : > { %v3953_v28 = vpop.f32.mrb[15].mxu1  ;;  %5542 = vmatprep.subr.bf16.mxu1 %v8577_v22  ;;  %v8488_v22 = vcombine.low %v2039_v56, %v2043_v7  ;;  %v2179_v57 = vld [vmem:[%s12864_s7 + $0x728] sm:$0xff]  ;;  %v1960_v7 = vld [vmem:[%s12864_s7 + $0x50] sm:$0xff] }
 0x495   : > { %5502 = vmatpush1.bf16.msra.mxu0 %v8448_v6  ;;  %v8497_v6 = vcombine.high %v2047_v19, %v2051_v20  ;;  %v2059_v31 = vld [vmem:[%s12864_s7 + $0x368] sm:$0xff]  ;;  %v8625_v12 = vcombine.high %v2175_v23, %v2179_v57  ;;  %v8624_v27 = vcombine.low %v2175_v23, %v2179_v57  ;;  %v2088_v13 = vld [vmem:[%s12864_s7 + $0x450] sm:$0xff] }
 0x496   : > { %5503 = vmatprep.subr.bf16.mxu0 %v8457_v61  ;;  %v8496_v61 = vcombine.low %v2047_v19, %v2051_v20  ;;  %v2183_v26 = vld [vmem:[%s12864_s7 + $0x748] sm:$0xff]  ;;  %v8505_v4 = vcombine.high %v2055_v24, %v2059_v31  ;;  %v8504_v34 = vcombine.low %v2055_v24, %v2059_v31  ;;  %v1968_v20 = vld [vmem:[%s12864_s7 + $0x90] sm:$0xff] }
 0x497   : > { %5543 = vmatpush1.bf16.msra.mxu1 %v8576_v36  ;;  %v2187_v36 = vld [vmem:[%s12864_s7 + $0x768] sm:$0xff]  ;;  %v2096_v57 = vld [vmem:[%s12864_s7 + $0x490] sm:$0xff] }
 0x498   : > { %5544 = vmatprep.subr.bf16.mxu1 %v8585_v29  ;;  %v2063_v28 = vld [vmem:[%s12864_s7 + $0x388] sm:$0xff]  ;;  %v8632_v45 = vcombine.low %v2183_v26, %v2187_v36  ;;  %v1976_v31 = vld [vmem:[%s12864_s7 + $0xd0] sm:$0xff] }
 0x499   : > { %5504 = vmatpush1.bf16.msra.mxu0 %v8456_v33  ;;  %v2067_v29 = vld [vmem:[%s12864_s7 + $0x3a8] sm:$0xff]  ;;  %v8633_v33 = vcombine.high %v2183_v26, %v2187_v36  ;;  %v2104_v36 = vld [vmem:[%s12864_s7 + $0x4d0] sm:$0xff] }
 0x49a   : > { %5505 = vmatprep.subr.bf16.mxu0 %v8465_v42  ;;  %v2195_v42 = vld [vmem:[%s12864_s7 + $0x7a8] sm:$0xff]  ;;  %v8512_v54 = vcombine.low %v2063_v28, %v2067_v29 }
 0x49b   : > { %5545 = vmatpush1.bf16.msra.mxu1 %v8584_v9  ;;  %v8513_v9 = vcombine.high %v2063_v28, %v2067_v29  ;;  %v8640_v49 = vcombine.low %v2191_v35, %v2195_v42  ;;  %v1984_v29 = vld [vmem:[%s12864_s7 + $0x110] sm:$0xff] }
 0x49c   : > { %5546 = vmatprep.subr.bf16.mxu1 %v8593_v47  ;;  %v2075_v47 = vld [vmem:[%s12864_s7 + $0x3e8] sm:$0xff] }
 0x49d   : > { %5506 = vmatpush1.bf16.msra.mxu0 %v8464_v53  ;;  %v8641_v53 = vcombine.high %v2191_v35, %v2195_v42  ;;  %v8520_v5 = vcombine.low %v2071_v46, %v2075_v47  ;;  %v2112_v42 = vld [vmem:[%s12864_s7 + $0x510] sm:$0xff] }
 0x49e   : > { %5507 = vmatprep.subr.bf16.mxu0 %v8473_v16  ;;  %v2203_v16 = vld [vmem:[%s12864_s7 + $0x7e8] sm:$0xff] }
 0x49f   : > { %5547 = vmatpush1.bf16.msra.mxu1 %v8592_v0  ;;  %v8521_v0 = vcombine.high %v2071_v46, %v2075_v47  ;;  %v8648_v56 = vcombine.low %v2199_v17, %v2203_v16  ;;  %v1992_v47 = vld [vmem:[%s12864_s7 + $0x150] sm:$0xff] }
 0x4a0   : > { %5548 = vmatprep.subr.bf16.mxu1 %v8601_v2  ;;  %v1956_v2 = vld [vmem:[%s12864_s7 + $0x30] sm:$0xff] }
 0x4a1   : > { %5508 = vmatpush1.bf16.msra.mxu0 %v8472_v3  ;;  %v8649_v3 = vcombine.high %v2199_v17, %v2203_v16  ;;  %v8402_v11 = vcombine.low %v1952_v1, %v1956_v2  ;;  %v2120_v16 = vld [vmem:[%s12864_s7 + $0x550] sm:$0xff] }
 0x4a2   : > { %5509 = vmatprep.subr.bf16.mxu0 %v8481_v52  ;;  %v2084_v52 = vld [vmem:[%s12864_s7 + $0x430] sm:$0xff] }
 0x4a3   : > { %5549 = vmatpush1.bf16.msra.mxu1 %v8600_v55  ;;  %v8403_v55 = vcombine.high %v1952_v1, %v1956_v2  ;;  %v8530_v19 = vcombine.low %v2080_v51, %v2084_v52  ;;  %v2000_v2 = vld [vmem:[%s12864_s7 + $0x190] sm:$0xff] }
 0x4a4   : > { %5550 = vmatprep.subr.bf16.mxu1 %v8609_v8  ;;  %v1964_v8 = vld [vmem:[%s12864_s7 + $0x70] sm:$0xff] }
 0x4a5   : > { %5510 = vmatpush1.bf16.msra.mxu0 %v8480_v10  ;;  %v8531_v10 = vcombine.high %v2080_v51, %v2084_v52  ;;  %v8410_v23 = vcombine.low %v1960_v7, %v1964_v8  ;;  %v2128_v52 = vld [vmem:[%s12864_s7 + $0x590] sm:$0xff] }
 0x4a6   : > { %5511 = vmatprep.subr.bf16.mxu0 %v8489_v15  ;;  %v2092_v15 = vld [vmem:[%s12864_s7 + $0x470] sm:$0xff] }
 0x4a7   : > { %5551 = vmatpush1.bf16.msra.mxu1 %v8608_v18  ;;  %v8411_v18 = vcombine.high %v1960_v7, %v1964_v8  ;;  %v8538_v24 = vcombine.low %v2088_v13, %v2092_v15 }
 0x4a8   : > { %5552 = vmatprep.subr.bf16.mxu1 %v8617_v21  ;;  %v1972_v21 = vld [vmem:[%s12864_s7 + $0xb0] sm:$0xff] }
 0x4a9   : > { %5512 = vmatpush1.bf16.msra.mxu0 %v8488_v22  ;;  %v8539_v22 = vcombine.high %v2088_v13, %v2092_v15  ;;  %v8418_v26 = vcombine.low %v1968_v20, %v1972_v21 }
 0x4aa   : > { %5513 = vmatprep.subr.bf16.mxu0 %v8497_v6  ;;  %v2100_v6 = vld [vmem:[%s12864_s7 + $0x4b0] sm:$0xff] }
 0x4ab   : > { %5553 = vmatpush1.bf16.msra.mxu1 %v8616_v62  ;;  %v8419_v62 = vcombine.high %v1968_v20, %v1972_v21  ;;  %v8546_v28 = vcombine.low %v2096_v57, %v2100_v6  ;;  %v2136_v21 = vld [vmem:[%s12864_s7 + $0x5d0] sm:$0xff] }
 0x4ac   : > { %5554 = vmatprep.subr.bf16.mxu1 %v8625_v12  ;;  %v1980_v12 = vld [vmem:[%s12864_s7 + $0xf0] sm:$0xff] }
 0x4ad   : > { %5514 = vmatpush1.bf16.msra.mxu0 %v8496_v61  ;;  %v8547_v61 = vcombine.high %v2096_v57, %v2100_v6  ;;  %v8426_v35 = vcombine.low %v1976_v31, %v1980_v12 }
 0x4ae   : > { %5515 = vmatprep.subr.bf16.mxu0 %v8505_v4  ;;  %v2108_v4 = vld [vmem:[%s12864_s7 + $0x4f0] sm:$0xff] }
 0x4af   : > { %5555 = vmatpush1.bf16.msra.mxu1 %v8624_v27  ;;  %v8427_v27 = vcombine.high %v1976_v31, %v1980_v12  ;;  %v8554_v46 = vcombine.low %v2104_v36, %v2108_v4 }
 0x4b0   : > { %5556 = vmatprep.subr.bf16.mxu1 %v8633_v33  ;;  %v1988_v33 = vld [vmem:[%s12864_s7 + $0x130] sm:$0xff] }
 0x4b1   : > { %5516 = vmatpush1.bf16.msra.mxu0 %v8504_v34  ;;  %v8555_v34 = vcombine.high %v2104_v36, %v2108_v4  ;;  %v8434_v17 = vcombine.low %v1984_v29, %v1988_v33 }
 0x4b2   : > { %5517 = vmatprep.subr.bf16.mxu0 %v8513_v9  ;;  %v2116_v9 = vld [vmem:[%s12864_s7 + $0x530] sm:$0xff] }
 0x4b3   : > { %5557 = vmatpush1.bf16.msra.mxu1 %v8632_v45  ;;  %v8435_v45 = vcombine.high %v1984_v29, %v1988_v33  ;;  %v8562_v1 = vcombine.low %v2112_v42, %v2116_v9  ;;  %v2148_v29 = vld [vmem:[%s12864_s7 + $0x630] sm:$0xff] }
 0x4b4   : > { %5558 = vmatprep.subr.bf16.mxu1 %v8641_v53  ;;  %v1996_v53 = vld [vmem:[%s12864_s7 + $0x170] sm:$0xff] }
 0x4b5   : > { %5518 = vmatpush1.bf16.msra.mxu0 %v8512_v54  ;;  %v8563_v54 = vcombine.high %v2112_v42, %v2116_v9  ;;  %v8442_v51 = vcombine.low %v1992_v47, %v1996_v53  ;;  %v2028_v42 = vld [vmem:[%s12864_s7 + $0x270] sm:$0xff] }
 0x4b6   : > { %5519 = vmatprep.subr.bf16.mxu0 %v8521_v0  ;;  %v2124_v0 = vld [vmem:[%s12864_s7 + $0x570] sm:$0xff] }
 0x4b7   : > { %5559 = vmatpush1.bf16.msra.mxu1 %v8640_v49  ;;  %v8443_v49 = vcombine.high %v1992_v47, %v1996_v53  ;;  %v8570_v8 = vcombine.low %v2120_v16, %v2124_v0  ;;  %v2156_v47 = vld [vmem:[%s12864_s7 + $0x670] sm:$0xff] }
 0x4b8   : > { %5560 = vmatprep.subr.bf16.mxu1 %v8649_v3  ;;  %v2004_v3 = vld [vmem:[%s12864_s7 + $0x1b0] sm:$0xff] }
 0x4b9   : > { %5520 = vmatpush1.bf16.msra.mxu0 %v8520_v5  ;;  %v8571_v5 = vcombine.high %v2120_v16, %v2124_v0  ;;  %v8450_v20 = vcombine.low %v2000_v2, %v2004_v3  ;;  %v2036_v16 = vld [vmem:[%s12864_s7 + $0x2b0] sm:$0xff] }
 0x4ba   : > { %5571 = vmatprep.subr.bf16.mxu0 %v8403_v55  ;;  %v2132_v55 = vld [vmem:[%s12864_s7 + $0x5b0] sm:$0xff] }
 0x4bb   : > { %5561 = vmatpush1.bf16.msra.mxu1 %v8648_v56  ;;  %v8451_v56 = vcombine.high %v2000_v2, %v2004_v3  ;;  %v8579_v15 = vcombine.high %v2128_v52, %v2132_v55  ;;  %v8578_v12 = vcombine.low %v2128_v52, %v2132_v55  ;;  %v2164_v2 = vld [vmem:[%s12864_s7 + $0x6b0] sm:$0xff] }
 0x4bc   : > { %5522 = vmatmul.mubr.bf16.vlgmr.msra.gmra.mrb[28].mxu0 %v11407_v58  ;;  %5612 = vmatprep.subr.bf16.mxu1 %v8531_v10  ;;  %v2008_v10 = vld [vmem:[%s12864_s7 + $0x1d0] sm:$0xff] }
 0x4bd   : > { %5572 = vmatpush1.bf16.msra.mxu0 %v8402_v11  ;;  %5603 = vmatprep.mubr.bf16.mxu0 %v11197_v32  ;;  %v2012_v11 = vld [vmem:[%s12864_s7 + $0x1f0] sm:$0xff] }
 0x4be   : > { %5563 = vmatmul.mubr.bf16.vlgmr.msra.gmra.mrb[28].mxu1 %v11418_v59  ;;  %5573 = vmatprep.subr.bf16.mxu0 %v8411_v18  ;;  %v2044_v52 = vld [vmem:[%s12864_s7 + $0x2f0] sm:$0xff] }
 0x4bf   : > { %5613 = vmatpush1.bf16.msra.mxu1 %v8530_v19  ;;  %5644 = vmatprep.mubr.bf16.mxu1 %v11211_v37 }
 0x4c0   : > { %5614 = vmatprep.subr.bf16.mxu1 %v8539_v22  ;;  %v2140_v22 = vld [vmem:[%s12864_s7 + $0x5f0] sm:$0xff] }
 0x4c1   : > { %5574 = vmatpush1.bf16.msra.mxu0 %v8410_v23  ;;  %v8587_v4 = vcombine.high %v2136_v21, %v2140_v22 }
 0x4c2   : > { %5575 = vmatprep.subr.bf16.mxu0 %v8419_v62  ;;  %v8459_v62 = vcombine.high %v2008_v10, %v2012_v11 }
 0x4c3   : > { %5615 = vmatpush1.bf16.msra.mxu1 %v8538_v24 }
 0x4c4   : > { %5616 = vmatprep.subr.bf16.mxu1 %v8547_v61  ;;  %v2016_v61 = vld [vmem:[%s12864_s7 + $0x210] sm:$0xff] }
 0x4c5   : > { %5576 = vmatpush1.bf16.msra.mxu0 %v8418_v26  ;;  %v2020_v26 = vld [vmem:[%s12864_s7 + $0x230] sm:$0xff] }
 0x4c6   : > { %5577 = vmatprep.subr.bf16.mxu0 %v8427_v27  ;;  %v8458_v27 = vcombine.low %v2008_v10, %v2012_v11  ;;  %v8467_v33 = vcombine.high %v2016_v61, %v2020_v26 }
 0x4c7   : > { %5617 = vmatpush1.bf16.msra.mxu1 %v8546_v28  ;;  %v2144_v28 = vld [vmem:[%s12864_s7 + $0x610] sm:$0xff] }
 0x4c8   : > { %5618 = vmatprep.subr.bf16.mxu1 %v8555_v34  ;;  %v8586_v34 = vcombine.low %v2136_v21, %v2140_v22  ;;  %v8595_v9 = vcombine.high %v2144_v28, %v2148_v29  ;;  %v2180_v21 = vld [vmem:[%s12864_s7 + $0x730] sm:$0xff] }
 0x4c9   : > { %5578 = vmatpush1.bf16.msra.mxu0 %v8426_v35  ;;  %v2024_v35 = vld [vmem:[%s12864_s7 + $0x250] sm:$0xff] }
 0x4ca   : > { %5579 = vmatprep.subr.bf16.mxu0 %v8435_v45  ;;  %v8466_v45 = vcombine.low %v2016_v61, %v2020_v26  ;;  %v8475_v53 = vcombine.high %v2024_v35, %v2028_v42  ;;  %v2184_v61 = vld [vmem:[%s12864_s7 + $0x750] sm:$0xff] }
 0x4cb   : > { %5619 = vmatpush1.bf16.msra.mxu1 %v8554_v46  ;;  %v2152_v46 = vld [vmem:[%s12864_s7 + $0x650] sm:$0xff] }
 0x4cc   : > { %5620 = vmatprep.subr.bf16.mxu1 %v8563_v54  ;;  %v8594_v54 = vcombine.low %v2144_v28, %v2148_v29  ;;  %v8603_v0 = vcombine.high %v2152_v46, %v2156_v47  ;;  %v2188_v26 = vld [vmem:[%s12864_s7 + $0x770] sm:$0xff] }
 0x4cd   : > { %5580 = vmatpush1.bf16.msra.mxu0 %v8434_v17  ;;  %v2032_v17 = vld [vmem:[%s12864_s7 + $0x290] sm:$0xff]  ;;  %v8635_v29 = vcombine.high %v2184_v61, %v2188_v26 }
 0x4ce   : > { %5581 = vmatprep.subr.bf16.mxu0 %v8443_v49  ;;  %v8474_v49 = vcombine.low %v2024_v35, %v2028_v42  ;;  %v8483_v3 = vcombine.high %v2032_v17, %v2036_v16  ;;  %v2068_v28 = vld [vmem:[%s12864_s7 + $0x3b0] sm:$0xff] }
 0x4cf   : > { %5621 = vmatpush1.bf16.msra.mxu1 %v8562_v1  ;;  %v3989_v7 = vpop.f32.mrb[16].mxu0  ;;  %v2160_v1 = vld [vmem:[%s12864_s7 + $0x690] sm:$0xff] }
 0x4d0   : > { %v3991_v13 = vpop.f32.mrb[17].mxu0  ;;  %5622 = vmatprep.subr.bf16.mxu1 %v8571_v5  ;;  %v8602_v5 = vcombine.low %v2152_v46, %v2156_v47  ;;  %v8611_v55 = vcombine.high %v2160_v1, %v2164_v2  ;;  %v8610_v11 = vcombine.low %v2160_v1, %v2164_v2  ;;  %v2196_v35 = vld [vmem:[%s12864_s7 + $0x7b0] sm:$0xff]  ;;  %v1957_v1 = vld [vmem:[%s12864_s7 + $0x38] sm:$0xff] }
 0x4d1   : > { %v4030_v18 = vpop.f32.mrb[16].mxu1  ;;  %v3993_v19 = vpop.f32.mrb[18].mxu0  ;;  %5582 = vmatpush1.bf16.msra.mxu0 %v8442_v51  ;;  %v2040_v51 = vld [vmem:[%s12864_s7 + $0x2d0] sm:$0xff] }
 0x4d2   : > { %v11689_v23 = vadd.f32 %v4030_v18, %v3989_v7  ;;  %v4032_v57 = vpop.f32.mrb[17].mxu1  ;;  %v3994_v6 = vpop.f32.mrb[19].mxu0  ;;  %5583 = vmatprep.subr.bf16.mxu0 %v8451_v56  ;;  %v8482_v56 = vcombine.low %v2032_v17, %v2036_v16  ;;  %v2168_v7 = vld [vmem:[%s12864_s7 + $0x6d0] sm:$0xff]  ;;  %v8491_v10 = vcombine.high %v2040_v51, %v2044_v52  ;;  %v8490_v19 = vcombine.low %v2040_v51, %v2044_v52  ;;  %v2085_v51 = vld [vmem:[%s12864_s7 + $0x438] sm:$0xff] }
 0x4d3   : > { %v11691_v24 = vadd.f32 %v4032_v57, %v3991_v13  ;;  %v4034_v31 = vpop.f32.mrb[18].mxu1  ;;  %5623 = vmatpush1.bf16.msra.mxu1 %v8570_v8  ;;  %v2172_v8 = vld [vmem:[%s12864_s7 + $0x6f0] sm:$0xff] }
 0x4d4   : > { %v4035_v36 = vpop.f32.mrb[19].mxu1  ;;  %5624 = vmatprep.subr.bf16.mxu1 %v8579_v15  ;;  %v2048_v13 = vld [vmem:[%s12864_s7 + $0x310] sm:$0xff]  ;;  %v8619_v18 = vcombine.high %v2168_v7, %v2172_v8  ;;  %v8618_v57 = vcombine.low %v2168_v7, %v2172_v8  ;;  %v1965_v7 = vld [vmem:[%s12864_s7 + $0x78] sm:$0xff] }
 0x4d5   : > { %5584 = vmatpush1.bf16.msra.mxu0 %v8450_v20  ;;  %v2052_v15 = vld [vmem:[%s12864_s7 + $0x330] sm:$0xff] }
 0x4d6   : > { %5585 = vmatprep.subr.bf16.mxu0 %v8459_v62  ;;  %v2176_v20 = vld [vmem:[%s12864_s7 + $0x710] sm:$0xff]  ;;  %v8499_v22 = vcombine.high %v2048_v13, %v2052_v15 }
 0x4d7   : > { %5625 = vmatpush1.bf16.msra.mxu1 %v8578_v12  ;;  %v2056_v6 = vld [vmem:[%s12864_s7 + $0x350] sm:$0xff]  ;;  %v8627_v31 = vcombine.high %v2176_v20, %v2180_v21  ;;  %v8498_v12 = vcombine.low %v2048_v13, %v2052_v15  ;;  %v2093_v13 = vld [vmem:[%s12864_s7 + $0x478] sm:$0xff] }
 0x4d8   : > { %5626 = vmatprep.subr.bf16.mxu1 %v8587_v4  ;;  %v2060_v62 = vld [vmem:[%s12864_s7 + $0x370] sm:$0xff]  ;;  %v8626_v4 = vcombine.low %v2176_v20, %v2180_v21  ;;  %v1973_v20 = vld [vmem:[%s12864_s7 + $0xb8] sm:$0xff] }
 0x4d9   : > { %5586 = vmatpush1.bf16.msra.mxu0 %v8458_v27  ;;  %v8507_v36 = vcombine.high %v2056_v6, %v2060_v62  ;;  %v2064_v27 = vld [vmem:[%s12864_s7 + $0x390] sm:$0xff] }
 0x4da   : > { %5587 = vmatprep.subr.bf16.mxu0 %v8467_v33  ;;  %v8506_v33 = vcombine.low %v2056_v6, %v2060_v62  ;;  %v8515_v42 = vcombine.high %v2064_v27, %v2068_v28  ;;  %v2076_v46 = vld [vmem:[%s12864_s7 + $0x3f0] sm:$0xff]  ;;  %v2101_v6 = vld [vmem:[%s12864_s7 + $0x4b8] sm:$0xff] }
 0x4db   : > { %5627 = vmatpush1.bf16.msra.mxu1 %v8586_v34  ;;  %v2192_v34 = vld [vmem:[%s12864_s7 + $0x790] sm:$0xff] }
 0x4dc   : > { %5628 = vmatprep.subr.bf16.mxu1 %v8595_v9  ;;  %v8634_v9 = vcombine.low %v2184_v61, %v2188_v26  ;;  %v8643_v47 = vcombine.high %v2192_v34, %v2196_v35  ;;  %v2204_v17 = vld [vmem:[%s12864_s7 + $0x7f0] sm:$0xff] }
 0x4dd   : > { %5588 = vmatpush1.bf16.msra.mxu0 %v8466_v45  ;;  %v2072_v45 = vld [vmem:[%s12864_s7 + $0x3d0] sm:$0xff] }
 0x4de   : > { %5589 = vmatprep.subr.bf16.mxu0 %v8475_v53  ;;  %v8514_v53 = vcombine.low %v2064_v27, %v2068_v28  ;;  %v8523_v16 = vcombine.high %v2072_v45, %v2076_v46  ;;  %v1985_v28 = vld [vmem:[%s12864_s7 + $0x118] sm:$0xff] }
 0x4df   : > { %5629 = vmatpush1.bf16.msra.mxu1 %v8594_v54  ;;  %v2200_v54 = vld [vmem:[%s12864_s7 + $0x7d0] sm:$0xff] }
 0x4e0   : > { %5630 = vmatprep.subr.bf16.mxu1 %v8603_v0  ;;  %v8642_v0 = vcombine.low %v2192_v34, %v2196_v35  ;;  %v8651_v2 = vcombine.high %v2200_v54, %v2204_v17  ;;  %v2113_v35 = vld [vmem:[%s12864_s7 + $0x518] sm:$0xff] }
 0x4e1   : > { %5590 = vmatpush1.bf16.msra.mxu0 %v8474_v49  ;;  %v1953_v49 = vld [vmem:[%s12864_s7 + $0x18] sm:$0xff] }
 0x4e2   : > { %5591 = vmatprep.subr.bf16.mxu0 %v8483_v3  ;;  %v8522_v3 = vcombine.low %v2072_v45, %v2076_v46  ;;  %v8405_v52 = vcombine.high %v1953_v49, %v1957_v1  ;;  %v1993_v46 = vld [vmem:[%s12864_s7 + $0x158] sm:$0xff] }
 0x4e3   : > { %5631 = vmatpush1.bf16.msra.mxu1 %v8602_v5  ;;  %v2081_v5 = vld [vmem:[%s12864_s7 + $0x418] sm:$0xff] }
 0x4e4   : > { %5632 = vmatprep.subr.bf16.mxu1 %v8611_v55  ;;  %v8650_v55 = vcombine.low %v2200_v54, %v2204_v17  ;;  %v8533_v8 = vcombine.high %v2081_v5, %v2085_v51  ;;  %v2121_v17 = vld [vmem:[%s12864_s7 + $0x558] sm:$0xff] }
 0x4e5   : > { %5592 = vmatpush1.bf16.msra.mxu0 %v8482_v56  ;;  %v1961_v56 = vld [vmem:[%s12864_s7 + $0x58] sm:$0xff] }
 0x4e6   : > { %5593 = vmatprep.subr.bf16.mxu0 %v8491_v10  ;;  %v8404_v10 = vcombine.low %v1953_v49, %v1957_v1  ;;  %v8413_v15 = vcombine.high %v1961_v56, %v1965_v7  ;;  %v2001_v1 = vld [vmem:[%s12864_s7 + $0x198] sm:$0xff] }
 0x4e7   : > { %5633 = vmatpush1.bf16.msra.mxu1 %v8610_v11  ;;  %v2089_v11 = vld [vmem:[%s12864_s7 + $0x458] sm:$0xff] }
 0x4e8   : > { %5634 = vmatprep.subr.bf16.mxu1 %v8619_v18  ;;  %v8532_v18 = vcombine.low %v2081_v5, %v2085_v51  ;;  %v8541_v21 = vcombine.high %v2089_v11, %v2093_v13  ;;  %v2129_v51 = vld [vmem:[%s12864_s7 + $0x598] sm:$0xff] }
 0x4e9   : > { %5594 = vmatpush1.bf16.msra.mxu0 %v8490_v19  ;;  %v1969_v19 = vld [vmem:[%s12864_s7 + $0x98] sm:$0xff] }
 0x4ea   : > { %5595 = vmatprep.subr.bf16.mxu0 %v8499_v22  ;;  %v8412_v22 = vcombine.low %v1961_v56, %v1965_v7  ;;  %v8421_v62 = vcombine.high %v1969_v19, %v1973_v20  ;;  %v8420_v26 = vcombine.low %v1969_v19, %v1973_v20  ;;  %v2137_v20 = vld [vmem:[%s12864_s7 + $0x5d8] sm:$0xff] }
 0x4eb   : > { %5635 = vmatpush1.bf16.msra.mxu1 %v8618_v57  ;;  %v2097_v57 = vld [vmem:[%s12864_s7 + $0x498] sm:$0xff] }
 0x4ec   : > { %5636 = vmatprep.subr.bf16.mxu1 %v8627_v31  ;;  %v8540_v31 = vcombine.low %v2089_v11, %v2093_v13  ;;  %v8549_v61 = vcombine.high %v2097_v57, %v2101_v6  ;;  %v8548_v27 = vcombine.low %v2097_v57, %v2101_v6 }
 0x4ed   : > { %5596 = vmatpush1.bf16.msra.mxu0 %v8498_v12  ;;  %v1981_v12 = vld [vmem:[%s12864_s7 + $0xf8] sm:$0xff] }
 0x4ee   : > { %5597 = vmatprep.subr.bf16.mxu0 %v8507_v36  ;;  %v2105_v36 = vld [vmem:[%s12864_s7 + $0x4d8] sm:$0xff] }
 0x4ef   : > { %5637 = vmatpush1.bf16.msra.mxu1 %v8626_v4 }
 0x4f0   : > { %5638 = vmatprep.subr.bf16.mxu1 %v8635_v29  ;;  %v1989_v29 = vld [vmem:[%s12864_s7 + $0x138] sm:$0xff] }
 0x4f1   : > { %5598 = vmatpush1.bf16.msra.mxu0 %v8506_v33  ;;  %v8436_v54 = vcombine.low %v1985_v28, %v1989_v29 }
 0x4f2   : > { %5599 = vmatprep.subr.bf16.mxu0 %v8515_v42  ;;  %v2117_v42 = vld [vmem:[%s12864_s7 + $0x538] sm:$0xff] }
 0x4f3   : > { %5639 = vmatpush1.bf16.msra.mxu1 %v8634_v9  ;;  %v8437_v9 = vcombine.high %v1985_v28, %v1989_v29  ;;  %v8564_v49 = vcombine.low %v2113_v35, %v2117_v42  ;;  %v2149_v28 = vld [vmem:[%s12864_s7 + $0x638] sm:$0xff] }
 0x4f4   : > { %5640 = vmatprep.subr.bf16.mxu1 %v8643_v47  ;;  %v1997_v47 = vld [vmem:[%s12864_s7 + $0x178] sm:$0xff] }
 0x4f5   : > { %5600 = vmatpush1.bf16.msra.mxu0 %v8514_v53  ;;  %v8565_v53 = vcombine.high %v2113_v35, %v2117_v42  ;;  %v8444_v5 = vcombine.low %v1993_v46, %v1997_v47  ;;  %v2029_v35 = vld [vmem:[%s12864_s7 + $0x278] sm:$0xff] }
 0x4f6   : > { %5601 = vmatprep.subr.bf16.mxu0 %v8523_v16  ;;  %v2125_v16 = vld [vmem:[%s12864_s7 + $0x578] sm:$0xff] }
 0x4f7   : > { %5641 = vmatpush1.bf16.msra.mxu1 %v8642_v0  ;;  %v8445_v0 = vcombine.high %v1993_v46, %v1997_v47  ;;  %v8572_v7 = vcombine.low %v2121_v17, %v2125_v16  ;;  %v2157_v46 = vld [vmem:[%s12864_s7 + $0x678] sm:$0xff] }
 0x4f8   : > { %5642 = vmatprep.subr.bf16.mxu1 %v8651_v2  ;;  %v2005_v2 = vld [vmem:[%s12864_s7 + $0x1b8] sm:$0xff] }
 0x4f9   : > { %5602 = vmatpush1.bf16.msra.mxu0 %v8522_v3  ;;  %v8573_v3 = vcombine.high %v2121_v17, %v2125_v16  ;;  %v8452_v19 = vcombine.low %v2001_v1, %v2005_v2  ;;  %v2037_v17 = vld [vmem:[%s12864_s7 + $0x2b8] sm:$0xff] }
 0x4fa   : > { %5653 = vmatprep.subr.bf16.mxu0 %v8405_v52  ;;  %v2133_v52 = vld [vmem:[%s12864_s7 + $0x5b8] sm:$0xff] }
 0x4fb   : > { %5643 = vmatpush1.bf16.msra.mxu1 %v8650_v55  ;;  %v8453_v55 = vcombine.high %v2001_v1, %v2005_v2  ;;  %v8581_v13 = vcombine.high %v2129_v51, %v2133_v52  ;;  %v2165_v1 = vld [vmem:[%s12864_s7 + $0x6b8] sm:$0xff] }
 0x4fc   : > { %5604 = vmatmul.mubr.bf16.vlgmr.msra.gmra.mrb[32].mxu0 %v11407_v58  ;;  %5694 = vmatprep.subr.bf16.mxu1 %v8533_v8  ;;  %v2009_v8 = vld [vmem:[%s12864_s7 + $0x1d8] sm:$0xff] }
 0x4fd   : > { %5654 = vmatpush1.bf16.msra.mxu0 %v8404_v10  ;;  %5685 = vmatprep.mubr.bf16.mxu0 %v11197_v32  ;;  %v1977_v32 = vld [vmem:[%s12864_s7 + $0xd8] sm:$0xff] }
 0x4fe   : > { %5645 = vmatmul.mubr.bf16.vlgmr.msra.gmra.mrb[32].mxu1 %v11418_v59  ;;  %5655 = vmatprep.subr.bf16.mxu0 %v8413_v15  ;;  %v8429_v4 = vcombine.high %v1977_v32, %v1981_v12  ;;  %v8428_v34 = vcombine.low %v1977_v32, %v1981_v12  ;;  %v2013_v10 = vld [vmem:[%s12864_s7 + $0x1f8] sm:$0xff]  ;;  %v8580_v12 = vcombine.low %v2129_v51, %v2133_v52 }
 0x4ff   : > { %5695 = vmatpush1.bf16.msra.mxu1 %v8532_v18  ;;  %5726 = vmatprep.mubr.bf16.mxu1 %v11211_v37  ;;  %v2109_v37 = vld [vmem:[%s12864_s7 + $0x4f8] sm:$0xff] }
 0x500   : > { %5696 = vmatprep.subr.bf16.mxu1 %v8541_v21  ;;  %v8557_v33 = vcombine.high %v2105_v36, %v2109_v37  ;;  %v8556_v45 = vcombine.low %v2105_v36, %v2109_v37  ;;  %v2141_v21 = vld [vmem:[%s12864_s7 + $0x5f8] sm:$0xff] }
 0x501   : > { %5656 = vmatpush1.bf16.msra.mxu0 %v8412_v22  ;;  %v8589_v37 = vcombine.high %v2137_v20, %v2141_v21  ;;  %v2045_v51 = vld [vmem:[%s12864_s7 + $0x2f8] sm:$0xff] }
 0x502   : > { %5657 = vmatprep.subr.bf16.mxu0 %v8421_v62  ;;  %v8461_v62 = vcombine.high %v2009_v8, %v2013_v10 }
 0x503   : > { %5697 = vmatpush1.bf16.msra.mxu1 %v8540_v31 }
 0x504   : > { %5698 = vmatprep.subr.bf16.mxu1 %v8549_v61  ;;  %v2017_v61 = vld [vmem:[%s12864_s7 + $0x218] sm:$0xff] }
 0x505   : > { %5658 = vmatpush1.bf16.msra.mxu0 %v8420_v26  ;;  %v2021_v26 = vld [vmem:[%s12864_s7 + $0x238] sm:$0xff] }
 0x506   : > { %5659 = vmatprep.subr.bf16.mxu0 %v8429_v4  ;;  %v8460_v4 = vcombine.low %v2009_v8, %v2013_v10  ;;  %v8469_v29 = vcombine.high %v2017_v61, %v2021_v26 }
 0x507   : > { %5699 = vmatpush1.bf16.msra.mxu1 %v8548_v27  ;;  %v2145_v27 = vld [vmem:[%s12864_s7 + $0x618] sm:$0xff] }
 0x508   : > { %5700 = vmatprep.subr.bf16.mxu1 %v8557_v33  ;;  %v8588_v33 = vcombine.low %v2137_v20, %v2141_v21  ;;  %v8597_v42 = vcombine.high %v2145_v27, %v2149_v28  ;;  %v2181_v20 = vld [vmem:[%s12864_s7 + $0x738] sm:$0xff] }
 0x509   : > { %5660 = vmatpush1.bf16.msra.mxu0 %v8428_v34  ;;  %v2025_v34 = vld [vmem:[%s12864_s7 + $0x258] sm:$0xff] }
 0x50a   : > { %5661 = vmatprep.subr.bf16.mxu0 %v8437_v9  ;;  %v8468_v9 = vcombine.low %v2017_v61, %v2021_v26  ;;  %v8477_v47 = vcombine.high %v2025_v34, %v2029_v35  ;;  %v2185_v61 = vld [vmem:[%s12864_s7 + $0x758] sm:$0xff] }
 0x50b   : > { %5701 = vmatpush1.bf16.msra.mxu1 %v8556_v45  ;;  %v2153_v45 = vld [vmem:[%s12864_s7 + $0x658] sm:$0xff] }
 0x50c   : > { %5702 = vmatprep.subr.bf16.mxu1 %v8565_v53  ;;  %v8596_v53 = vcombine.low %v2145_v27, %v2149_v28  ;;  %v8605_v16 = vcombine.high %v2153_v45, %v2157_v46  ;;  %v2189_v26 = vld [vmem:[%s12864_s7 + $0x778] sm:$0xff] }
 0x50d   : > { %5662 = vmatpush1.bf16.msra.mxu0 %v8436_v54  ;;  %v2033_v54 = vld [vmem:[%s12864_s7 + $0x298] sm:$0xff]  ;;  %v8637_v28 = vcombine.high %v2185_v61, %v2189_v26 }
 0x50e   : > { %5663 = vmatprep.subr.bf16.mxu0 %v8445_v0  ;;  %v8476_v0 = vcombine.low %v2025_v34, %v2029_v35  ;;  %v8485_v2 = vcombine.high %v2033_v54, %v2037_v17  ;;  %v2069_v27 = vld [vmem:[%s12864_s7 + $0x3b8] sm:$0xff] }
 0x50f   : > { %5703 = vmatpush1.bf16.msra.mxu1 %v8564_v49  ;;  %v4071_v56 = vpop.f32.mrb[20].mxu0  ;;  %v2161_v49 = vld [vmem:[%s12864_s7 + $0x698] sm:$0xff] }
 0x510   : > { %v4073_v11 = vpop.f32.mrb[21].mxu0  ;;  %5704 = vmatprep.subr.bf16.mxu1 %v8573_v3  ;;  %v8604_v3 = vcombine.low %v2153_v45, %v2157_v46  ;;  %v8613_v52 = vcombine.high %v2161_v49, %v2165_v1  ;;  %v8612_v10 = vcombine.low %v2161_v49, %v2165_v1  ;;  %v2197_v34 = vld [vmem:[%s12864_s7 + $0x7b8] sm:$0xff]  ;;  %v8658_v49 = vld [vmem:[%s12864_s7 + $0x1020] sm:$0xff] }
 0x511   : > { %v4112_v15 = vpop.f32.mrb[20].mxu1  ;;  %v4075_v18 = vpop.f32.mrb[22].mxu0  ;;  %5664 = vmatpush1.bf16.msra.mxu0 %v8444_v5  ;;  %v2041_v5 = vld [vmem:[%s12864_s7 + $0x2d8] sm:$0xff] }
 0x512   : > { %v11889_v22 = vadd.f32 %v4112_v15, %v4071_v56  ;;  %v4114_v57 = vpop.f32.mrb[21].mxu1  ;;  %v4076_v6 = vpop.f32.mrb[23].mxu0  ;;  %5665 = vmatprep.subr.bf16.mxu0 %v8453_v55  ;;  %v8484_v55 = vcombine.low %v2033_v54, %v2037_v17  ;;  %v2169_v56 = vld [vmem:[%s12864_s7 + $0x6d8] sm:$0xff]  ;;  %v8493_v8 = vcombine.high %v2041_v5, %v2045_v51  ;;  %v8492_v18 = vcombine.low %v2041_v5, %v2045_v51  ;;  %v8786_v5 = vld [vmem:[%s12864_s7 + $0x1420] sm:$0xff] }
 0x513   : > { %v11891_v31 = vadd.f32 %v4114_v57, %v4073_v11  ;;  %v4116_v32 = vpop.f32.mrb[22].mxu1  ;;  %5705 = vmatpush1.bf16.msra.mxu1 %v8572_v7  ;;  %v2173_v7 = vld [vmem:[%s12864_s7 + $0x6f8] sm:$0xff] }
 0x514   : > { %v4117_v36 = vpop.f32.mrb[23].mxu1  ;;  %5706 = vmatprep.subr.bf16.mxu1 %v8581_v13  ;;  %v2049_v11 = vld [vmem:[%s12864_s7 + $0x318] sm:$0xff]  ;;  %v8621_v15 = vcombine.high %v2169_v56, %v2173_v7  ;;  %v8620_v57 = vcombine.low %v2169_v56, %v2173_v7  ;;  %v8666_v56 = vld [vmem:[%s12864_s7 + $0x1060] sm:$0xff] }
 0x515   : > { %5666 = vmatpush1.bf16.msra.mxu0 %v8452_v19  ;;  %v2053_v13 = vld [vmem:[%s12864_s7 + $0x338] sm:$0xff] }
 0x516   : > { %5667 = vmatprep.subr.bf16.mxu0 %v8461_v62  ;;  %v2177_v19 = vld [vmem:[%s12864_s7 + $0x718] sm:$0xff]  ;;  %v8501_v21 = vcombine.high %v2049_v11, %v2053_v13 }
 0x517   : > { %5707 = vmatpush1.bf16.msra.mxu1 %v8580_v12  ;;  %v2057_v6 = vld [vmem:[%s12864_s7 + $0x358] sm:$0xff]  ;;  %v8629_v32 = vcombine.high %v2177_v19, %v2181_v20  ;;  %v8500_v12 = vcombine.low %v2049_v11, %v2053_v13  ;;  %v8794_v11 = vld [vmem:[%s12864_s7 + $0x1460] sm:$0xff] }
 0x518   : > { %5708 = vmatprep.subr.bf16.mxu1 %v8589_v37  ;;  %v2061_v62 = vld [vmem:[%s12864_s7 + $0x378] sm:$0xff]  ;;  %v8628_v37 = vcombine.low %v2177_v19, %v2181_v20  ;;  %v8670_v19 = vld [vmem:[%s12864_s7 + $0x1080] sm:$0xff] }
 0x519   : > { %5668 = vmatpush1.bf16.msra.mxu0 %v8460_v4  ;;  %v8509_v36 = vcombine.high %v2057_v6, %v2061_v62  ;;  %v2065_v4 = vld [vmem:[%s12864_s7 + $0x398] sm:$0xff]  ;;  %v8674_v20 = vld [vmem:[%s12864_s7 + $0x10a0] sm:$0xff] }
 0x51a   : > { %5669 = vmatprep.subr.bf16.mxu0 %v8469_v29  ;;  %v8508_v29 = vcombine.low %v2057_v6, %v2061_v62  ;;  %v8517_v35 = vcombine.high %v2065_v4, %v2069_v27  ;;  %v2077_v45 = vld [vmem:[%s12864_s7 + $0x3f8] sm:$0xff]  ;;  %v8798_v6 = vld [vmem:[%s12864_s7 + $0x1480] sm:$0xff] }
 0x51b   : > { %5709 = vmatpush1.bf16.msra.mxu1 %v8588_v33  ;;  %v2193_v33 = vld [vmem:[%s12864_s7 + $0x798] sm:$0xff]  ;;  %v8802_v62 = vld [vmem:[%s12864_s7 + $0x14a0] sm:$0xff] }
 0x51c   : > { %5710 = vmatprep.subr.bf16.mxu1 %v8597_v42  ;;  %v8636_v42 = vcombine.low %v2185_v61, %v2189_v26  ;;  %v8645_v46 = vcombine.high %v2193_v33, %v2197_v34  ;;  %v2205_v54 = vld [vmem:[%s12864_s7 + $0x7f8] sm:$0xff]  ;;  %v9055_v61 = vcombine.high %v8798_v6, %v8802_v62  ;;  %v8926_v26 = vcombine.low %v8670_v19, %v8674_v20 }
 0x51d   : > { %5670 = vmatpush1.bf16.msra.mxu0 %v8468_v9  ;;  %v2073_v9 = vld [vmem:[%s12864_s7 + $0x3d8] sm:$0xff] }
 0x51e   : > { %5671 = vmatprep.subr.bf16.mxu0 %v8477_v47  ;;  %v8516_v47 = vcombine.low %v2065_v4, %v2069_v27  ;;  %v8525_v17 = vcombine.high %v2073_v9, %v2077_v45  ;;  %v9054_v4 = vcombine.low %v8798_v6, %v8802_v62  ;;  %v8686_v27 = vld [vmem:[%s12864_s7 + $0x1100] sm:$0xff] }
 0x51f   : > { %5711 = vmatpush1.bf16.msra.mxu1 %v8596_v53  ;;  %v2201_v53 = vld [vmem:[%s12864_s7 + $0x7d8] sm:$0xff]  ;;  %v8842_v6 = vld [vmem:[%s12864_s7 + $0x15e0] sm:$0xff] }
 0x520   : > { %5712 = vmatprep.subr.bf16.mxu1 %v8605_v16  ;;  %v8644_v16 = vcombine.low %v2193_v33, %v2197_v34  ;;  %v8653_v1 = vcombine.high %v2201_v53, %v2205_v54  ;;  %v8814_v34 = vld [vmem:[%s12864_s7 + $0x1500] sm:$0xff] }
 0x521   : > { %5672 = vmatpush1.bf16.msra.mxu0 %v8476_v0  ;;  %v8654_v0 = vld [vmem:[%s12864_s7 + $0x1000] sm:$0xff] }
 0x522   : > { %5673 = vmatprep.subr.bf16.mxu0 %v8485_v2  ;;  %v8524_v2 = vcombine.low %v2073_v9, %v2077_v45  ;;  %v8911_v51 = vcombine.high %v8654_v0, %v8658_v49  ;;  %v8694_v45 = vld [vmem:[%s12864_s7 + $0x1140] sm:$0xff] }
 0x523   : > { %5713 = vmatpush1.bf16.msra.mxu1 %v8604_v3  ;;  %v8782_v3 = vld [vmem:[%s12864_s7 + $0x1400] sm:$0xff] }
 0x524   : > { %5714 = vmatprep.subr.bf16.mxu1 %v8613_v52  ;;  %v8652_v52 = vcombine.low %v2201_v53, %v2205_v54  ;;  %v9039_v7 = vcombine.high %v8782_v3, %v8786_v5  ;;  %v8822_v54 = vld [vmem:[%s12864_s7 + $0x1540] sm:$0xff] }
 0x525   : > { %5674 = vmatpush1.bf16.msra.mxu0 %v8484_v55  ;;  %v8662_v55 = vld [vmem:[%s12864_s7 + $0x1040] sm:$0xff] }
 0x526   : > { %5675 = vmatprep.subr.bf16.mxu0 %v8493_v8  ;;  %v8910_v8 = vcombine.low %v8654_v0, %v8658_v49  ;;  %v8919_v13 = vcombine.high %v8662_v55, %v8666_v56  ;;  %v8702_v49 = vld [vmem:[%s12864_s7 + $0x1180] sm:$0xff] }
 0x527   : > { %5715 = vmatpush1.bf16.msra.mxu1 %v8612_v10  ;;  %v8790_v10 = vld [vmem:[%s12864_s7 + $0x1440] sm:$0xff] }
 0x528   : > { %5716 = vmatprep.subr.bf16.mxu1 %v8621_v15  ;;  %v9038_v15 = vcombine.low %v8782_v3, %v8786_v5  ;;  %v8830_v5 = vld [vmem:[%s12864_s7 + $0x1580] sm:$0xff] }
 0x529   : > { %5676 = vmatpush1.bf16.msra.mxu0 %v8492_v18  ;;  %v12014_v18 = vrot.slane %v10561_v48, 1  ;;  %v8918_v48 = vcombine.low %v8662_v55, %v8666_v56 }
 0x52a   : > { %5677 = vmatprep.subr.bf16.mxu0 %v8501_v21  ;;  %v9047_v21 = vcombine.high %v8790_v10, %v8794_v11 }
 0x52b   : > { %5717 = vmatpush1.bf16.msra.mxu1 %v8620_v57  ;;  %v12025_v57 = vrot.slane %v10566_v60, 1  ;;  %v8678_v60 = vld [vmem:[%s12864_s7 + $0x10c0] sm:$0xff] }
 0x52c   : > { %5718 = vmatprep.subr.bf16.mxu1 %v8629_v32  ;;  %v9046_v32 = vcombine.low %v8790_v10, %v8794_v11 }
 0x52d   : > { %5678 = vmatpush1.bf16.msra.mxu0 %v8500_v12  ;;  %v8682_v12 = vld [vmem:[%s12864_s7 + $0x10e0] sm:$0xff] }
 0x52e   : > { %5679 = vmatprep.subr.bf16.mxu0 %v8509_v36  ;;  %v8810_v36 = vld [vmem:[%s12864_s7 + $0x14e0] sm:$0xff]  ;;  %v8934_v33 = vcombine.low %v8678_v60, %v8682_v12 }
 0x52f   : > { %5719 = vmatpush1.bf16.msra.mxu1 %v8628_v37  ;;  %v8935_v37 = vcombine.high %v8678_v60, %v8682_v12 }
 0x530   : > { %5720 = vmatprep.subr.bf16.mxu1 %v8637_v28  ;;  %v8690_v28 = vld [vmem:[%s12864_s7 + $0x1120] sm:$0xff] }
 0x531   : > { %5680 = vmatpush1.bf16.msra.mxu0 %v8508_v29  ;;  %v8942_v53 = vcombine.low %v8686_v27, %v8690_v28 }
 0x532   : > { %5681 = vmatprep.subr.bf16.mxu0 %v8517_v35  ;;  %v8818_v35 = vld [vmem:[%s12864_s7 + $0x1520] sm:$0xff] }
 0x533   : > { %5721 = vmatpush1.bf16.msra.mxu1 %v8636_v42  ;;  %v8943_v42 = vcombine.high %v8686_v27, %v8690_v28  ;;  %v9070_v0 = vcombine.low %v8814_v34, %v8818_v35  ;;  %v8850_v27 = vld [vmem:[%s12864_s7 + $0x1620] sm:$0xff] }
 0x534   : > { %5722 = vmatprep.subr.bf16.mxu1 %v8645_v46  ;;  %v8698_v46 = vld [vmem:[%s12864_s7 + $0x1160] sm:$0xff] }
 0x535   : > { %5682 = vmatpush1.bf16.msra.mxu0 %v8516_v47  ;;  %v9071_v47 = vcombine.high %v8814_v34, %v8818_v35  ;;  %v8950_v3 = vcombine.low %v8694_v45, %v8698_v46  ;;  %v8730_v34 = vld [vmem:[%s12864_s7 + $0x1260] sm:$0xff] }
 0x536   : > { %5683 = vmatprep.subr.bf16.mxu0 %v8525_v17  ;;  %v8826_v17 = vld [vmem:[%s12864_s7 + $0x1560] sm:$0xff] }
 0x537   : > { %5723 = vmatpush1.bf16.msra.mxu1 %v8644_v16  ;;  %v8951_v16 = vcombine.high %v8694_v45, %v8698_v46  ;;  %v9078_v56 = vcombine.low %v8822_v54, %v8826_v17  ;;  %v8858_v45 = vld [vmem:[%s12864_s7 + $0x1660] sm:$0xff] }
 0x538   : > { %5724 = vmatprep.subr.bf16.mxu1 %v8653_v1  ;;  %v8706_v1 = vld [vmem:[%s12864_s7 + $0x11a0] sm:$0xff] }
 0x539   : > { %5684 = vmatpush1.bf16.msra.mxu0 %v8524_v2  ;;  %v9079_v2 = vcombine.high %v8822_v54, %v8826_v17  ;;  %v8738_v54 = vld [vmem:[%s12864_s7 + $0x12a0] sm:$0xff] }
 0x53a   : > { %7280 = vmatprep.subr.bf16.mxu0 %v8911_v51  ;;  %v8834_v51 = vld [vmem:[%s12864_s7 + $0x15a0] sm:$0xff] }
 0x53b   : > { %5725 = vmatpush1.bf16.msra.mxu1 %v8652_v52  ;;  %v8959_v52 = vcombine.high %v8702_v49, %v8706_v1  ;;  %v9086_v12 = vcombine.low %v8830_v5, %v8834_v51 }
 0x53c   : > { %5686 = vmatmul.mubr.bf16.vlgmr.msra.gmra.mrb[36].mxu0 %v11407_v58  ;;  %7321 = vmatprep.subr.bf16.mxu1 %v9039_v7  ;;  %v8927_v58 = vcombine.high %v8670_v19, %v8674_v20  ;;  %v8710_v7 = vld [vmem:[%s12864_s7 + $0x11c0] sm:$0xff] }
 0x53d   : > { %7281 = vmatpush1.bf16.msra.mxu0 %v8910_v8  ;;  %7312 = vmatprep.mubr.bf16.mxu0 %v12014_v18  ;;  %v8714_v8 = vld [vmem:[%s12864_s7 + $0x11e0] sm:$0xff] }
 0x53e   : > { %5727 = vmatmul.mubr.bf16.vlgmr.msra.gmra.mrb[36].mxu1 %v11418_v59  ;;  %7282 = vmatprep.subr.bf16.mxu0 %v8919_v13  ;;  %v8806_v59 = vld [vmem:[%s12864_s7 + $0x14c0] sm:$0xff]  ;;  %v9087_v13 = vcombine.high %v8830_v5, %v8834_v51 }
 0x53f   : > { %7322 = vmatpush1.bf16.msra.mxu1 %v9038_v15  ;;  %7353 = vmatprep.mubr.bf16.mxu1 %v12025_v57  ;;  %v9063_v29 = vcombine.high %v8806_v59, %v8810_v36  ;;  %v9062_v9 = vcombine.low %v8806_v59, %v8810_v36  ;;  %v8746_v5 = vld [vmem:[%s12864_s7 + $0x12e0] sm:$0xff] }
 0x540   : > { %7323 = vmatprep.subr.bf16.mxu1 %v9047_v21  ;;  %v8958_v21 = vcombine.low %v8702_v49, %v8706_v1  ;;  %v8866_v49 = vld [vmem:[%s12864_s7 + $0x16a0] sm:$0xff] }
 0x541   : > { %7283 = vmatpush1.bf16.msra.mxu0 %v8918_v48  ;;  %v8838_v48 = vld [vmem:[%s12864_s7 + $0x15c0] sm:$0xff] }
 0x542   : > { %7284 = vmatprep.subr.bf16.mxu0 %v8927_v58  ;;  %v9095_v36 = vcombine.high %v8838_v48, %v8842_v6 }
 0x543   : > { %7324 = vmatpush1.bf16.msra.mxu1 %v9046_v32  ;;  %v8967_v32 = vcombine.high %v8710_v7, %v8714_v8 }
 0x544   : > { %7325 = vmatprep.subr.bf16.mxu1 %v9055_v61  ;;  %v8718_v61 = vld [vmem:[%s12864_s7 + $0x1200] sm:$0xff] }
 0x545   : > { %7285 = vmatpush1.bf16.msra.mxu0 %v8926_v26  ;;  %v8722_v26 = vld [vmem:[%s12864_s7 + $0x1220] sm:$0xff] }
 0x546   : > { %7286 = vmatprep.subr.bf16.mxu0 %v8935_v37  ;;  %v8966_v37 = vcombine.low %v8710_v7, %v8714_v8  ;;  %v8975_v28 = vcombine.high %v8718_v61, %v8722_v26 }
 0x547   : > { %7326 = vmatpush1.bf16.msra.mxu1 %v9054_v4  ;;  %v8846_v4 = vld [vmem:[%s12864_s7 + $0x1600] sm:$0xff] }
 0x548   : > { %7327 = vmatprep.subr.bf16.mxu1 %v9063_v29  ;;  %v9094_v29 = vcombine.low %v8838_v48, %v8842_v6  ;;  %v9103_v35 = vcombine.high %v8846_v4, %v8850_v27  ;;  %v8758_v6 = vld [vmem:[%s12864_s7 + $0x1340] sm:$0xff] }
 0x549   : > { %7287 = vmatpush1.bf16.msra.mxu0 %v8934_v33  ;;  %v8726_v33 = vld [vmem:[%s12864_s7 + $0x1240] sm:$0xff] }
 0x54a   : > { %7288 = vmatprep.subr.bf16.mxu0 %v8943_v42  ;;  %v8974_v42 = vcombine.low %v8718_v61, %v8722_v26  ;;  %v8983_v46 = vcombine.high %v8726_v33, %v8730_v34 }
 0x54b   : > { %7328 = vmatpush1.bf16.msra.mxu1 %v9062_v9  ;;  %v8854_v9 = vld [vmem:[%s12864_s7 + $0x1640] sm:$0xff] }
 0x54c   : > { %7329 = vmatprep.subr.bf16.mxu1 %v9071_v47  ;;  %v9102_v47 = vcombine.low %v8846_v4, %v8850_v27  ;;  %v9111_v17 = vcombine.high %v8854_v9, %v8858_v45  ;;  %v8894_v27 = vld [vmem:[%s12864_s7 + $0x1780] sm:$0xff] }
 0x54d   : > { %7289 = vmatpush1.bf16.msra.mxu0 %v8942_v53  ;;  %v8734_v53 = vld [vmem:[%s12864_s7 + $0x1280] sm:$0xff] }
 0x54e   : > { %7290 = vmatprep.subr.bf16.mxu0 %v8951_v16  ;;  %v8982_v16 = vcombine.low %v8726_v33, %v8730_v34  ;;  %v8991_v1 = vcombine.high %v8734_v53, %v8738_v54  ;;  %v8774_v34 = vld [vmem:[%s12864_s7 + $0x13c0] sm:$0xff] }
 0x54f   : > { %7330 = vmatpush1.bf16.msra.mxu1 %v9070_v0  ;;  %v5441_v55 = vpop.f32.mrb[24].mxu0  ;;  %v8862_v0 = vld [vmem:[%s12864_s7 + $0x1680] sm:$0xff] }
 0x550   : > { %v5442_v10 = vadd.f32 %v5441_v55, %v11281_v30  ;;  %v5443_v11 = vpop.f32.mrb[25].mxu0  ;;  %7331 = vmatprep.subr.bf16.mxu1 %v9079_v2  ;;  %v9110_v2 = vcombine.low %v8854_v9, %v8858_v45  ;;  %v9119_v51 = vcombine.high %v8862_v0, %v8866_v49  ;;  %v8870_v55 = vld [vmem:[%s12864_s7 + $0x16c0] sm:$0xff]  ;;  %v9118_v8 = vcombine.low %v8862_v0, %v8866_v49  ;;  %v8783_v49 = vld [vmem:[%s12864_s7 + $0x1408] sm:$0xff] }
 0x551   : > { %v5482_v15 = vpop.f32.mrb[24].mxu1  ;;  %v5444_v19 = vadd.f32 %v5443_v11, %v11283_v38  ;;  %v5445_v20 = vpop.f32.mrb[26].mxu0  ;;  %7291 = vmatpush1.bf16.msra.mxu0 %v8950_v3  ;;  %v8742_v3 = vld [vmem:[%s12864_s7 + $0x12c0] sm:$0xff] }
 0x552   : > { %v12097_v62 = vadd.f32 %v5482_v15, %v5442_v10  ;;  %v5484_v30 = vpop.f32.mrb[25].mxu1  ;;  %v5446_v58 = vpop.f32.mrb[27].mxu0  ;;  %7292 = vmatprep.subr.bf16.mxu0 %v8959_v52  ;;  %v8990_v52 = vcombine.low %v8734_v53, %v8738_v54  ;;  %v8999_v7 = vcombine.high %v8742_v3, %v8746_v5  ;;  %v8750_v10 = vld [vmem:[%s12864_s7 + $0x1300] sm:$0xff]  ;;  %v8998_v15 = vcombine.low %v8742_v3, %v8746_v5  ;;  %v8655_v54 = vld [vmem:[%s12864_s7 + $0x1008] sm:$0xff] }
 0x553   : > { %v12099_v60 = vadd.f32 %v5484_v30, %v5444_v19  ;;  %v5486_v38 = vpop.f32.mrb[26].mxu1  ;;  %7332 = vmatpush1.bf16.msra.mxu1 %v9078_v56  ;;  %v8874_v56 = vld [vmem:[%s12864_s7 + $0x16e0] sm:$0xff]  ;;  %v8663_v5 = vld [vmem:[%s12864_s7 + $0x1048] sm:$0xff] }
 0x554   : > { %v5487_v59 = vpop.f32.mrb[27].mxu1  ;;  %7333 = vmatprep.subr.bf16.mxu1 %v9087_v13  ;;  %v8754_v11 = vld [vmem:[%s12864_s7 + $0x1320] sm:$0xff]  ;;  %v9127_v13 = vcombine.high %v8870_v55, %v8874_v56  ;;  %v9126_v48 = vcombine.low %v8870_v55, %v8874_v56  ;;  %v8791_v56 = vld [vmem:[%s12864_s7 + $0x1448] sm:$0xff] }
 0x555   : > { %7293 = vmatpush1.bf16.msra.mxu0 %v8958_v21  ;;  %v8878_v19 = vld [vmem:[%s12864_s7 + $0x1700] sm:$0xff]  ;;  %v9007_v21 = vcombine.high %v8750_v10, %v8754_v11 }
 0x556   : > { %7294 = vmatprep.subr.bf16.mxu0 %v8967_v32  ;;  %v8882_v20 = vld [vmem:[%s12864_s7 + $0x1720] sm:$0xff]  ;;  %v9006_v32 = vcombine.low %v8750_v10, %v8754_v11 }
 0x557   : > { %7334 = vmatpush1.bf16.msra.mxu1 %v9086_v12  ;;  %v8762_v30 = vld [vmem:[%s12864_s7 + $0x1360] sm:$0xff]  ;;  %v9135_v58 = vcombine.high %v8878_v19, %v8882_v20  ;;  %v9134_v26 = vcombine.low %v8878_v19, %v8882_v20  ;;  %v12232_v19 = vrot.slane %v10569_v14, 1 }
 0x558   : > { %7335 = vmatprep.subr.bf16.mxu1 %v9095_v36  ;;  %v8886_v38 = vld [vmem:[%s12864_s7 + $0x1740] sm:$0xff]  ;;  %v9015_v61 = vcombine.high %v8758_v6, %v8762_v30  ;;  %v9014_v4 = vcombine.low %v8758_v6, %v8762_v30  ;;  %v8679_v30 = vld [vmem:[%s12864_s7 + $0x10c8] sm:$0xff] }
 0x559   : > { %7295 = vmatpush1.bf16.msra.mxu0 %v8966_v37  ;;  %v8890_v12 = vld [vmem:[%s12864_s7 + $0x1760] sm:$0xff] }
 0x55a   : > { %7296 = vmatprep.subr.bf16.mxu0 %v8975_v28  ;;  %v8766_v59 = vld [vmem:[%s12864_s7 + $0x1380] sm:$0xff]  ;;  %v9143_v37 = vcombine.high %v8886_v38, %v8890_v12  ;;  %v9142_v33 = vcombine.low %v8886_v38, %v8890_v12  ;;  %v8807_v12 = vld [vmem:[%s12864_s7 + $0x14c8] sm:$0xff] }
 0x55b   : > { %7336 = vmatpush1.bf16.msra.mxu1 %v9094_v29  ;;  %v8770_v36 = vld [vmem:[%s12864_s7 + $0x13a0] sm:$0xff] }
 0x55c   : > { %7337 = vmatprep.subr.bf16.mxu1 %v9103_v35  ;;  %v8898_v28 = vld [vmem:[%s12864_s7 + $0x17a0] sm:$0xff]  ;;  %v9023_v29 = vcombine.high %v8766_v59, %v8770_v36  ;;  %v9022_v9 = vcombine.low %v8766_v59, %v8770_v36  ;;  %v8687_v36 = vld [vmem:[%s12864_s7 + $0x1108] sm:$0xff] }
 0x55d   : > { %7297 = vmatpush1.bf16.msra.mxu0 %v8974_v42  ;;  %v8778_v35 = vld [vmem:[%s12864_s7 + $0x13e0] sm:$0xff]  ;;  %v9151_v42 = vcombine.high %v8894_v27, %v8898_v28  ;;  %v9150_v53 = vcombine.low %v8894_v27, %v8898_v28  ;;  %v8815_v28 = vld [vmem:[%s12864_s7 + $0x1508] sm:$0xff] }
 0x55e   : > { %7298 = vmatprep.subr.bf16.mxu0 %v8983_v46  ;;  %v8902_v45 = vld [vmem:[%s12864_s7 + $0x17c0] sm:$0xff]  ;;  %v9030_v0 = vcombine.low %v8774_v34, %v8778_v35 }
 0x55f   : > { %7338 = vmatpush1.bf16.msra.mxu1 %v9102_v47  ;;  %v8906_v46 = vld [vmem:[%s12864_s7 + $0x17e0] sm:$0xff]  ;;  %v9031_v47 = vcombine.high %v8774_v34, %v8778_v35  ;;  %v8695_v35 = vld [vmem:[%s12864_s7 + $0x1148] sm:$0xff] }
 0x560   : > { %7339 = vmatprep.subr.bf16.mxu1 %v9111_v17  ;;  %v8659_v17 = vld [vmem:[%s12864_s7 + $0x1028] sm:$0xff]  ;;  %v9158_v3 = vcombine.low %v8902_v45, %v8906_v46 }
 0x561   : > { %7299 = vmatpush1.bf16.msra.mxu0 %v8982_v16  ;;  %v9159_v16 = vcombine.high %v8902_v45, %v8906_v46  ;;  %v8912_v55 = vcombine.low %v8655_v54, %v8659_v17  ;;  %v8823_v46 = vld [vmem:[%s12864_s7 + $0x1548] sm:$0xff] }
 0x562   : > { %7300 = vmatprep.subr.bf16.mxu0 %v8991_v1  ;;  %v8787_v1 = vld [vmem:[%s12864_s7 + $0x1428] sm:$0xff] }
 0x563   : > { %7340 = vmatpush1.bf16.msra.mxu1 %v9110_v2  ;;  %v8913_v2 = vcombine.high %v8655_v54, %v8659_v17  ;;  %v9040_v11 = vcombine.low %v8783_v49, %v8787_v1  ;;  %v8703_v17 = vld [vmem:[%s12864_s7 + $0x1188] sm:$0xff] }
 0x564   : > { %7341 = vmatprep.subr.bf16.mxu1 %v9119_v51  ;;  %v8667_v51 = vld [vmem:[%s12864_s7 + $0x1068] sm:$0xff] }
 0x565   : > { %7301 = vmatpush1.bf16.msra.mxu0 %v8990_v52  ;;  %v9041_v52 = vcombine.high %v8783_v49, %v8787_v1  ;;  %v8921_v10 = vcombine.high %v8663_v5, %v8667_v51  ;;  %v8920_v20 = vcombine.low %v8663_v5, %v8667_v51  ;;  %v8831_v1 = vld [vmem:[%s12864_s7 + $0x1588] sm:$0xff] }
 0x566   : > { %7302 = vmatprep.subr.bf16.mxu0 %v8999_v7  ;;  %v8795_v7 = vld [vmem:[%s12864_s7 + $0x1468] sm:$0xff] }
 0x567   : > { %7342 = vmatpush1.bf16.msra.mxu1 %v9118_v8  ;;  %v12222_v8 = vrot.slane %v10563_v50, 1  ;;  %v9049_v50 = vcombine.high %v8791_v56, %v8795_v7  ;;  %v9048_v14 = vcombine.low %v8791_v56, %v8795_v7 }
 0x568   : > { %7343 = vmatprep.subr.bf16.mxu1 %v9127_v13  ;;  %v8671_v13 = vld [vmem:[%s12864_s7 + $0x1088] sm:$0xff] }
 0x569   : > { %7303 = vmatpush1.bf16.msra.mxu0 %v8998_v15  ;;  %v8675_v15 = vld [vmem:[%s12864_s7 + $0x10a8] sm:$0xff] }
 0x56a   : > { %7304 = vmatprep.subr.bf16.mxu0 %v9007_v21  ;;  %v8799_v21 = vld [vmem:[%s12864_s7 + $0x1488] sm:$0xff]  ;;  %v8929_v6 = vcombine.high %v8671_v13, %v8675_v15  ;;  %v8928_v38 = vcombine.low %v8671_v13, %v8675_v15 }
 0x56b   : > { %7344 = vmatpush1.bf16.msra.mxu1 %v9126_v48  ;;  %v8803_v48 = vld [vmem:[%s12864_s7 + $0x14a8] sm:$0xff] }
 0x56c   : > { %7345 = vmatprep.subr.bf16.mxu1 %v9135_v58  ;;  %v8683_v58 = vld [vmem:[%s12864_s7 + $0x10e8] sm:$0xff]  ;;  %v9056_v59 = vcombine.low %v8799_v21, %v8803_v48 }
 0x56d   : > { %7305 = vmatpush1.bf16.msra.mxu0 %v9006_v32  ;;  %v9057_v32 = vcombine.high %v8799_v21, %v8803_v48  ;;  %v8936_v27 = vcombine.low %v8679_v30, %v8683_v58  ;;  %v8843_v21 = vld [vmem:[%s12864_s7 + $0x15e8] sm:$0xff] }
 0x56e   : > { %7306 = vmatprep.subr.bf16.mxu0 %v9015_v61  ;;  %v8811_v61 = vld [vmem:[%s12864_s7 + $0x14e8] sm:$0xff] }
 0x56f   : > { %7346 = vmatpush1.bf16.msra.mxu1 %v9134_v26  ;;  %v8937_v26 = vcombine.high %v8679_v30, %v8683_v58  ;;  %v9064_v34 = vcombine.low %v8807_v12, %v8811_v61 }
 0x570   : > { %7347 = vmatprep.subr.bf16.mxu1 %v9143_v37  ;;  %v8691_v37 = vld [vmem:[%s12864_s7 + $0x1128] sm:$0xff] }
 0x571   : > { %7307 = vmatpush1.bf16.msra.mxu0 %v9014_v4  ;;  %v9065_v4 = vcombine.high %v8807_v12, %v8811_v61  ;;  %v8944_v45 = vcombine.low %v8687_v36, %v8691_v37 }
 0x572   : > { %7308 = vmatprep.subr.bf16.mxu0 %v9023_v29  ;;  %v8819_v29 = vld [vmem:[%s12864_s7 + $0x1528] sm:$0xff] }
 0x573   : > { %7348 = vmatpush1.bf16.msra.mxu1 %v9142_v33  ;;  %v8945_v33 = vcombine.high %v8687_v36, %v8691_v37  ;;  %v9072_v54 = vcombine.low %v8815_v28, %v8819_v29  ;;  %v8851_v36 = vld [vmem:[%s12864_s7 + $0x1628] sm:$0xff] }
 0x574   : > { %7349 = vmatprep.subr.bf16.mxu1 %v9151_v42  ;;  %v8699_v42 = vld [vmem:[%s12864_s7 + $0x1168] sm:$0xff] }
 0x575   : > { %7309 = vmatpush1.bf16.msra.mxu0 %v9022_v9  ;;  %v9073_v9 = vcombine.high %v8815_v28, %v8819_v29  ;;  %v8952_v49 = vcombine.low %v8695_v35, %v8699_v42  ;;  %v8731_v28 = vld [vmem:[%s12864_s7 + $0x1268] sm:$0xff] }
 0x576   : > { %7310 = vmatprep.subr.bf16.mxu0 %v9031_v47  ;;  %v8827_v47 = vld [vmem:[%s12864_s7 + $0x1568] sm:$0xff] }
 0x577   : > { %7350 = vmatpush1.bf16.msra.mxu1 %v9150_v53  ;;  %v8953_v53 = vcombine.high %v8695_v35, %v8699_v42  ;;  %v9080_v51 = vcombine.low %v8823_v46, %v8827_v47  ;;  %v8859_v35 = vld [vmem:[%s12864_s7 + $0x1668] sm:$0xff] }
 0x578   : > { %7351 = vmatprep.subr.bf16.mxu1 %v9159_v16  ;;  %v8707_v16 = vld [vmem:[%s12864_s7 + $0x11a8] sm:$0xff] }
 0x579   : > { %7311 = vmatpush1.bf16.msra.mxu0 %v9030_v0  ;;  %v9081_v0 = vcombine.high %v8823_v46, %v8827_v47  ;;  %v8739_v46 = vld [vmem:[%s12864_s7 + $0x12a8] sm:$0xff] }
 0x57a   : > { %7362 = vmatprep.subr.bf16.mxu0 %v8913_v2  ;;  %v8835_v2 = vld [vmem:[%s12864_s7 + $0x15a8] sm:$0xff] }
 0x57b   : > { %7352 = vmatpush1.bf16.msra.mxu1 %v9158_v3  ;;  %v8961_v3 = vcombine.high %v8703_v17, %v8707_v16  ;;  %v9088_v58 = vcombine.low %v8831_v1, %v8835_v2 }
 0x57c   : > { %7313 = vmatmul.mubr.bf16.vlgmr.msra.gmra.mrb[40].mxu0 %v12222_v8  ;;  %7403 = vmatprep.subr.bf16.mxu1 %v9041_v52  ;;  %v8711_v52 = vld [vmem:[%s12864_s7 + $0x11c8] sm:$0xff] }
 0x57d   : > { %7363 = vmatpush1.bf16.msra.mxu0 %v8912_v55  ;;  %7394 = vmatprep.mubr.bf16.mxu0 %v12014_v18  ;;  %v8715_v55 = vld [vmem:[%s12864_s7 + $0x11e8] sm:$0xff] }
 0x57e   : > { %7354 = vmatmul.mubr.bf16.vlgmr.msra.gmra.mrb[40].mxu1 %v12232_v19  ;;  %7364 = vmatprep.subr.bf16.mxu0 %v8921_v10  ;;  %v9089_v10 = vcombine.high %v8831_v1, %v8835_v2  ;;  %v8747_v1 = vld [vmem:[%s12864_s7 + $0x12e8] sm:$0xff] }
 0x57f   : > { %7404 = vmatpush1.bf16.msra.mxu1 %v9040_v11  ;;  %7435 = vmatprep.mubr.bf16.mxu1 %v12025_v57 }
 0x580   : > { %7405 = vmatprep.subr.bf16.mxu1 %v9049_v50  ;;  %v8960_v50 = vcombine.low %v8703_v17, %v8707_v16  ;;  %v8867_v17 = vld [vmem:[%s12864_s7 + $0x16a8] sm:$0xff] }
 0x581   : > { %7365 = vmatpush1.bf16.msra.mxu0 %v8920_v20  ;;  %v8839_v20 = vld [vmem:[%s12864_s7 + $0x15c8] sm:$0xff] }
 0x582   : > { %7366 = vmatprep.subr.bf16.mxu0 %v8929_v6  ;;  %v9097_v61 = vcombine.high %v8839_v20, %v8843_v21 }
 0x583   : > { %7406 = vmatpush1.bf16.msra.mxu1 %v9048_v14  ;;  %v8969_v14 = vcombine.high %v8711_v52, %v8715_v55 }
 0x584   : > { %7407 = vmatprep.subr.bf16.mxu1 %v9057_v32  ;;  %v8719_v32 = vld [vmem:[%s12864_s7 + $0x1208] sm:$0xff] }
 0x585   : > { %7367 = vmatpush1.bf16.msra.mxu0 %v8928_v38  ;;  %v8723_v38 = vld [vmem:[%s12864_s7 + $0x1228] sm:$0xff] }
 0x586   : > { %7368 = vmatprep.subr.bf16.mxu0 %v8937_v26  ;;  %v8968_v26 = vcombine.low %v8711_v52, %v8715_v55  ;;  %v8977_v37 = vcombine.high %v8719_v32, %v8723_v38 }
 0x587   : > { %7408 = vmatpush1.bf16.msra.mxu1 %v9056_v59  ;;  %v8847_v59 = vld [vmem:[%s12864_s7 + $0x1608] sm:$0xff] }
 0x588   : > { %7409 = vmatprep.subr.bf16.mxu1 %v9065_v4  ;;  %v9096_v4 = vcombine.low %v8839_v20, %v8843_v21  ;;  %v9105_v29 = vcombine.high %v8847_v59, %v8851_v36  ;;  %v8759_v21 = vld [vmem:[%s12864_s7 + $0x1348] sm:$0xff] }
 0x589   : > { %7369 = vmatpush1.bf16.msra.mxu0 %v8936_v27  ;;  %v8727_v27 = vld [vmem:[%s12864_s7 + $0x1248] sm:$0xff] }
 0x58a   : > { %7370 = vmatprep.subr.bf16.mxu0 %v8945_v33  ;;  %v8976_v33 = vcombine.low %v8719_v32, %v8723_v38  ;;  %v8985_v42 = vcombine.high %v8727_v27, %v8731_v28 }
 0x58b   : > { %7410 = vmatpush1.bf16.msra.mxu1 %v9064_v34  ;;  %v8855_v34 = vld [vmem:[%s12864_s7 + $0x1648] sm:$0xff] }
 0x58c   : > { %7411 = vmatprep.subr.bf16.mxu1 %v9073_v9  ;;  %v9104_v9 = vcombine.low %v8847_v59, %v8851_v36  ;;  %v9113_v47 = vcombine.high %v8855_v34, %v8859_v35  ;;  %v8895_v36 = vld [vmem:[%s12864_s7 + $0x1788] sm:$0xff] }
 0x58d   : > { %7371 = vmatpush1.bf16.msra.mxu0 %v8944_v45  ;;  %v8735_v45 = vld [vmem:[%s12864_s7 + $0x1288] sm:$0xff] }
 0x58e   : > { %7372 = vmatprep.subr.bf16.mxu0 %v8953_v53  ;;  %v8984_v53 = vcombine.low %v8727_v27, %v8731_v28  ;;  %v8993_v16 = vcombine.high %v8735_v45, %v8739_v46  ;;  %v8775_v28 = vld [vmem:[%s12864_s7 + $0x13c8] sm:$0xff] }
 0x58f   : > { %7412 = vmatpush1.bf16.msra.mxu1 %v9072_v54  ;;  %v5523_v5 = vpop.f32.mrb[28].mxu0  ;;  %v8863_v54 = vld [vmem:[%s12864_s7 + $0x1688] sm:$0xff] }
 0x590   : > { %v5524_v56 = vadd.f32 %v5523_v5, %v11489_v25  ;;  %v5525_v7 = vpop.f32.mrb[29].mxu0  ;;  %7413 = vmatprep.subr.bf16.mxu1 %v9081_v0  ;;  %v9112_v0 = vcombine.low %v8855_v34, %v8859_v35  ;;  %v9121_v2 = vcombine.high %v8863_v54, %v8867_v17  ;;  %v8871_v5 = vld [vmem:[%s12864_s7 + $0x16c8] sm:$0xff]  ;;  %v9120_v55 = vcombine.low %v8863_v54, %v8867_v17  ;;  %v8784_v17 = vld [vmem:[%s12864_s7 + $0x1410] sm:$0xff] }
 0x591   : > { %v5564_v11 = vpop.f32.mrb[28].mxu1  ;;  %v5526_v13 = vadd.f32 %v5525_v7, %v11491_v63  ;;  %v5527_v15 = vpop.f32.mrb[30].mxu0  ;;  %7373 = vmatpush1.bf16.msra.mxu0 %v8952_v49  ;;  %v8743_v49 = vld [vmem:[%s12864_s7 + $0x12c8] sm:$0xff] }
 0x592   : > { %v12305_v48 = vadd.f32 %v5564_v11, %v5524_v56  ;;  %v5566_v25 = vpop.f32.mrb[29].mxu1  ;;  %v5528_v6 = vpop.f32.mrb[31].mxu0  ;;  %7374 = vmatprep.subr.bf16.mxu0 %v8961_v3  ;;  %v8992_v3 = vcombine.low %v8735_v45, %v8739_v46  ;;  %v9001_v52 = vcombine.high %v8743_v49, %v8747_v1  ;;  %v8751_v56 = vld [vmem:[%s12864_s7 + $0x1308] sm:$0xff]  ;;  %v9000_v11 = vcombine.low %v8743_v49, %v8747_v1  ;;  %v8656_v46 = vld [vmem:[%s12864_s7 + $0x1010] sm:$0xff] }
 0x593   : > { %v12307_v30 = vadd.f32 %v5566_v25, %v5526_v13  ;;  %v5568_v63 = vpop.f32.mrb[30].mxu1  ;;  %7414 = vmatpush1.bf16.msra.mxu1 %v9080_v51  ;;  %v8875_v51 = vld [vmem:[%s12864_s7 + $0x16e8] sm:$0xff]  ;;  %v8664_v1 = vld [vmem:[%s12864_s7 + $0x1050] sm:$0xff] }
 0x594   : > { %v5569_v12 = vpop.f32.mrb[31].mxu1  ;;  %7415 = vmatprep.subr.bf16.mxu1 %v9089_v10  ;;  %v8755_v7 = vld [vmem:[%s12864_s7 + $0x1328] sm:$0xff]  ;;  %v9129_v10 = vcombine.high %v8871_v5, %v8875_v51  ;;  %v9128_v20 = vcombine.low %v8871_v5, %v8875_v51  ;;  %v8792_v51 = vld [vmem:[%s12864_s7 + $0x1450] sm:$0xff] }
 0x595   : > { %7375 = vmatpush1.bf16.msra.mxu0 %v8960_v50  ;;  %v8879_v13 = vld [vmem:[%s12864_s7 + $0x1708] sm:$0xff]  ;;  %v9009_v50 = vcombine.high %v8751_v56, %v8755_v7 }
 0x596   : > { %7376 = vmatprep.subr.bf16.mxu0 %v8969_v14  ;;  %v8883_v15 = vld [vmem:[%s12864_s7 + $0x1728] sm:$0xff]  ;;  %v9008_v14 = vcombine.low %v8751_v56, %v8755_v7  ;;  %v8672_v7 = vld [vmem:[%s12864_s7 + $0x1090] sm:$0xff] }
 0x597   : > { %7416 = vmatpush1.bf16.msra.mxu1 %v9088_v58  ;;  %v8763_v25 = vld [vmem:[%s12864_s7 + $0x1368] sm:$0xff]  ;;  %v9137_v6 = vcombine.high %v8879_v13, %v8883_v15  ;;  %v9136_v38 = vcombine.low %v8879_v13, %v8883_v15  ;;  %v8800_v15 = vld [vmem:[%s12864_s7 + $0x1490] sm:$0xff] }
 0x598   : > { %7417 = vmatprep.subr.bf16.mxu1 %v9097_v61  ;;  %v8887_v63 = vld [vmem:[%s12864_s7 + $0x1748] sm:$0xff]  ;;  %v9017_v32 = vcombine.high %v8759_v21, %v8763_v25  ;;  %v9016_v59 = vcombine.low %v8759_v21, %v8763_v25  ;;  %v8680_v25 = vld [vmem:[%s12864_s7 + $0x10d0] sm:$0xff] }
 0x599   : > { %7377 = vmatpush1.bf16.msra.mxu0 %v8968_v26  ;;  %v8891_v58 = vld [vmem:[%s12864_s7 + $0x1768] sm:$0xff] }
 0x59a   : > { %7378 = vmatprep.subr.bf16.mxu0 %v8977_v37  ;;  %v8767_v12 = vld [vmem:[%s12864_s7 + $0x1388] sm:$0xff]  ;;  %v9145_v26 = vcombine.high %v8887_v63, %v8891_v58  ;;  %v9144_v27 = vcombine.low %v8887_v63, %v8891_v58  ;;  %v8808_v58 = vld [vmem:[%s12864_s7 + $0x14d0] sm:$0xff] }
 0x59b   : > { %7418 = vmatpush1.bf16.msra.mxu1 %v9096_v4  ;;  %v8771_v61 = vld [vmem:[%s12864_s7 + $0x13a8] sm:$0xff] }
 0x59c   : > { %7419 = vmatprep.subr.bf16.mxu1 %v9105_v29  ;;  %v8899_v37 = vld [vmem:[%s12864_s7 + $0x17a8] sm:$0xff]  ;;  %v9025_v4 = vcombine.high %v8767_v12, %v8771_v61  ;;  %v9024_v34 = vcombine.low %v8767_v12, %v8771_v61  ;;  %v8688_v61 = vld [vmem:[%s12864_s7 + $0x1110] sm:$0xff] }
 0x59d   : > { %7379 = vmatpush1.bf16.msra.mxu0 %v8976_v33  ;;  %v8779_v29 = vld [vmem:[%s12864_s7 + $0x13e8] sm:$0xff]  ;;  %v9153_v33 = vcombine.high %v8895_v36, %v8899_v37  ;;  %v9152_v45 = vcombine.low %v8895_v36, %v8899_v37  ;;  %v8816_v37 = vld [vmem:[%s12864_s7 + $0x1510] sm:$0xff] }
 0x59e   : > { %7380 = vmatprep.subr.bf16.mxu0 %v8985_v42  ;;  %v8903_v35 = vld [vmem:[%s12864_s7 + $0x17c8] sm:$0xff]  ;;  %v9032_v54 = vcombine.low %v8775_v28, %v8779_v29 }
 0x59f   : > { %7420 = vmatpush1.bf16.msra.mxu1 %v9104_v9  ;;  %v8907_v42 = vld [vmem:[%s12864_s7 + $0x17e8] sm:$0xff]  ;;  %v9033_v9 = vcombine.high %v8775_v28, %v8779_v29  ;;  %v8696_v29 = vld [vmem:[%s12864_s7 + $0x1150] sm:$0xff] }
 0x5a0   : > { %7421 = vmatprep.subr.bf16.mxu1 %v9113_v47  ;;  %v8660_v47 = vld [vmem:[%s12864_s7 + $0x1030] sm:$0xff]  ;;  %v9160_v49 = vcombine.low %v8903_v35, %v8907_v42 }
 0x5a1   : > { %7381 = vmatpush1.bf16.msra.mxu0 %v8984_v53  ;;  %v9161_v53 = vcombine.high %v8903_v35, %v8907_v42  ;;  %v8914_v5 = vcombine.low %v8656_v46, %v8660_v47  ;;  %v8824_v42 = vld [vmem:[%s12864_s7 + $0x1550] sm:$0xff] }
 0x5a2   : > { %7382 = vmatprep.subr.bf16.mxu0 %v8993_v16  ;;  %v8788_v16 = vld [vmem:[%s12864_s7 + $0x1430] sm:$0xff] }
 0x5a3   : > { %7422 = vmatpush1.bf16.msra.mxu1 %v9112_v0  ;;  %v8915_v0 = vcombine.high %v8656_v46, %v8660_v47  ;;  %v9042_v56 = vcombine.low %v8784_v17, %v8788_v16  ;;  %v8704_v47 = vld [vmem:[%s12864_s7 + $0x1190] sm:$0xff] }
 0x5a4   : > { %7423 = vmatprep.subr.bf16.mxu1 %v9121_v2  ;;  %v8668_v2 = vld [vmem:[%s12864_s7 + $0x1070] sm:$0xff] }
 0x5a5   : > { %7383 = vmatpush1.bf16.msra.mxu0 %v8992_v3  ;;  %v9043_v3 = vcombine.high %v8784_v17, %v8788_v16  ;;  %v8922_v13 = vcombine.low %v8664_v1, %v8668_v2  ;;  %v8832_v16 = vld [vmem:[%s12864_s7 + $0x1590] sm:$0xff] }
 0x5a6   : > { %7384 = vmatprep.subr.bf16.mxu0 %v9001_v52  ;;  %v8796_v52 = vld [vmem:[%s12864_s7 + $0x1470] sm:$0xff] }
 0x5a7   : > { %7424 = vmatpush1.bf16.msra.mxu1 %v9120_v55  ;;  %v8923_v55 = vcombine.high %v8664_v1, %v8668_v2  ;;  %v9050_v21 = vcombine.low %v8792_v51, %v8796_v52 }
 0x5a8   : > { %7425 = vmatprep.subr.bf16.mxu1 %v9129_v10  ;;  %v8676_v10 = vld [vmem:[%s12864_s7 + $0x10b0] sm:$0xff] }
 0x5a9   : > { %7385 = vmatpush1.bf16.msra.mxu0 %v9000_v11  ;;  %v9051_v11 = vcombine.high %v8792_v51, %v8796_v52  ;;  %v8930_v63 = vcombine.low %v8672_v7, %v8676_v10 }
 0x5aa   : > { %7386 = vmatprep.subr.bf16.mxu0 %v9009_v50  ;;  %v8804_v50 = vld [vmem:[%s12864_s7 + $0x14b0] sm:$0xff] }
 0x5ab   : > { %7426 = vmatpush1.bf16.msra.mxu1 %v9128_v20  ;;  %v8931_v20 = vcombine.high %v8672_v7, %v8676_v10  ;;  %v9058_v12 = vcombine.low %v8800_v15, %v8804_v50 }
 0x5ac   : > { %7427 = vmatprep.subr.bf16.mxu1 %v9137_v6  ;;  %v8684_v6 = vld [vmem:[%s12864_s7 + $0x10f0] sm:$0xff] }
 0x5ad   : > { %7387 = vmatpush1.bf16.msra.mxu0 %v9008_v14  ;;  %v9059_v14 = vcombine.high %v8800_v15, %v8804_v50  ;;  %v8938_v36 = vcombine.low %v8680_v25, %v8684_v6  ;;  %v8844_v15 = vld [vmem:[%s12864_s7 + $0x15f0] sm:$0xff] }
 0x5ae   : > { %7388 = vmatprep.subr.bf16.mxu0 %v9017_v32  ;;  %v8812_v32 = vld [vmem:[%s12864_s7 + $0x14f0] sm:$0xff] }
 0x5af   : > { %7428 = vmatpush1.bf16.msra.mxu1 %v9136_v38  ;;  %v8939_v38 = vcombine.high %v8680_v25, %v8684_v6  ;;  %v9066_v28 = vcombine.low %v8808_v58, %v8812_v32 }
 0x5b0   : > { %7429 = vmatprep.subr.bf16.mxu1 %v9145_v26  ;;  %v8692_v26 = vld [vmem:[%s12864_s7 + $0x1130] sm:$0xff] }
 0x5b1   : > { %7389 = vmatpush1.bf16.msra.mxu0 %v9016_v59  ;;  %v9067_v59 = vcombine.high %v8808_v58, %v8812_v32  ;;  %v8946_v35 = vcombine.low %v8688_v61, %v8692_v26 }
 0x5b2   : > { %7390 = vmatprep.subr.bf16.mxu0 %v9025_v4  ;;  %v8820_v4 = vld [vmem:[%s12864_s7 + $0x1530] sm:$0xff] }
 0x5b3   : > { %7430 = vmatpush1.bf16.msra.mxu1 %v9144_v27  ;;  %v8947_v27 = vcombine.high %v8688_v61, %v8692_v26  ;;  %v9074_v46 = vcombine.low %v8816_v37, %v8820_v4  ;;  %v8852_v61 = vld [vmem:[%s12864_s7 + $0x1630] sm:$0xff] }
 0x5b4   : > { %7431 = vmatprep.subr.bf16.mxu1 %v9153_v33  ;;  %v8700_v33 = vld [vmem:[%s12864_s7 + $0x1170] sm:$0xff] }
 0x5b5   : > { %7391 = vmatpush1.bf16.msra.mxu0 %v9024_v34  ;;  %v9075_v34 = vcombine.high %v8816_v37, %v8820_v4  ;;  %v8954_v17 = vcombine.low %v8696_v29, %v8700_v33  ;;  %v8732_v37 = vld [vmem:[%s12864_s7 + $0x1270] sm:$0xff] }
 0x5b6   : > { %7392 = vmatprep.subr.bf16.mxu0 %v9033_v9  ;;  %v8828_v9 = vld [vmem:[%s12864_s7 + $0x1570] sm:$0xff] }
 0x5b7   : > { %7432 = vmatpush1.bf16.msra.mxu1 %v9152_v45  ;;  %v8955_v45 = vcombine.high %v8696_v29, %v8700_v33  ;;  %v9082_v2 = vcombine.low %v8824_v42, %v8828_v9  ;;  %v8860_v29 = vld [vmem:[%s12864_s7 + $0x1670] sm:$0xff] }
 0x5b8   : > { %7433 = vmatprep.subr.bf16.mxu1 %v9161_v53  ;;  %v8708_v53 = vld [vmem:[%s12864_s7 + $0x11b0] sm:$0xff] }
 0x5b9   : > { %7393 = vmatpush1.bf16.msra.mxu0 %v9032_v54  ;;  %v9083_v54 = vcombine.high %v8824_v42, %v8828_v9  ;;  %v8740_v42 = vld [vmem:[%s12864_s7 + $0x12b0] sm:$0xff] }
 0x5ba   : > { %7444 = vmatprep.subr.bf16.mxu0 %v8915_v0  ;;  %v8836_v0 = vld [vmem:[%s12864_s7 + $0x15b0] sm:$0xff] }
 0x5bb   : > { %7434 = vmatpush1.bf16.msra.mxu1 %v9160_v49  ;;  %v8963_v49 = vcombine.high %v8704_v47, %v8708_v53  ;;  %v9090_v6 = vcombine.low %v8832_v16, %v8836_v0 }
 0x5bc   : > { %7395 = vmatmul.mubr.bf16.vlgmr.msra.gmra.mrb[44].mxu0 %v12222_v8  ;;  %7485 = vmatprep.subr.bf16.mxu1 %v9043_v3  ;;  %v8712_v3 = vld [vmem:[%s12864_s7 + $0x11d0] sm:$0xff] }
 0x5bd   : > { %7445 = vmatpush1.bf16.msra.mxu0 %v8914_v5  ;;  %7476 = vmatprep.mubr.bf16.mxu0 %v12014_v18  ;;  %v8716_v5 = vld [vmem:[%s12864_s7 + $0x11f0] sm:$0xff] }
 0x5be   : > { %7436 = vmatmul.mubr.bf16.vlgmr.msra.gmra.mrb[44].mxu1 %v12232_v19  ;;  %7446 = vmatprep.subr.bf16.mxu0 %v8923_v55  ;;  %v9091_v55 = vcombine.high %v8832_v16, %v8836_v0  ;;  %v8748_v16 = vld [vmem:[%s12864_s7 + $0x12f0] sm:$0xff] }
 0x5bf   : > { %7486 = vmatpush1.bf16.msra.mxu1 %v9042_v56  ;;  %7517 = vmatprep.mubr.bf16.mxu1 %v12025_v57 }
 0x5c0   : > { %7487 = vmatprep.subr.bf16.mxu1 %v9051_v11  ;;  %v8962_v11 = vcombine.low %v8704_v47, %v8708_v53  ;;  %v8868_v47 = vld [vmem:[%s12864_s7 + $0x16b0] sm:$0xff] }
 0x5c1   : > { %7447 = vmatpush1.bf16.msra.mxu0 %v8922_v13  ;;  %v8840_v13 = vld [vmem:[%s12864_s7 + $0x15d0] sm:$0xff] }
 0x5c2   : > { %7448 = vmatprep.subr.bf16.mxu0 %v8931_v20  ;;  %v9099_v32 = vcombine.high %v8840_v13, %v8844_v15 }
 0x5c3   : > { %7488 = vmatpush1.bf16.msra.mxu1 %v9050_v21  ;;  %v8971_v21 = vcombine.high %v8712_v3, %v8716_v5 }
 0x5c4   : > { %7489 = vmatprep.subr.bf16.mxu1 %v9059_v14  ;;  %v8720_v14 = vld [vmem:[%s12864_s7 + $0x1210] sm:$0xff] }
 0x5c5   : > { %7449 = vmatpush1.bf16.msra.mxu0 %v8930_v63  ;;  %v8724_v63 = vld [vmem:[%s12864_s7 + $0x1230] sm:$0xff] }
 0x5c6   : > { %7450 = vmatprep.subr.bf16.mxu0 %v8939_v38  ;;  %v8970_v38 = vcombine.low %v8712_v3, %v8716_v5  ;;  %v8979_v26 = vcombine.high %v8720_v14, %v8724_v63 }
 0x5c7   : > { %7490 = vmatpush1.bf16.msra.mxu1 %v9058_v12  ;;  %v8848_v12 = vld [vmem:[%s12864_s7 + $0x1610] sm:$0xff] }
 0x5c8   : > { %7491 = vmatprep.subr.bf16.mxu1 %v9067_v59  ;;  %v9098_v59 = vcombine.low %v8840_v13, %v8844_v15  ;;  %v9107_v4 = vcombine.high %v8848_v12, %v8852_v61  ;;  %v8760_v15 = vld [vmem:[%s12864_s7 + $0x1350] sm:$0xff] }
 0x5c9   : > { %7451 = vmatpush1.bf16.msra.mxu0 %v8938_v36  ;;  %v8728_v36 = vld [vmem:[%s12864_s7 + $0x1250] sm:$0xff] }
 0x5ca   : > { %7452 = vmatprep.subr.bf16.mxu0 %v8947_v27  ;;  %v8978_v27 = vcombine.low %v8720_v14, %v8724_v63  ;;  %v8987_v33 = vcombine.high %v8728_v36, %v8732_v37 }
 0x5cb   : > { %7492 = vmatpush1.bf16.msra.mxu1 %v9066_v28  ;;  %v8856_v28 = vld [vmem:[%s12864_s7 + $0x1650] sm:$0xff] }
 0x5cc   : > { %7493 = vmatprep.subr.bf16.mxu1 %v9075_v34  ;;  %v9106_v34 = vcombine.low %v8848_v12, %v8852_v61  ;;  %v9115_v9 = vcombine.high %v8856_v28, %v8860_v29  ;;  %v8896_v61 = vld [vmem:[%s12864_s7 + $0x1790] sm:$0xff] }
 0x5cd   : > { %7453 = vmatpush1.bf16.msra.mxu0 %v8946_v35  ;;  %v8736_v35 = vld [vmem:[%s12864_s7 + $0x1290] sm:$0xff] }
 0x5ce   : > { %7454 = vmatprep.subr.bf16.mxu0 %v8955_v45  ;;  %v8986_v45 = vcombine.low %v8728_v36, %v8732_v37  ;;  %v8995_v53 = vcombine.high %v8736_v35, %v8740_v42  ;;  %v8776_v37 = vld [vmem:[%s12864_s7 + $0x13d0] sm:$0xff] }
 0x5cf   : > { %7494 = vmatpush1.bf16.msra.mxu1 %v9074_v46  ;;  %v5605_v1 = vpop.f32.mrb[32].mxu0  ;;  %v8864_v46 = vld [vmem:[%s12864_s7 + $0x1690] sm:$0xff] }
 0x5d0   : > { %v5606_v51 = vadd.f32 %v5605_v1, %v11689_v23  ;;  %v5607_v52 = vpop.f32.mrb[33].mxu0  ;;  %7495 = vmatprep.subr.bf16.mxu1 %v9083_v54  ;;  %v9114_v54 = vcombine.low %v8856_v28, %v8860_v29  ;;  %v9123_v0 = vcombine.high %v8864_v46, %v8868_v47  ;;  %v8872_v1 = vld [vmem:[%s12864_s7 + $0x16d0] sm:$0xff]  ;;  %v9122_v5 = vcombine.low %v8864_v46, %v8868_v47  ;;  %v8785_v47 = vld [vmem:[%s12864_s7 + $0x1418] sm:$0xff] }
 0x5d1   : > { %v5646_v56 = vpop.f32.mrb[32].mxu1  ;;  %v5608_v7 = vadd.f32 %v5607_v52, %v11691_v24  ;;  %v5609_v10 = vpop.f32.mrb[34].mxu0  ;;  %7455 = vmatpush1.bf16.msra.mxu0 %v8954_v17  ;;  %v8744_v17 = vld [vmem:[%s12864_s7 + $0x12d0] sm:$0xff] }
 0x5d2   : > { %v12507_v50 = vadd.f32 %v5646_v56, %v5606_v51  ;;  %v5648_v23 = vpop.f32.mrb[33].mxu1  ;;  %v5610_v20 = vpop.f32.mrb[35].mxu0  ;;  %7456 = vmatprep.subr.bf16.mxu0 %v8963_v49  ;;  %v8994_v49 = vcombine.low %v8736_v35, %v8740_v42  ;;  %v9003_v3 = vcombine.high %v8744_v17, %v8748_v16  ;;  %v8752_v51 = vld [vmem:[%s12864_s7 + $0x1310] sm:$0xff]  ;;  %v9002_v56 = vcombine.low %v8744_v17, %v8748_v16  ;;  %v8657_v42 = vld [vmem:[%s12864_s7 + $0x1018] sm:$0xff] }
 0x5d3   : > { %v12509_v25 = vadd.f32 %v5648_v23, %v5608_v7  ;;  %v5650_v24 = vpop.f32.mrb[34].mxu1  ;;  %7496 = vmatpush1.bf16.msra.mxu1 %v9082_v2  ;;  %v8876_v2 = vld [vmem:[%s12864_s7 + $0x16f0] sm:$0xff]  ;;  %v8665_v16 = vld [vmem:[%s12864_s7 + $0x1058] sm:$0xff] }
 0x5d4   : > { %v5651_v58 = vpop.f32.mrb[35].mxu1  ;;  %7497 = vmatprep.subr.bf16.mxu1 %v9091_v55  ;;  %v8756_v52 = vld [vmem:[%s12864_s7 + $0x1330] sm:$0xff]  ;;  %v9131_v55 = vcombine.high %v8872_v1, %v8876_v2  ;;  %v9130_v13 = vcombine.low %v8872_v1, %v8876_v2  ;;  %v8793_v2 = vld [vmem:[%s12864_s7 + $0x1458] sm:$0xff] }
 0x5d5   : > { %7457 = vmatpush1.bf16.msra.mxu0 %v8962_v11  ;;  %v8880_v7 = vld [vmem:[%s12864_s7 + $0x1710] sm:$0xff]  ;;  %v9011_v11 = vcombine.high %v8752_v51, %v8756_v52 }
 0x5d6   : > { %7458 = vmatprep.subr.bf16.mxu0 %v8971_v21  ;;  %v8884_v10 = vld [vmem:[%s12864_s7 + $0x1730] sm:$0xff]  ;;  %v9010_v21 = vcombine.low %v8752_v51, %v8756_v52  ;;  %v8673_v52 = vld [vmem:[%s12864_s7 + $0x1098] sm:$0xff] }
 0x5d7   : > { %7498 = vmatpush1.bf16.msra.mxu1 %v9090_v6  ;;  %v8764_v23 = vld [vmem:[%s12864_s7 + $0x1370] sm:$0xff]  ;;  %v9139_v20 = vcombine.high %v8880_v7, %v8884_v10  ;;  %v9138_v63 = vcombine.low %v8880_v7, %v8884_v10  ;;  %v8801_v10 = vld [vmem:[%s12864_s7 + $0x1498] sm:$0xff] }
 0x5d8   : > { %7499 = vmatprep.subr.bf16.mxu1 %v9099_v32  ;;  %v8888_v24 = vld [vmem:[%s12864_s7 + $0x1750] sm:$0xff]  ;;  %v9019_v14 = vcombine.high %v8760_v15, %v8764_v23  ;;  %v9018_v12 = vcombine.low %v8760_v15, %v8764_v23  ;;  %v8685_v23 = vld [vmem:[%s12864_s7 + $0x10f8] sm:$0xff] }
 0x5d9   : > { %7459 = vmatpush1.bf16.msra.mxu0 %v8970_v38  ;;  %v8892_v6 = vld [vmem:[%s12864_s7 + $0x1770] sm:$0xff] }
 0x5da   : > { %7460 = vmatprep.subr.bf16.mxu0 %v8979_v26  ;;  %v8768_v58 = vld [vmem:[%s12864_s7 + $0x1390] sm:$0xff]  ;;  %v9147_v38 = vcombine.high %v8888_v24, %v8892_v6  ;;  %v9146_v36 = vcombine.low %v8888_v24, %v8892_v6  ;;  %v8809_v24 = vld [vmem:[%s12864_s7 + $0x14d8] sm:$0xff] }
 0x5db   : > { %7500 = vmatpush1.bf16.msra.mxu1 %v9098_v59  ;;  %v8772_v32 = vld [vmem:[%s12864_s7 + $0x13b0] sm:$0xff] }
 0x5dc   : > { %7501 = vmatprep.subr.bf16.mxu1 %v9107_v4  ;;  %v8900_v26 = vld [vmem:[%s12864_s7 + $0x17b0] sm:$0xff]  ;;  %v9027_v59 = vcombine.high %v8768_v58, %v8772_v32  ;;  %v9026_v28 = vcombine.low %v8768_v58, %v8772_v32  ;;  %v8693_v58 = vld [vmem:[%s12864_s7 + $0x1138] sm:$0xff] }
 0x5dd   : > { %7461 = vmatpush1.bf16.msra.mxu0 %v8978_v27  ;;  %v8780_v4 = vld [vmem:[%s12864_s7 + $0x13f0] sm:$0xff]  ;;  %v9155_v27 = vcombine.high %v8896_v61, %v8900_v26  ;;  %v9154_v35 = vcombine.low %v8896_v61, %v8900_v26  ;;  %v8821_v61 = vld [vmem:[%s12864_s7 + $0x1538] sm:$0xff] }
 0x5de   : > { %7462 = vmatprep.subr.bf16.mxu0 %v8987_v33  ;;  %v8904_v29 = vld [vmem:[%s12864_s7 + $0x17d0] sm:$0xff]  ;;  %v9034_v46 = vcombine.low %v8776_v37, %v8780_v4 }
 0x5df   : > { %7502 = vmatpush1.bf16.msra.mxu1 %v9106_v34  ;;  %v8908_v33 = vld [vmem:[%s12864_s7 + $0x17f0] sm:$0xff]  ;;  %v9035_v34 = vcombine.high %v8776_v37, %v8780_v4  ;;  %v8701_v37 = vld [vmem:[%s12864_s7 + $0x1178] sm:$0xff] }
 0x5e0   : > { %7503 = vmatprep.subr.bf16.mxu1 %v9115_v9  ;;  %v8661_v9 = vld [vmem:[%s12864_s7 + $0x1038] sm:$0xff]  ;;  %v9162_v17 = vcombine.low %v8904_v29, %v8908_v33 }
 0x5e1   : > { %7463 = vmatpush1.bf16.msra.mxu0 %v8986_v45  ;;  %v9163_v45 = vcombine.high %v8904_v29, %v8908_v33  ;;  %v8916_v1 = vcombine.low %v8657_v42, %v8661_v9  ;;  %v8829_v29 = vld [vmem:[%s12864_s7 + $0x1578] sm:$0xff] }
 0x5e2   : > { %7464 = vmatprep.subr.bf16.mxu0 %v8995_v53  ;;  %v8789_v53 = vld [vmem:[%s12864_s7 + $0x1438] sm:$0xff] }
 0x5e3   : > { %7504 = vmatpush1.bf16.msra.mxu1 %v9114_v54  ;;  %v8917_v54 = vcombine.high %v8657_v42, %v8661_v9  ;;  %v9044_v51 = vcombine.low %v8785_v47, %v8789_v53  ;;  %v8709_v42 = vld [vmem:[%s12864_s7 + $0x11b8] sm:$0xff] }
 0x5e4   : > { %7505 = vmatprep.subr.bf16.mxu1 %v9123_v0  ;;  %v8669_v0 = vld [vmem:[%s12864_s7 + $0x1078] sm:$0xff] }
 0x5e5   : > { %7465 = vmatpush1.bf16.msra.mxu0 %v8994_v49  ;;  %v9045_v49 = vcombine.high %v8785_v47, %v8789_v53  ;;  %v8924_v7 = vcombine.low %v8665_v16, %v8669_v0  ;;  %v8837_v47 = vld [vmem:[%s12864_s7 + $0x15b8] sm:$0xff] }
 0x5e6   : > { %7466 = vmatprep.subr.bf16.mxu0 %v9003_v3  ;;  %v8797_v3 = vld [vmem:[%s12864_s7 + $0x1478] sm:$0xff] }
 0x5e7   : > { %7506 = vmatpush1.bf16.msra.mxu1 %v9122_v5  ;;  %v8925_v5 = vcombine.high %v8665_v16, %v8669_v0  ;;  %v9052_v15 = vcombine.low %v8793_v2, %v8797_v3  ;;  %v8713_v16 = vld [vmem:[%s12864_s7 + $0x11d8] sm:$0xff] }
 0x5e8   : > { %7507 = vmatprep.subr.bf16.mxu1 %v9131_v55  ;;  %v8677_v55 = vld [vmem:[%s12864_s7 + $0x10b8] sm:$0xff] }
 0x5e9   : > { %7467 = vmatpush1.bf16.msra.mxu0 %v9002_v56  ;;  %v9053_v56 = vcombine.high %v8793_v2, %v8797_v3  ;;  %v8717_v0 = vld [vmem:[%s12864_s7 + $0x11f8] sm:$0xff] }
 0x5ea   : > { %7468 = vmatprep.subr.bf16.mxu0 %v9011_v11  ;;  %v8805_v11 = vld [vmem:[%s12864_s7 + $0x14b8] sm:$0xff] }
 0x5eb   : > { %7508 = vmatpush1.bf16.msra.mxu1 %v9130_v13  ;;  %v8933_v13 = vcombine.high %v8673_v52, %v8677_v55 }
 0x5ec   : > { %7509 = vmatprep.subr.bf16.mxu1 %v9139_v20  ;;  %v9061_v20 = vcombine.high %v8801_v10, %v8805_v11 }
 0x5ed   : > { %7469 = vmatpush1.bf16.msra.mxu0 %v9010_v21  ;;  %v8932_v21 = vcombine.low %v8673_v52, %v8677_v55  ;;  %v8841_v55 = vld [vmem:[%s12864_s7 + $0x15d8] sm:$0xff] }
 0x5ee   : > { %7470 = vmatprep.subr.bf16.mxu0 %v9019_v14  ;;  %v9060_v14 = vcombine.low %v8801_v10, %v8805_v11  ;;  %v8973_v11 = vcombine.high %v8713_v16, %v8717_v0 }
 0x5ef   : > { %7510 = vmatpush1.bf16.msra.mxu1 %v9138_v63  ;;  %v8689_v63 = vld [vmem:[%s12864_s7 + $0x1118] sm:$0xff] }
 0x5f0   : > { %7511 = vmatprep.subr.bf16.mxu1 %v9147_v38  ;;  %v8949_v26 = vcombine.high %v8689_v63, %v8693_v58 }
 0x5f1   : > { %7471 = vmatpush1.bf16.msra.mxu0 %v9018_v12  ;;  %v8817_v12 = vld [vmem:[%s12864_s7 + $0x1518] sm:$0xff] }
 0x5f2   : > { %7472 = vmatprep.subr.bf16.mxu0 %v9027_v59  ;;  %v9077_v4 = vcombine.high %v8817_v12, %v8821_v61 }
 0x5f3   : > { %7512 = vmatpush1.bf16.msra.mxu1 %v9146_v36  ;;  %v8697_v36 = vld [vmem:[%s12864_s7 + $0x1158] sm:$0xff] }
 0x5f4   : > { %7513 = vmatprep.subr.bf16.mxu1 %v9155_v27  ;;  %v8948_v27 = vcombine.low %v8689_v63, %v8693_v58  ;;  %v8957_v33 = vcombine.high %v8697_v36, %v8701_v37  ;;  %v8729_v58 = vld [vmem:[%s12864_s7 + $0x1258] sm:$0xff] }
 0x5f5   : > { %7473 = vmatpush1.bf16.msra.mxu0 %v9026_v28  ;;  %v8825_v28 = vld [vmem:[%s12864_s7 + $0x1558] sm:$0xff] }
 0x5f6   : > { %7474 = vmatprep.subr.bf16.mxu0 %v9035_v34  ;;  %v9076_v34 = vcombine.low %v8817_v12, %v8821_v61  ;;  %v9085_v9 = vcombine.high %v8825_v28, %v8829_v29  ;;  %v8857_v61 = vld [vmem:[%s12864_s7 + $0x1658] sm:$0xff] }
 0x5f7   : > { %7514 = vmatpush1.bf16.msra.mxu1 %v9154_v35  ;;  %v8705_v35 = vld [vmem:[%s12864_s7 + $0x1198] sm:$0xff] }
 0x5f8   : > { %7515 = vmatprep.subr.bf16.mxu1 %v9163_v45  ;;  %v8956_v45 = vcombine.low %v8697_v36, %v8701_v37  ;;  %v8965_v53 = vcombine.high %v8705_v35, %v8709_v42  ;;  %v8964_v52 = vcombine.low %v8705_v35, %v8709_v42  ;;  %v8737_v37 = vld [vmem:[%s12864_s7 + $0x1298] sm:$0xff] }
 0x5f9   : > { %7475 = vmatpush1.bf16.msra.mxu0 %v9034_v46  ;;  %v8833_v46 = vld [vmem:[%s12864_s7 + $0x1598] sm:$0xff] }
 0x5fa   : > { %7526 = vmatprep.subr.bf16.mxu0 %v8917_v54  ;;  %v9093_v2 = vcombine.high %v8833_v46, %v8837_v47  ;;  %v8745_v42 = vld [vmem:[%s12864_s7 + $0x12d8] sm:$0xff] }
 0x5fb   : > { %7516 = vmatpush1.bf16.msra.mxu1 %v9162_v17  ;;  %v9084_v17 = vcombine.low %v8825_v28, %v8829_v29  ;;  %v8865_v29 = vld [vmem:[%s12864_s7 + $0x1698] sm:$0xff] }
 0x5fc   : > { %7477 = vmatmul.mubr.bf16.vlgmr.msra.gmra.mrb[48].mxu0 %v12222_v8  ;;  %7567 = vmatprep.subr.bf16.mxu1 %v9045_v49 }
 0x5fd   : > { %7527 = vmatpush1.bf16.msra.mxu0 %v8916_v1  ;;  %7558 = vmatprep.mubr.bf16.mxu0 %v12014_v18  ;;  %v8681_v18 = vld [vmem:[%s12864_s7 + $0x10d8] sm:$0xff] }
 0x5fe   : > { %7518 = vmatmul.mubr.bf16.vlgmr.msra.gmra.mrb[48].mxu1 %v12232_v19  ;;  %7528 = vmatprep.subr.bf16.mxu0 %v8925_v5  ;;  %v8941_v6 = vcombine.high %v8681_v18, %v8685_v23  ;;  %v8940_v38 = vcombine.low %v8681_v18, %v8685_v23  ;;  %v8721_v18 = vld [vmem:[%s12864_s7 + $0x1218] sm:$0xff] }
 0x5ff   : > { %7568 = vmatpush1.bf16.msra.mxu1 %v9044_v51  ;;  %7599 = vmatprep.mubr.bf16.mxu1 %v12025_v57  ;;  %v8813_v57 = vld [vmem:[%s12864_s7 + $0x14f8] sm:$0xff] }
 0x600   : > { %7569 = vmatprep.subr.bf16.mxu1 %v9053_v56  ;;  %v9069_v32 = vcombine.high %v8809_v24, %v8813_v57  ;;  %v9068_v59 = vcombine.low %v8809_v24, %v8813_v57  ;;  %v8845_v56 = vld [vmem:[%s12864_s7 + $0x15f8] sm:$0xff]  ;;  %v8972_v24 = vcombine.low %v8713_v16, %v8717_v0 }
 0x601   : > { %7529 = vmatpush1.bf16.msra.mxu0 %v8924_v7  ;;  %v8725_v23 = vld [vmem:[%s12864_s7 + $0x1238] sm:$0xff]  ;;  %v9100_v63 = vcombine.low %v8841_v55, %v8845_v56 }
 0x602   : > { %7530 = vmatprep.subr.bf16.mxu0 %v8933_v13  ;;  %v8849_v57 = vld [vmem:[%s12864_s7 + $0x1618] sm:$0xff]  ;;  %v8980_v12 = vcombine.low %v8721_v18, %v8725_v23 }
 0x603   : > { %7570 = vmatpush1.bf16.msra.mxu1 %v9052_v15  ;;  %v9092_v15 = vcombine.low %v8833_v46, %v8837_v47  ;;  %v8873_v47 = vld [vmem:[%s12864_s7 + $0x16d8] sm:$0xff] }
 0x604   : > { %7571 = vmatprep.subr.bf16.mxu1 %v9061_v20  ;;  %v8753_v16 = vld [vmem:[%s12864_s7 + $0x1318] sm:$0xff] }
 0x605   : > { %7531 = vmatpush1.bf16.msra.mxu0 %v8932_v21  ;;  %v9101_v21 = vcombine.high %v8841_v55, %v8845_v56  ;;  %v8757_v0 = vld [vmem:[%s12864_s7 + $0x1338] sm:$0xff] }
 0x606   : > { %7532 = vmatprep.subr.bf16.mxu0 %v8941_v6  ;;  %v8853_v6 = vld [vmem:[%s12864_s7 + $0x1638] sm:$0xff] }
 0x607   : > { %7572 = vmatpush1.bf16.msra.mxu1 %v9060_v14  ;;  %v8981_v14 = vcombine.high %v8721_v18, %v8725_v23  ;;  %v9108_v36 = vcombine.low %v8849_v57, %v8853_v6  ;;  %v8765_v55 = vld [vmem:[%s12864_s7 + $0x1378] sm:$0xff] }
 0x608   : > { %7573 = vmatprep.subr.bf16.mxu1 %v9069_v32  ;;  %v8733_v32 = vld [vmem:[%s12864_s7 + $0x1278] sm:$0xff] }
 0x609   : > { %7533 = vmatpush1.bf16.msra.mxu0 %v8940_v38  ;;  %v9109_v38 = vcombine.high %v8849_v57, %v8853_v6  ;;  %v8988_v28 = vcombine.low %v8729_v58, %v8733_v32  ;;  %v8769_v18 = vld [vmem:[%s12864_s7 + $0x1398] sm:$0xff] }
 0x60a   : > { %7534 = vmatprep.subr.bf16.mxu0 %v8949_v26  ;;  %v8861_v26 = vld [vmem:[%s12864_s7 + $0x1678] sm:$0xff] }
 0x60b   : > { %7574 = vmatpush1.bf16.msra.mxu1 %v9068_v59  ;;  %v8989_v59 = vcombine.high %v8729_v58, %v8733_v32  ;;  %v9116_v35 = vcombine.low %v8857_v61, %v8861_v26  ;;  %v8773_v23 = vld [vmem:[%s12864_s7 + $0x13b8] sm:$0xff] }
 0x60c   : > { %7575 = vmatprep.subr.bf16.mxu1 %v9077_v4  ;;  %v8741_v4 = vld [vmem:[%s12864_s7 + $0x12b8] sm:$0xff]  ;;  %v9029_v6 = vcombine.high %v8769_v18, %v8773_v23 }
 0x60d   : > { %7535 = vmatpush1.bf16.msra.mxu0 %v8948_v27  ;;  %v9117_v27 = vcombine.high %v8857_v61, %v8861_v26  ;;  %v8996_v46 = vcombine.low %v8737_v37, %v8741_v4  ;;  %v8901_v57 = vld [vmem:[%s12864_s7 + $0x17b8] sm:$0xff] }
 0x60e   : > { %7536 = vmatprep.subr.bf16.mxu0 %v8957_v33  ;;  %v8869_v33 = vld [vmem:[%s12864_s7 + $0x16b8] sm:$0xff] }
 0x60f   : > { %7576 = vmatpush1.bf16.msra.mxu1 %v9076_v34  ;;  %v5687_v54 = vpop.f32.mrb[36].mxu0  ;;  %v8997_v34 = vcombine.high %v8737_v37, %v8741_v4  ;;  %v8781_v58 = vld [vmem:[%s12864_s7 + $0x13f8] sm:$0xff] }
 0x610   : > { %v5688_v49 = vadd.f32 %v5687_v54, %v11889_v22  ;;  %v5689_v1 = vpop.f32.mrb[37].mxu0  ;;  %7577 = vmatprep.subr.bf16.mxu1 %v9085_v9  ;;  %v8749_v9 = vld [vmem:[%s12864_s7 + $0x12f8] sm:$0xff] }
 0x611   : > { %v5728_v3 = vpop.f32.mrb[36].mxu1  ;;  %v5690_v5 = vadd.f32 %v5689_v1, %v11891_v31  ;;  %v5691_v51 = vpop.f32.mrb[38].mxu0  ;;  %7537 = vmatpush1.bf16.msra.mxu0 %v8956_v45  ;;  %v9125_v45 = vcombine.high %v8865_v29, %v8869_v33  ;;  %v9005_v54 = vcombine.high %v8745_v42, %v8749_v9  ;;  %v9004_v1 = vcombine.low %v8745_v42, %v8749_v9  ;;  %v8909_v61 = vld [vmem:[%s12864_s7 + $0x17f8] sm:$0xff] }
 0x612   : > { %v12709_v7 = vadd.f32 %v5728_v3, %v5688_v49  ;;  %v5730_v22 = vpop.f32.mrb[37].mxu1  ;;  %v5692_v10 = vpop.f32.mrb[39].mxu0  ;;  %7538 = vmatprep.subr.bf16.mxu0 %v8965_v53  ;;  %v8877_v53 = vld [vmem:[%s12864_s7 + $0x16f8] sm:$0xff] }
 0x613   : > { %v12711_v13 = vadd.f32 %v5730_v22, %v5690_v5  ;;  %v5732_v31 = vpop.f32.mrb[38].mxu1  ;;  %7578 = vmatpush1.bf16.msra.mxu1 %v9084_v17  ;;  %v9124_v17 = vcombine.low %v8865_v29, %v8869_v33  ;;  %v9133_v49 = vcombine.high %v8873_v47, %v8877_v53  ;;  %v8885_v3 = vld [vmem:[%s12864_s7 + $0x1738] sm:$0xff]  ;;  %v9013_v5 = vcombine.high %v8753_v16, %v8757_v0 }
 0x614   : > { %v5733_v20 = vpop.f32.mrb[39].mxu1  ;;  %7579 = vmatprep.subr.bf16.mxu1 %v9093_v2  ;;  %v8881_v2 = vld [vmem:[%s12864_s7 + $0x1718] sm:$0xff]  ;;  %v9132_v51 = vcombine.low %v8873_v47, %v8877_v53  ;;  %v9012_v22 = vcombine.low %v8753_v16, %v8757_v0 }
 0x615   : > { %7539 = vmatpush1.bf16.msra.mxu0 %v8964_v52  ;;  %v8761_v52 = vld [vmem:[%s12864_s7 + $0x1358] sm:$0xff]  ;;  %v9141_v56 = vcombine.high %v8881_v2, %v8885_v3 }
 0x616   : > { %7540 = vmatprep.subr.bf16.mxu0 %v8973_v11  ;;  %v8889_v10 = vld [vmem:[%s12864_s7 + $0x1758] sm:$0xff]  ;;  %v9021_v31 = vcombine.high %v8761_v52, %v8765_v55 }
 0x617   : > { %7580 = vmatpush1.bf16.msra.mxu1 %v9092_v15  ;;  %v8893_v11 = vld [vmem:[%s12864_s7 + $0x1778] sm:$0xff]  ;;  %v9140_v15 = vcombine.low %v8881_v2, %v8885_v3 }
 0x618   : > { %7581 = vmatprep.subr.bf16.mxu1 %v9101_v21  ;;  %v9149_v20 = vcombine.high %v8889_v10, %v8893_v11  ;;  %v9020_v21 = vcombine.low %v8761_v52, %v8765_v55 }
 0x619   : > { %7541 = vmatpush1.bf16.msra.mxu0 %v8972_v24  ;;  %v8897_v24 = vld [vmem:[%s12864_s7 + $0x1798] sm:$0xff] }
 0x61a   : > { %7542 = vmatprep.subr.bf16.mxu0 %v8981_v14  ;;  %v9148_v14 = vcombine.low %v8889_v10, %v8893_v11  ;;  %v9157_v32 = vcombine.high %v8897_v24, %v8901_v57  ;;  %v7636_v11 = vsub.s32 4, %v10208_v39 }
 0x61b   : > { %7582 = vmatpush1.bf16.msra.mxu1 %v9100_v63  ;;  %v8777_v63 = vld [vmem:[%s12864_s7 + $0x13d8] sm:$0xff] }
 0x61c   : > { %7583 = vmatprep.subr.bf16.mxu1 %v9109_v38  ;;  %v9028_v38 = vcombine.low %v8769_v18, %v8773_v23  ;;  %v9037_v26 = vcombine.high %v8777_v63, %v8781_v58  ;;  %v9036_v37 = vcombine.low %v8777_v63, %v8781_v58 }
 0x61d   : > { %7543 = vmatpush1.bf16.msra.mxu0 %v8980_v12  ;;  %v8905_v12 = vld [vmem:[%s12864_s7 + $0x17d8] sm:$0xff] }
 0x61e   : > { %7544 = vmatprep.subr.bf16.mxu0 %v8989_v59  ;;  %v9156_v59 = vcombine.low %v8897_v24, %v8901_v57  ;;  %v9164_v4 = vcombine.low %v8905_v12, %v8909_v61 }
 0x61f   : > { %7584 = vmatpush1.bf16.msra.mxu1 %v9108_v36  ;;  %v9165_v36 = vcombine.high %v8905_v12, %v8909_v61  ;;  %v7648_v61 = vsub.s32 7, %v10208_v39 }
 0x620   : > { %7585 = vmatprep.subr.bf16.mxu1 %v9117_v27 }
 0x621   : > { %7545 = vmatpush1.bf16.msra.mxu0 %v8988_v28  ;;  %v12814_v28 = vld [vmem:[%s12865_s8] sm:$0xff] }
 0x622   : > { %7546 = vmatprep.subr.bf16.mxu0 %v8997_v34  ;;  %v7621_v42 = vrot.slane %v12814_v28, %v10211_v40 }
 0x623   : > { %7586 = vmatpush1.bf16.msra.mxu1 %v9116_v35 }
 0x624   : > { %7587 = vmatprep.subr.bf16.mxu1 %v9125_v45 }
 0x625   : > { %7547 = vmatpush1.bf16.msra.mxu0 %v8996_v46 }
 0x626   : > { %7548 = vmatprep.subr.bf16.mxu0 %v9005_v54 }
 0x627   : > { %7588 = vmatpush1.bf16.msra.mxu1 %v9124_v17 }
 0x628   : > { %7589 = vmatprep.subr.bf16.mxu1 %v9133_v49 }
 0x629   : > { %7549 = vmatpush1.bf16.msra.mxu0 %v9004_v1  ;;  %v7629_v1 = vrot.slane %v12814_v28, %v10214_v41  ;;  %v7640_v41 = vsub.s32 5, %v10208_v39 }
 0x62a   : > { %7550 = vmatprep.subr.bf16.mxu0 %v9013_v5 }
 0x62b   : > { %7590 = vmatpush1.bf16.msra.mxu1 %v9132_v51  ;;  %v7641_v24 = vrot.slane %v12814_v28, %v7640_v41 }
 0x62c   : > { %7591 = vmatprep.subr.bf16.mxu1 %v9141_v56 }
 0x62d   : > { %7551 = vmatpush1.bf16.msra.mxu0 %v9012_v22 }
 0x62e   : > { %7552 = vmatprep.subr.bf16.mxu0 %v9021_v31 }
 0x62f   : > { %7592 = vmatpush1.bf16.msra.mxu1 %v9140_v15 }
 0x630   : > { %7593 = vmatprep.subr.bf16.mxu1 %v9149_v20 }
 0x631   : > { %7553 = vmatpush1.bf16.msra.mxu0 %v9020_v21 }
 0x632   : > { %7554 = vmatprep.subr.bf16.mxu0 %v9029_v6 }
 0x633   : > { %7594 = vmatpush1.bf16.msra.mxu1 %v9148_v14 }
 0x634   : > { %7595 = vmatprep.subr.bf16.mxu1 %v9157_v32 }
 0x635   : > { %7555 = vmatpush1.bf16.msra.mxu0 %v9028_v38  ;;  %v7644_v38 = vsub.s32 6, %v10208_v39 }
 0x636   : > { %7556 = vmatprep.subr.bf16.mxu0 %v9037_v26 }
 0x637   : > { %7596 = vmatpush1.bf16.msra.mxu1 %v9156_v59 }
 0x638   : > { %7597 = vmatprep.subr.bf16.mxu1 %v9165_v36 }
 0x639   : > { %7557 = vmatpush1.bf16.msra.mxu0 %v9036_v37 }
 0x63b   : > { %7598 = vmatpush1.bf16.msra.mxu1 %v9164_v4 }
 0x63c   : > { %7559 = vmatmul.mubr.bf16.vlgmr.msra.gmra.mrb[52].mxu0 %v12222_v8  ;;  %v7625_v8 = vrot.slane %v12814_v28, %v10220_v43 }
 0x63e   : > { %7600 = vmatmul.mubr.bf16.vlgmr.msra.gmra.mrb[52].mxu1 %v12232_v19 }
 0x64f   : > { %v7314_v27 = vpop.f32.mrb[40].mxu0 }
 0x650   : > { %v7316_v29 = vpop.f32.mrb[41].mxu0 }
 0x651   : > { %v7355_v33 = vpop.f32.mrb[40].mxu1  ;;  %v7318_v34 = vpop.f32.mrb[42].mxu0 }
 0x652   : > { %v7356_v35 = vadd.f32 %v7355_v33, %v7314_v27  ;;  %v7357_v9 = vpop.f32.mrb[41].mxu1  ;;  %v7319_v45 = vpop.f32.mrb[43].mxu0 }
 0x653   : > { %v7358_v46 = vadd.f32 %v7357_v9, %v7316_v29  ;;  %v7359_v19 = vpop.f32.mrb[42].mxu1  ;;  %v7649_v29 = vrot.slane %v12814_v28, %v7648_v61 }
 0x654   : > { %v7608_v47 = vadd.f32 %v7356_v35, %v12097_v62  ;;  %v7360_v53 = vpop.f32.mrb[43].mxu1 }
 0x655   : > { %v7609_v54 = vadd.f32 %v7358_v46, %v12099_v60  ;;  %v7633_v60 = vrot.slane %v12814_v28, %v10223_v44 }
 0x656   : > { %v7658_v40 = vadd.f32 %v7621_v42, %v7608_v47 }
 0x657   : > { %v7659_v17 = vadd.f32 %v7625_v8, %v7609_v54 }
 0x658   : > { %7666 = vst [vmem:[%s12825_s18] sm:$0xff] %v7658_v40 }
 0x659   : > { %7667 = vst [vmem:[%s12825_s18 + $0x8] sm:$0xff] %v7659_v17 }
 0x68f   : > { %v7396_v16 = vpop.f32.mrb[44].mxu0 }
 0x690   : > { %v7398_v43 = vpop.f32.mrb[45].mxu0 }
 0x691   : > { %v7437_v0 = vpop.f32.mrb[44].mxu1  ;;  %v7400_v62 = vpop.f32.mrb[46].mxu0 }
 0x692   : > { %v7438_v49 = vadd.f32 %v7437_v0, %v7396_v16  ;;  %v7439_v2 = vpop.f32.mrb[45].mxu1  ;;  %v7401_v3 = vpop.f32.mrb[47].mxu0 }
 0x693   : > { %v7440_v5 = vadd.f32 %v7439_v2, %v7398_v43  ;;  %v7441_v51 = vpop.f32.mrb[46].mxu1 }
 0x694   : > { %v7610_v52 = vadd.f32 %v7438_v49, %v12305_v48  ;;  %v7442_v55 = vpop.f32.mrb[47].mxu1  ;;  %v7637_v48 = vrot.slane %v12814_v28, %v7636_v11 }
 0x695   : > { %v7611_v56 = vadd.f32 %v7440_v5, %v12307_v30 }
 0x696   : > { %v7660_v22 = vadd.f32 %v7629_v1, %v7610_v52 }
 0x697   : > { %v7661_v10 = vadd.f32 %v7633_v60, %v7611_v56 }
 0x698   : > { %7668 = vst [vmem:[%s12825_s18 + $0x10] sm:$0xff] %v7660_v22 }
 0x699   : > { %7669 = vst [vmem:[%s12825_s18 + $0x18] sm:$0xff] %v7661_v10 }
 0x6cf   : > { %v7478_v31 = vpop.f32.mrb[48].mxu0 }
 0x6d0   : > { %v7480_v15 = vpop.f32.mrb[49].mxu0 }
 0x6d1   : > { %v7519_v18 = vpop.f32.mrb[48].mxu1  ;;  %v7482_v44 = vpop.f32.mrb[50].mxu0 }
 0x6d2   : > { %v7520_v23 = vadd.f32 %v7519_v18, %v7478_v31  ;;  %v7521_v20 = vpop.f32.mrb[49].mxu1  ;;  %v7483_v21 = vpop.f32.mrb[51].mxu0 }
 0x6d3   : > { %v7522_v30 = vadd.f32 %v7521_v20, %v7480_v15  ;;  %v7523_v57 = vpop.f32.mrb[50].mxu1 }
 0x6d4   : > { %v7612_v6 = vadd.f32 %v7520_v23, %v12507_v50  ;;  %v7524_v14 = vpop.f32.mrb[51].mxu1  ;;  %v7645_v50 = vrot.slane %v12814_v28, %v7644_v38 }
 0x6d5   : > { %v7613_v63 = vadd.f32 %v7522_v30, %v12509_v25 }
 0x6d6   : > { %v7662_v58 = vadd.f32 %v7637_v48, %v7612_v6 }
 0x6d7   : > { %v7663_v32 = vadd.f32 %v7641_v24, %v7613_v63 }
 0x6d8   : > { %7670 = vst [vmem:[%s12825_s18 + $0x20] sm:$0xff] %v7662_v58 }
 0x6d9   : > { %7671 = vst [vmem:[%s12825_s18 + $0x28] sm:$0xff] %v7663_v32 }
 0x70f   : > { %v7560_v12 = vpop.f32.mrb[52].mxu0 }
 0x710   : > { %v7562_v26 = vpop.f32.mrb[53].mxu0 }
 0x711   : > { %v7601_v59 = vpop.f32.mrb[52].mxu1  ;;  %v7564_v36 = vpop.f32.mrb[54].mxu0 }
 0x712   : > { %v7602_v37 = vadd.f32 %v7601_v59, %v7560_v12  ;;  %v7603_v4 = vpop.f32.mrb[53].mxu1  ;;  %v7565_v27 = vpop.f32.mrb[55].mxu0 }
 0x713   : > { %v7604_v25 = vadd.f32 %v7603_v4, %v7562_v26  ;;  %v7605_v33 = vpop.f32.mrb[54].mxu1 }
 0x714   : > { %v7614_v34 = vadd.f32 %v7602_v37, %v12709_v7  ;;  %v7606_v35 = vpop.f32.mrb[55].mxu1 }
 0x715   : > { %v7615_v42 = vadd.f32 %v7604_v25, %v12711_v13 }
 0x716   : > { %v7664_v39 = vadd.f32 %v7645_v50, %v7614_v34 }
 0x717   : > { %v7665_v9 = vadd.f32 %v7649_v29, %v7615_v42 }
 0x718   : > { %7672 = vst [vmem:[%s12825_s18 + $0x30] sm:$0xff] %v7664_v39 }
 0x719   : > { %7673 = vst [vmem:[%s12825_s18 + $0x38] sm:$0xff] %v7665_v9 }
 0x71a PF: > { %s19_s30 = sadd.s32 1, %s9550_s30  }
 0x71b   : > { %p16_p4 = scmp.ge.s32.totalorder %s19_s30, 4  }
 0x71d   :  { %18 = sbr.rel (!%p16_p4) target bundleno = 1 (0x1), region = 88 }

</bundles_post_ra>
